<compile_context>
chip_gen: v6e
topology: v6e:2x2x1
jax: 0.10.0
libtpu: 0.0.40
codegen_flags: <defaults>
</compile_context>

<pallas_src>
import jax
import jax.numpy as jnp
import numpy as np
from jax.experimental import pallas as pl
from jax.experimental.pallas import tpu as pltpu

REAL_DIM = 3
FEATURE_DIM = 32
HIDDEN_DIM = 64
OUT_DIM = 16 + REAL_DIM * (1 + 2 * REAL_DIM)   # 37
ACTNORM_EPS = 1e-6

LANE = 128          # element-wise chunk width (lane axis)
MAX_TILE = 8192     # batch samples per grid step


# --------------------------------------------------------------------------
# quaternion-candidate affine map: cand(16) = A @ m(9) + c   (pytorch3d order)
# rows r = 4k + j ; diagonal rows (r = 5k) are t_k = 1 +- m00 +- m11 +- m22.
# --------------------------------------------------------------------------
def _build_candidate_map():
    A = np.zeros((16, 9), np.float32)
    c = np.zeros((16, 1), np.float32)
    m = lambda a, b: 3 * a + b
    diag_sign = [(1., 1., 1.), (1., -1., -1.), (-1., 1., -1.), (-1., -1., 1.)]
    for k, (s00, s11, s22) in enumerate(diag_sign):
        r = 5 * k
        c[r, 0] = 1.0
        A[r, m(0, 0)], A[r, m(1, 1)], A[r, m(2, 2)] = s00, s11, s22
    off = {
        1:  [(m(2, 1), 1.), (m(1, 2), -1.)],
        2:  [(m(0, 2), 1.), (m(2, 0), -1.)],
        3:  [(m(1, 0), 1.), (m(0, 1), -1.)],
        4:  [(m(2, 1), 1.), (m(1, 2), -1.)],
        6:  [(m(1, 0), 1.), (m(0, 1), 1.)],
        7:  [(m(0, 2), 1.), (m(2, 0), 1.)],
        8:  [(m(0, 2), 1.), (m(2, 0), -1.)],
        9:  [(m(1, 0), 1.), (m(0, 1), 1.)],
        11: [(m(1, 2), 1.), (m(2, 1), 1.)],
        12: [(m(1, 0), 1.), (m(0, 1), -1.)],
        13: [(m(0, 2), 1.), (m(2, 0), 1.)],
        14: [(m(2, 1), 1.), (m(1, 2), 1.)],
    }
    for r, terms in off.items():
        for idx, coef in terms:
            A[r, idx] = coef
    return jnp.asarray(A), jnp.asarray(c)


def _det4(m):
    # Laplace expansion along the first two rows (shared 2x2 minors).
    s0 = m[0][0] * m[1][1] - m[0][1] * m[1][0]
    s1 = m[0][0] * m[1][2] - m[0][2] * m[1][0]
    s2 = m[0][0] * m[1][3] - m[0][3] * m[1][0]
    s3 = m[0][1] * m[1][2] - m[0][2] * m[1][1]
    s4 = m[0][1] * m[1][3] - m[0][3] * m[1][1]
    s5 = m[0][2] * m[1][3] - m[0][3] * m[1][2]
    c5 = m[2][2] * m[3][3] - m[2][3] * m[3][2]
    c4 = m[2][1] * m[3][3] - m[2][3] * m[3][1]
    c3 = m[2][1] * m[3][2] - m[2][2] * m[3][1]
    c2 = m[2][0] * m[3][3] - m[2][3] * m[3][0]
    c1 = m[2][0] * m[3][2] - m[2][2] * m[3][0]
    c0 = m[2][0] * m[3][1] - m[2][1] * m[3][0]
    return s0 * c5 - s1 * c4 + s2 * c3 + s3 * c2 - s4 * c1 + s5 * c0


# --------------------------------------------------------------------------
# main kernel
# --------------------------------------------------------------------------
def c16tr_kernel(feat_ref, rot_ref, vec_ref,
                 w1t_ref, b1_ref, w2t_ref, b2_ref,
                 amat_ref, cbias_ref, eye3_ref,
                 wp_ref, ssign_ref, ldjc_ref,
                 trot_ref, tvec_ref, ldj_ref, stat_ref,
                 nf_buf, cand_buf, vt_buf, acc_ref):
    f32 = jnp.float32
    hp = jax.lax.Precision.HIGHEST
    tile = feat_ref.shape[0]
    mm = 256 if tile % 256 == 0 else LANE        # matmul N per MXU call
    n_mm = tile // mm
    n_ck = tile // LANE

    # ---------------- stage A: per-tile MXU work into VMEM scratch ---------
    # TODO(synk): BasicMLP definition not provided upstream; assumed
    # Linear -> ReLU -> Linear (the mask only affects apply_mask(), not forward).
    @pl.loop(0, n_mm)
    def _mm(s):
        c0 = pl.multiple_of(s * mm, LANE)
        cols = pl.ds(c0, mm)
        x = feat_ref[cols, :]                                    # (mm, 32)
        h = jax.lax.dot_general(w1t_ref[...], x, (((1,), (1,)), ((), ())),
                                precision=hp, preferred_element_type=f32)
        h = jnp.maximum(h + b1_ref[...], 0.0)                    # (64, mm)
        nf = jax.lax.dot_general(w2t_ref[...], h, (((1,), (0,)), ((), ())),
                                 precision=hp, preferred_element_type=f32)
        nf_buf[:, cols] = nf + b2_ref[...]                       # (37, mm)

        r = rot_ref[cols, :]                                     # (mm, 9)
        cand = jax.lax.dot_general(amat_ref[...], r, (((1,), (1,)), ((), ())),
                                   precision=hp, preferred_element_type=f32)
        cand_buf[:, cols] = cand + cbias_ref[...]                # (16, mm)

        v = vec_ref[cols, :]                                     # (mm, 3)
        vt_buf[:, cols] = jax.lax.dot_general(
            eye3_ref[...], v, (((1,), (1,)), ((), ())),
            precision=hp, preferred_element_type=f32)            # (3, mm)

    acc_ref[...] = jnp.zeros_like(acc_ref)

    wp = [[wp_ref[a, b] for b in range(3)] for a in range(3)]
    ssg = [ssign_ref[0, c] for c in range(3)]
    ldj_c = ldjc_ref[0, 0]

    # ---------------- stage B: element-wise math on 128-lane chunks --------
    @pl.loop(0, n_ck)
    def _ck(ci):
        off = pl.multiple_of(ci * LANE, LANE)
        cols = pl.ds(off, LANE)

        def nfr(i):
            return nf_buf[pl.ds(i, 1), cols]                     # (1, 128)

        def cdr(i):
            return cand_buf[pl.ds(i, 1), cols]

        # -- matrix_to_quaternion: first-max candidate selection ------------
        q_abs = [jnp.sqrt(jnp.maximum(cdr(5 * k), 0.0)) for k in range(4)]
        qmax = jnp.maximum(jnp.maximum(q_abs[0], q_abs[1]),
                           jnp.maximum(q_abs[2], q_abs[3]))
        taken = jnp.zeros((1, LANE), jnp.bool_)
        sel = jnp.zeros((4, LANE), f32)
        den = jnp.zeros((1, LANE), f32)
        for k in range(4):
            best = jnp.logical_and(q_abs[k] == qmax, jnp.logical_not(taken))
            sel = sel + jnp.where(best, cand_buf[pl.ds(4 * k, 4), cols], 0.0)
            den = den + jnp.where(best, q_abs[k], 0.0)
            taken = jnp.logical_or(taken, best)
        quat4 = sel * (0.5 / jnp.maximum(den, 0.1))              # exact divide
        quat = [quat4[j:j + 1, :] for j in range(4)]

        # -- so3 = nf[:16].reshape(4,4) + I ; q2 = so3 @ quat ; log|det so3| -
        so3 = [[nfr(4 * i + j) + (1.0 if i == j else 0.0) for j in range(4)]
               for i in range(4)]
        q2 = [so3[i][0] * quat[0] + so3[i][1] * quat[1]
              + so3[i][2] * quat[2] + so3[i][3] * quat[3] for i in range(4)]
        ldj = jnp.log(jnp.abs(_det4(so3)))

        # -- log|det real| = log|det w_p| + sum log|s_sign| + sum w_s --------
        ws = [nfr(34 + c) for c in range(3)]
        ldj = ldj + ws[0] + ws[1] + ws[2] + ldj_c

        # -- t_vector = w_p @ L @ U @ vector ---------------------------------
        ud = [ssg[c] * jnp.exp(ws[c]) for c in range(3)]
        l10, l20, l21 = nfr(19), nfr(22), nfr(23)
        u01, u02, u12 = nfr(26), nfr(27), nfr(30)
        v0 = vt_buf[pl.ds(0, 1), cols]
        v1 = vt_buf[pl.ds(1, 1), cols]
        v2 = vt_buf[pl.ds(2, 1), cols]
        y0 = ud[0] * v0 + u01 * v1 + u02 * v2
        y1 = ud[1] * v1 + u12 * v2
        y2 = ud[2] * v2
        z0 = y0
        z1 = l10 * y0 + y1
        z2 = l20 * y0 + l21 * y1 + y2
        tv = [wp[a][0] * z0 + wp[a][1] * z1 + wp[a][2] * z2 for a in range(3)]
        tv3 = jnp.concatenate(tv, axis=0)                        # (3, 128)
        tvec_ref[:, cols] = tv3
        acc_ref[0:3, :] = acc_ref[0:3, :] + tv3                  # ActNorm stats
        acc_ref[3:6, :] = acc_ref[3:6, :] + tv3 * tv3

        # -- ldj += -4 log|q2|  ( == -2 log |q2|^2 ) --------------------------
        nsq = (q2[0] * q2[0] + q2[1] * q2[1]
               + q2[2] * q2[2] + q2[3] * q2[3])
        ldj_ref[:, cols] = ldj - 2.0 * jnp.log(nsq)

        # -- quaternion_to_matrix (scale invariant -> no normalization) ------
        two_s = 2.0 / nsq                                        # exact divide
        r_, i_, j_, k_ = q2
        rows = [1.0 - two_s * (j_ * j_ + k_ * k_), two_s * (i_ * j_ - k_ * r_),
                two_s * (i_ * k_ + j_ * r_),
                two_s * (i_ * j_ + k_ * r_), 1.0 - two_s * (i_ * i_ + k_ * k_),
                two_s * (j_ * k_ - i_ * r_),
                two_s * (i_ * k_ - j_ * r_), two_s * (j_ * k_ + i_ * r_),
                1.0 - two_s * (i_ * i_ + j_ * j_)]
        trot_ref[:, cols] = jnp.concatenate(rows, axis=0)

    stat_ref[...] = acc_ref[...]


# --------------------------------------------------------------------------
# wrapper
# --------------------------------------------------------------------------
def _tile_plan(n):
    n128 = ((n + LANE - 1) // LANE) * LANE
    if n128 <= MAX_TILE:
        # keep >=2 grid steps when possible so v7x's two TensorCores get work
        tile = n128 if n128 <= LANE else ((n128 // 2 + LANE - 1) // LANE) * LANE
    else:
        nt = (n128 + MAX_TILE - 1) // MAX_TILE
        tile = (((n128 + nt - 1) // nt + LANE - 1) // LANE) * LANE
    n_pad = ((n128 + tile - 1) // tile) * tile
    return tile, n_pad, n_pad // tile


def _vspec(shape, index_map):
    return pl.BlockSpec(shape, index_map)


def _smem_spec(shape):
    return pl.BlockSpec(shape, lambda i: (0, 0),
                        memory_space=pltpu.MemorySpace.SMEM)


@jax.jit
def condition16transr_forward(feature, rotation, vector, params):
    f32 = jnp.float32
    n = feature.shape[0]
    tile, n_pad, num_tiles = _tile_plan(n)
    pad = n_pad - n

    # natural (batch-major) layouts; only padding, no transposes
    feat_p = jnp.pad(feature.astype(f32), ((0, pad), (0, 0)))
    rot_p = jnp.pad(rotation.reshape(n, 9).astype(f32), ((0, pad), (0, 0)))
    vec_p = jnp.pad(vector.astype(f32), ((0, pad), (0, 0)))

    w1t = params['w1'].T.astype(f32)                        # (64, 32)
    b1c = params['b1'].reshape(HIDDEN_DIM, 1).astype(f32)
    w2t = params['w2'].T.astype(f32)                        # (37, 64)
    b2c = params['b2'].reshape(OUT_DIM, 1).astype(f32)
    amat, cbias = _build_candidate_map()
    eye3 = jnp.eye(3, dtype=f32)
    wp = params['w_p'].astype(f32)
    ssign = params['s_sign'].astype(f32)
    ldj_const = (jnp.log(jnp.abs(jnp.linalg.det(wp)))
                 + jnp.sum(jnp.log(jnp.abs(ssign)))).reshape(1, 1)

    in_specs = [
        _vspec((tile, FEATURE_DIM), lambda i: (i, 0)),
        _vspec((tile, 9), lambda i: (i, 0)),
        _vspec((tile, REAL_DIM), lambda i: (i, 0)),
        _vspec((HIDDEN_DIM, FEATURE_DIM), lambda i: (0, 0)),
        _vspec((HIDDEN_DIM, 1), lambda i: (0, 0)),
        _vspec((OUT_DIM, HIDDEN_DIM), lambda i: (0, 0)),
        _vspec((OUT_DIM, 1), lambda i: (0, 0)),
        _vspec((16, 9), lambda i: (0, 0)),
        _vspec((16, 1), lambda i: (0, 0)),
        _vspec((3, 3), lambda i: (0, 0)),
        _smem_spec((3, 3)),
        _smem_spec((1, 3)),
        _smem_spec((1, 1)),
    ]
    out_shape = (jax.ShapeDtypeStruct((9, n_pad), f32),
                 jax.ShapeDtypeStruct((REAL_DIM, n_pad), f32),
                 jax.ShapeDtypeStruct((1, n_pad), f32),
                 jax.ShapeDtypeStruct((6, num_tiles * LANE), f32))
    out_specs = (_vspec((9, tile), lambda i: (0, i)),
                 _vspec((REAL_DIM, tile), lambda i: (0, i)),
                 _vspec((1, tile), lambda i: (0, i)),
                 _vspec((6, LANE), lambda i: (0, i)))
    scratch = [pltpu.VMEM((OUT_DIM, tile), f32),   # nf
               pltpu.VMEM((16, tile), f32),        # quaternion candidates
               pltpu.VMEM((REAL_DIM, tile), f32),  # vector^T
               pltpu.VMEM((6, LANE), f32)]         # ActNorm partial sums

    trot_o, tvec_o, ldj_o, stat_o = pl.pallas_call(
        c16tr_kernel,
        grid=(num_tiles,),
        in_specs=in_specs,
        out_specs=out_specs,
        out_shape=out_shape,
        scratch_shapes=scratch,
        compiler_params=pltpu.CompilerParams(
            dimension_semantics=("parallel",),
            vmem_limit_bytes=32 * 1024 * 1024),
    )(feat_p, rot_p, vec_p, w1t, b1c, w2t, b2c, amat, cbias, eye3,
      wp, ssign, ldj_const)

    # ---- ActNorm init + affine (trivial, fused by XLA) ---------------------
    s = jnp.sum(stat_o, axis=1)                 # padded lanes contribute 0
    mean = s[0:3] / n
    var = (s[3:6] - n * mean * mean) / (n - 1.0)
    bias = -mean
    scale = -jnp.log(jnp.sqrt(var) + ACTNORM_EPS)

    trot = trot_o[:, :n].T.reshape(n, 3, 3)
    tvec = (tvec_o[:, :n].T + bias) * jnp.exp(scale)
    ldj = ldj_o[0, :n] + jnp.sum(scale)
    return trot, tvec, ldj


# ---------------------------- pure-JAX reference ----------------------------
def _matrix_to_quaternion(matrix):
    m = matrix.reshape(matrix.shape[0], 9)
    m00, m01, m02, m10, m11, m12, m20, m21, m22 = [m[:, i] for i in range(9)]
    q_abs = jnp.sqrt(jnp.maximum(jnp.stack([
        1.0 + m00 + m11 + m22,
        1.0 + m00 - m11 - m22,
        1.0 - m00 + m11 - m22,
        1.0 - m00 - m11 + m22], axis=-1), 0.0))
    cand = jnp.stack([
        jnp.stack([q_abs[:, 0] ** 2, m21 - m12, m02 - m20, m10 - m01], axis=-1),
        jnp.stack([m21 - m12, q_abs[:, 1] ** 2, m10 + m01, m02 + m20], axis=-1),
        jnp.stack([m02 - m20, m10 + m01, q_abs[:, 2] ** 2, m12 + m21], axis=-1),
        jnp.stack([m10 - m01, m02 + m20, m21 + m12, q_abs[:, 3] ** 2], axis=-1),
    ], axis=-2)
    cand = cand / (2.0 * jnp.maximum(q_abs, 0.1))[..., None]
    idx = jnp.argmax(q_abs, axis=-1)
    return jnp.take_along_axis(cand, idx[:, None, None], axis=1)[:, 0, :]


def _quaternion_to_matrix(q):
    r, i, j, k = q[:, 0], q[:, 1], q[:, 2], q[:, 3]
    two_s = 2.0 / jnp.sum(q * q, axis=-1)
    o = jnp.stack([
        1 - two_s * (j * j + k * k), two_s * (i * j - k * r), two_s * (i * k + j * r),
        two_s * (i * j + k * r), 1 - two_s * (i * i + k * k), two_s * (j * k - i * r),
        two_s * (i * k - j * r), two_s * (j * k + i * r), 1 - two_s * (i * i + j * j)],
        axis=-1)
    return o.reshape(-1, 3, 3)


def reference_forward(feature, rotation, vector, params):
    hp = jax.lax.Precision.HIGHEST
    d = REAL_DIM
    h = jnp.maximum(jnp.dot(feature, params['w1'], precision=hp) + params['b1'], 0.0)
    nf = jnp.dot(h, params['w2'], precision=hp) + params['b2']
    so3 = nf[:, :16].reshape(-1, 4, 4) + jnp.eye(4, dtype=jnp.float32)
    wl = nf[:, 16:16 + d * d].reshape(-1, d, d)
    wu = nf[:, 16 + d * d:16 + 2 * d * d].reshape(-1, d, d)
    ws = nf[:, 16 + 2 * d * d:]
    u_mask = jnp.triu(jnp.ones((d, d), jnp.float32), 1)
    L = wl * u_mask.T + jnp.eye(d, dtype=jnp.float32)
    U = wu * u_mask + jnp.diag(params['s_sign'][0])[None] * jnp.exp(ws)[:, None, :]
    real = jnp.einsum('ab,nbc,ncd->nad', params['w_p'], L, U, precision=hp)
    quat = _matrix_to_quaternion(rotation)
    quat2 = jnp.einsum('nij,nj->ni', so3, quat, precision=hp)
    length = jnp.linalg.norm(quat2, axis=-1, keepdims=True)
    tvec = jnp.einsum('nab,nb->na', real, vector, precision=hp)
    trot = _quaternion_to_matrix(quat2 / length)
    ldj = (jnp.log(jnp.abs(jnp.linalg.det(so3)))
           + jnp.log(jnp.abs(jnp.linalg.det(real)))
           - 4.0 * jnp.log(length[:, 0]))
    bias = -tvec.mean(axis=0)
    scale = -jnp.log(tvec.std(axis=0, ddof=1) + ACTNORM_EPS)
    out_vec = (tvec + bias) * jnp.exp(scale)
    return trot, out_vec, ldj + scale.sum()


if __name__ == "__main__":
    B = 8
    key = jax.random.PRNGKey(0)
    ks = jax.random.split(key, 6)

    params = dict(
        w1=0.1 * jax.random.normal(ks[0], (FEATURE_DIM, HIDDEN_DIM), jnp.float32),
        b1=jnp.zeros((1, HIDDEN_DIM), jnp.float32),
        w2=0.1 * jax.random.normal(ks[1], (HIDDEN_DIM, OUT_DIM), jnp.float32),
        b2=jnp.zeros((1, OUT_DIM), jnp.float32),
    )
    # ConditionLU buffers (QR + LU of a random matrix, as in __init__)
    w0 = jax.random.normal(ks[2], (REAL_DIM, REAL_DIM), jnp.float32)
    q_mat, _ = jnp.linalg.qr(w0)
    w_p, _, u_mat = jax.scipy.linalg.lu(q_mat)
    params['w_p'] = jnp.asarray(w_p, jnp.float32)
    params['s_sign'] = jnp.sign(jnp.diag(u_mat)).reshape(1, REAL_DIM).astype(jnp.float32)

    # inputs: valid random rotation matrices, vectors, conditioning features
    qraw = jax.random.normal(ks[3], (B, 4), jnp.float32)
    rotation = _quaternion_to_matrix(qraw / jnp.linalg.norm(qraw, axis=-1, keepdims=True))
    vector = jax.random.normal(ks[4], (B, REAL_DIM), jnp.float32)
    feature = jax.random.normal(ks[5], (B, FEATURE_DIM), jnp.float32)

    trot, tvec, ldj = condition16transr_forward(feature, rotation, vector, params)
    jax.block_until_ready((trot, tvec, ldj))

    ref_rot, ref_vec, ref_ldj = reference_forward(feature, rotation, vector, params)
    assert np.allclose(np.asarray(trot), np.asarray(ref_rot), atol=1e-3, rtol=1e-3)
    assert np.allclose(np.asarray(tvec), np.asarray(ref_vec), atol=1e-3, rtol=1e-3)
    assert np.allclose(np.asarray(ldj), np.asarray(ref_ldj), atol=1e-3, rtol=1e-3)
    print("KERNEL_OK")
</pallas_src>

<mosaic_0001>
module attributes {stable_mosaic.version = 11 : i64} {
  func.func @c16tr_kernel(%arg0: i32, %arg1: memref<128x32xf32, #tpu.memory_space<vmem>>, %arg2: memref<128x9xf32, #tpu.memory_space<vmem>>, %arg3: memref<128x3xf32, #tpu.memory_space<vmem>>, %arg4: memref<64x32xf32, #tpu.memory_space<vmem>>, %arg5: memref<64x1xf32, #tpu.memory_space<vmem>>, %arg6: memref<37x64xf32, #tpu.memory_space<vmem>>, %arg7: memref<37x1xf32, #tpu.memory_space<vmem>>, %arg8: memref<16x9xf32, #tpu.memory_space<vmem>>, %arg9: memref<16x1xf32, #tpu.memory_space<vmem>>, %arg10: memref<3x3xf32, #tpu.memory_space<vmem>>, %arg11: memref<3x3xf32, #tpu.memory_space<smem>>, %arg12: memref<1x3xf32, #tpu.memory_space<smem>>, %arg13: memref<1x1xf32, #tpu.memory_space<smem>>, %arg14: memref<9x128xf32, #tpu.memory_space<vmem>>, %arg15: memref<3x128xf32, #tpu.memory_space<vmem>>, %arg16: memref<1x128xf32, #tpu.memory_space<vmem>>, %arg17: memref<6x128xf32, #tpu.memory_space<vmem>>, %arg18: memref<37x128xf32, #tpu.memory_space<vmem>>, %arg19: memref<16x128xf32, #tpu.memory_space<vmem>>, %arg20: memref<3x128xf32, #tpu.memory_space<vmem>>, %arg21: memref<6x128xf32, #tpu.memory_space<vmem>>) attributes {dimension_semantics = [#tpu.dimension_semantics<parallel>], iteration_bounds = array<i64: 1>, scalar_prefetch = 0 : i64, scratch_operands = 4 : i64, tpu.core_type = #tpu.core_type<tc>, window_params = [{transform_indices = @transform_0, window_bounds = array<i64: 128, 32>}, {transform_indices = @transform_1, window_bounds = array<i64: 128, 9>}, {transform_indices = @transform_2, window_bounds = array<i64: 128, 3>}, {pipeline_mode = #tpu.pipeline_mode<synchronous>, transform_indices = @transform_3, window_bounds = array<i64: 64, 32>}, {pipeline_mode = #tpu.pipeline_mode<synchronous>, transform_indices = @transform_4, window_bounds = array<i64: 64, 1>}, {pipeline_mode = #tpu.pipeline_mode<synchronous>, transform_indices = @transform_5, window_bounds = array<i64: 37, 64>}, {pipeline_mode = #tpu.pipeline_mode<synchronous>, transform_indices = @transform_6, window_bounds = array<i64: 37, 1>}, {pipeline_mode = #tpu.pipeline_mode<synchronous>, transform_indices = @transform_7, window_bounds = array<i64: 16, 9>}, {pipeline_mode = #tpu.pipeline_mode<synchronous>, transform_indices = @transform_8, window_bounds = array<i64: 16, 1>}, {pipeline_mode = #tpu.pipeline_mode<synchronous>, transform_indices = @transform_9, window_bounds = array<i64: 3, 3>}, {transform_indices = @transform_10, window_bounds = array<i64: 3, 3>}, {transform_indices = @transform_11, window_bounds = array<i64: 1, 3>}, {transform_indices = @transform_12, window_bounds = array<i64: 1, 1>}, {transform_indices = @transform_13, window_bounds = array<i64: 9, 128>}, {transform_indices = @transform_14, window_bounds = array<i64: 3, 128>}, {transform_indices = @transform_15, window_bounds = array<i64: 1, 128>}, {transform_indices = @transform_16, window_bounds = array<i64: 6, 128>}]} {
    %c0_i32 = arith.constant 0 : i32
    %c1_i32 = arith.constant 1 : i32
    %0 = arith.muli %c0_i32, %c1_i32 : i32
    %c0_i32_0 = arith.constant 0 : i32
    %1 = arith.addi %c0_i32_0, %0 : i32
    %c128_i32 = arith.constant 128 : i32
    %2 = arith.muli %1, %c128_i32 : i32
    %3 = tpu.assume_multiple %2, 128 : i32
    %4 = arith.index_cast %3 : i32 to index
    %c0 = arith.constant 0 : index
    %5 = vector.load %arg1[%4, %c0] : memref<128x32xf32, #tpu.memory_space<vmem>>, vector<128x32xf32>
    %c0_1 = arith.constant 0 : index
    %c0_2 = arith.constant 0 : index
    %6 = vector.load %arg4[%c0_1, %c0_2] : memref<64x32xf32, #tpu.memory_space<vmem>>, vector<64x32xf32>
    %cst = arith.constant dense<0.000000e+00> : vector<64x128xf32>
    %7 = tpu.matmul %6, %5, %cst {dimension_numbers = #tpu.dot_dimension_numbers<[1], [1], [0], [0], [0, 0, 1, 0], [], []>, precision = #tpu.contract_precision<fp32>} : vector<64x32xf32>, vector<128x32xf32>, vector<64x128xf32> -> vector<64x128xf32>
    %c0_3 = arith.constant 0 : index
    %c0_4 = arith.constant 0 : index
    %8 = vector.load %arg5[%c0_3, %c0_4] : memref<64x1xf32, #tpu.memory_space<vmem>>, vector<64x1xf32>
    %9 = vector.broadcast %8 : vector<64x1xf32> to vector<64x128xf32>
    %10 = arith.addf %7, %9 : vector<64x128xf32>
    %cst_5 = arith.constant 0.000000e+00 : f32
    %11 = vector.broadcast %cst_5 : f32 to vector<64x128xf32>
    %12 = arith.maximumf %10, %11 : vector<64x128xf32>
    %c0_6 = arith.constant 0 : index
    %c0_7 = arith.constant 0 : index
    %13 = vector.load %arg6[%c0_6, %c0_7] : memref<37x64xf32, #tpu.memory_space<vmem>>, vector<37x64xf32>
    %cst_8 = arith.constant dense<0.000000e+00> : vector<37x128xf32>
    %14 = tpu.matmul %13, %12, %cst_8 {dimension_numbers = #tpu.dot_dimension_numbers<[1], [0], [0], [1], [0, 0, 1, 1], [], []>, precision = #tpu.contract_precision<fp32>} : vector<37x64xf32>, vector<64x128xf32>, vector<37x128xf32> -> vector<37x128xf32>
    %c0_9 = arith.constant 0 : index
    %c0_10 = arith.constant 0 : index
    %15 = vector.load %arg7[%c0_9, %c0_10] : memref<37x1xf32, #tpu.memory_space<vmem>>, vector<37x1xf32>
    %16 = vector.broadcast %15 : vector<37x1xf32> to vector<37x128xf32>
    %17 = arith.addf %14, %16 : vector<37x128xf32>
    %c0_11 = arith.constant 0 : index
    %18 = arith.index_cast %3 : i32 to index
    %19 = vector.load %arg18[%c0_11, %18] : memref<37x128xf32, #tpu.memory_space<vmem>>, vector<37x128xf32>
    tpu.vector_store %arg18[%c0_11, %18], %17 {strides = array<i32>} : memref<37x128xf32, #tpu.memory_space<vmem>>, vector<37x128xf32>,
    %20 = arith.index_cast %3 : i32 to index
    %c0_12 = arith.constant 0 : index
    %21 = vector.load %arg2[%20, %c0_12] : memref<128x9xf32, #tpu.memory_space<vmem>>, vector<128x9xf32>
    %c0_13 = arith.constant 0 : index
    %c0_14 = arith.constant 0 : index
    %22 = vector.load %arg8[%c0_13, %c0_14] : memref<16x9xf32, #tpu.memory_space<vmem>>, vector<16x9xf32>
    %cst_15 = arith.constant dense<0.000000e+00> : vector<16x128xf32>
    %23 = tpu.matmul %22, %21, %cst_15 {dimension_numbers = #tpu.dot_dimension_numbers<[1], [1], [0], [0], [0, 0, 1, 0], [], []>, precision = #tpu.contract_precision<fp32>} : vector<16x9xf32>, vector<128x9xf32>, vector<16x128xf32> -> vector<16x128xf32>
    %c0_16 = arith.constant 0 : index
    %c0_17 = arith.constant 0 : index
    %24 = vector.load %arg9[%c0_16, %c0_17] : memref<16x1xf32, #tpu.memory_space<vmem>>, vector<16x1xf32>
    %25 = vector.broadcast %24 : vector<16x1xf32> to vector<16x128xf32>
    %26 = arith.addf %23, %25 : vector<16x128xf32>
    %c0_18 = arith.constant 0 : index
    %27 = arith.index_cast %3 : i32 to index
    %28 = vector.load %arg19[%c0_18, %27] : memref<16x128xf32, #tpu.memory_space<vmem>>, vector<16x128xf32>
    tpu.vector_store %arg19[%c0_18, %27], %26 {strides = array<i32>} : memref<16x128xf32, #tpu.memory_space<vmem>>, vector<16x128xf32>,
    %29 = arith.index_cast %3 : i32 to index
    %c0_19 = arith.constant 0 : index
    %30 = vector.load %arg3[%29, %c0_19] : memref<128x3xf32, #tpu.memory_space<vmem>>, vector<128x3xf32>
    %c0_20 = arith.constant 0 : index
    %c0_21 = arith.constant 0 : index
    %31 = vector.load %arg10[%c0_20, %c0_21] : memref<3x3xf32, #tpu.memory_space<vmem>>, vector<3x3xf32>
    %cst_22 = arith.constant dense<0.000000e+00> : vector<3x128xf32>
    %32 = tpu.matmul %31, %30, %cst_22 {dimension_numbers = #tpu.dot_dimension_numbers<[1], [1], [0], [0], [0, 0, 1, 0], [], []>, precision = #tpu.contract_precision<fp32>} : vector<3x3xf32>, vector<128x3xf32>, vector<3x128xf32> -> vector<3x128xf32>
    %c0_23 = arith.constant 0 : index
    %33 = arith.index_cast %3 : i32 to index
    %34 = vector.load %arg20[%c0_23, %33] : memref<3x128xf32, #tpu.memory_space<vmem>>, vector<3x128xf32>
    tpu.vector_store %arg20[%c0_23, %33], %32 {strides = array<i32>} : memref<3x128xf32, #tpu.memory_space<vmem>>, vector<3x128xf32>,
    %c1_i32_24 = arith.constant 1 : i32
    %cst_25 = arith.constant 0.000000e+00 : f32
    %35 = vector.broadcast %cst_25 : f32 to vector<6x128xf32>
    %c0_26 = arith.constant 0 : index
    %c0_27 = arith.constant 0 : index
    %36 = vector.load %arg21[%c0_26, %c0_27] : memref<6x128xf32, #tpu.memory_space<vmem>>, vector<6x128xf32>
    tpu.vector_store %arg21[%c0_26, %c0_27], %35 {strides = array<i32>} : memref<6x128xf32, #tpu.memory_space<vmem>>, vector<6x128xf32>,
    %c0_28 = arith.constant 0 : index
    %c0_29 = arith.constant 0 : index
    %37 = memref.load %arg11[%c0_28, %c0_29] : memref<3x3xf32, #tpu.memory_space<smem>>
    %c0_30 = arith.constant 0 : index
    %c1 = arith.constant 1 : index
    %38 = memref.load %arg11[%c0_30, %c1] : memref<3x3xf32, #tpu.memory_space<smem>>
    %c0_31 = arith.constant 0 : index
    %c2 = arith.constant 2 : index
    %39 = memref.load %arg11[%c0_31, %c2] : memref<3x3xf32, #tpu.memory_space<smem>>
    %c1_32 = arith.constant 1 : index
    %c0_33 = arith.constant 0 : index
    %40 = memref.load %arg11[%c1_32, %c0_33] : memref<3x3xf32, #tpu.memory_space<smem>>
    %c1_34 = arith.constant 1 : index
    %c1_35 = arith.constant 1 : index
    %41 = memref.load %arg11[%c1_34, %c1_35] : memref<3x3xf32, #tpu.memory_space<smem>>
    %c1_36 = arith.constant 1 : index
    %c2_37 = arith.constant 2 : index
    %42 = memref.load %arg11[%c1_36, %c2_37] : memref<3x3xf32, #tpu.memory_space<smem>>
    %c2_38 = arith.constant 2 : index
    %c0_39 = arith.constant 0 : index
    %43 = memref.load %arg11[%c2_38, %c0_39] : memref<3x3xf32, #tpu.memory_space<smem>>
    %c2_40 = arith.constant 2 : index
    %c1_41 = arith.constant 1 : index
    %44 = memref.load %arg11[%c2_40, %c1_41] : memref<3x3xf32, #tpu.memory_space<smem>>
    %c2_42 = arith.constant 2 : index
    %c2_43 = arith.constant 2 : index
    %45 = memref.load %arg11[%c2_42, %c2_43] : memref<3x3xf32, #tpu.memory_space<smem>>
    %c0_44 = arith.constant 0 : index
    %c0_45 = arith.constant 0 : index
    %46 = memref.load %arg12[%c0_44, %c0_45] : memref<1x3xf32, #tpu.memory_space<smem>>
    %c0_46 = arith.constant 0 : index
    %c1_47 = arith.constant 1 : index
    %47 = memref.load %arg12[%c0_46, %c1_47] : memref<1x3xf32, #tpu.memory_space<smem>>
    %c0_48 = arith.constant 0 : index
    %c2_49 = arith.constant 2 : index
    %48 = memref.load %arg12[%c0_48, %c2_49] : memref<1x3xf32, #tpu.memory_space<smem>>
    %c0_50 = arith.constant 0 : index
    %c0_51 = arith.constant 0 : index
    %49 = memref.load %arg13[%c0_50, %c0_51] : memref<1x1xf32, #tpu.memory_space<smem>>
    %c0_i32_52 = arith.constant 0 : i32
    %c1_i32_53 = arith.constant 1 : i32
    %50 = arith.muli %c0_i32_52, %c1_i32_53 : i32
    %c0_i32_54 = arith.constant 0 : i32
    %51 = arith.addi %c0_i32_54, %50 : i32
    %c128_i32_55 = arith.constant 128 : i32
    %52 = arith.muli %51, %c128_i32_55 : i32
    %53 = tpu.assume_multiple %52, 128 : i32
    %c0_56 = arith.constant 0 : index
    %54 = arith.index_cast %53 : i32 to index
    %55 = vector.load %arg19[%c0_56, %54] : memref<16x128xf32, #tpu.memory_space<vmem>>, vector<1x128xf32>
    %cst_57 = arith.constant 0.000000e+00 : f32
    %56 = vector.broadcast %cst_57 : f32 to vector<1x128xf32>
    %57 = arith.maximumf %55, %56 : vector<1x128xf32>
    %58 = math.sqrt %57 : vector<1x128xf32>
    %c5 = arith.constant 5 : index
    %59 = arith.index_cast %53 : i32 to index
    %60 = vector.load %arg19[%c5, %59] : memref<16x128xf32, #tpu.memory_space<vmem>>, vector<1x128xf32>
    %cst_58 = arith.constant 0.000000e+00 : f32
    %61 = vector.broadcast %cst_58 : f32 to vector<1x128xf32>
    %62 = arith.maximumf %60, %61 : vector<1x128xf32>
    %63 = math.sqrt %62 : vector<1x128xf32>
    %c10 = arith.constant 10 : index
    %64 = arith.index_cast %53 : i32 to index
    %65 = vector.load %arg19[%c10, %64] : memref<16x128xf32, #tpu.memory_space<vmem>>, vector<1x128xf32>
    %cst_59 = arith.constant 0.000000e+00 : f32
    %66 = vector.broadcast %cst_59 : f32 to vector<1x128xf32>
    %67 = arith.maximumf %65, %66 : vector<1x128xf32>
    %68 = math.sqrt %67 : vector<1x128xf32>
    %c15 = arith.constant 15 : index
    %69 = arith.index_cast %53 : i32 to index
    %70 = vector.load %arg19[%c15, %69] : memref<16x128xf32, #tpu.memory_space<vmem>>, vector<1x128xf32>
    %cst_60 = arith.constant 0.000000e+00 : f32
    %71 = vector.broadcast %cst_60 : f32 to vector<1x128xf32>
    %72 = arith.maximumf %70, %71 : vector<1x128xf32>
    %73 = math.sqrt %72 : vector<1x128xf32>
    %74 = arith.maximumf %58, %63 : vector<1x128xf32>
    %75 = arith.maximumf %68, %73 : vector<1x128xf32>
    %76 = arith.maximumf %74, %75 : vector<1x128xf32>
    %false = arith.constant false
    %77 = vector.broadcast %false : i1 to vector<1x128xi1>
    %cst_61 = arith.constant 0.000000e+00 : f32
    %78 = vector.broadcast %cst_61 : f32 to vector<4x128xf32>
    %cst_62 = arith.constant 0.000000e+00 : f32
    %79 = vector.broadcast %cst_62 : f32 to vector<1x128xf32>
    %80 = arith.cmpf oeq, %58, %76 : vector<1x128xf32>
    %cst_63 = arith.constant dense<true> : vector<1x128xi1>
    %81 = arith.xori %77, %cst_63 : vector<1x128xi1>
    %82 = arith.andi %80, %81 : vector<1x128xi1>
    %c0_64 = arith.constant 0 : index
    %83 = arith.index_cast %53 : i32 to index
    %84 = vector.load %arg19[%c0_64, %83] : memref<16x128xf32, #tpu.memory_space<vmem>>, vector<4x128xf32>
    %cst_65 = arith.constant 0.000000e+00 : f32
    %85 = vector.shape_cast %82 : vector<1x128xi1> to vector<1x128xi1>
    %86 = vector.broadcast %85 : vector<1x128xi1> to vector<4x128xi1>
    %87 = vector.broadcast %cst_65 : f32 to vector<4x128xf32>
    %88 = arith.select %86, %84, %87 : vector<4x128xi1>, vector<4x128xf32>
    %89 = arith.addf %78, %88 : vector<4x128xf32>
    %cst_66 = arith.constant 0.000000e+00 : f32
    %90 = vector.broadcast %cst_66 : f32 to vector<1x128xf32>
    %91 = arith.select %82, %58, %90 : vector<1x128xi1>, vector<1x128xf32>
    %92 = arith.addf %79, %91 : vector<1x128xf32>
    %93 = arith.ori %77, %82 : vector<1x128xi1>
    %94 = arith.cmpf oeq, %63, %76 : vector<1x128xf32>
    %cst_67 = arith.constant dense<true> : vector<1x128xi1>
    %95 = arith.xori %93, %cst_67 : vector<1x128xi1>
    %96 = arith.andi %94, %95 : vector<1x128xi1>
    %c4 = arith.constant 4 : index
    %97 = arith.index_cast %53 : i32 to index
    %98 = vector.load %arg19[%c4, %97] : memref<16x128xf32, #tpu.memory_space<vmem>>, vector<4x128xf32>
    %cst_68 = arith.constant 0.000000e+00 : f32
    %99 = vector.shape_cast %96 : vector<1x128xi1> to vector<1x128xi1>
    %100 = vector.broadcast %99 : vector<1x128xi1> to vector<4x128xi1>
    %101 = vector.broadcast %cst_68 : f32 to vector<4x128xf32>
    %102 = arith.select %100, %98, %101 : vector<4x128xi1>, vector<4x128xf32>
    %103 = arith.addf %89, %102 : vector<4x128xf32>
    %cst_69 = arith.constant 0.000000e+00 : f32
    %104 = vector.broadcast %cst_69 : f32 to vector<1x128xf32>
    %105 = arith.select %96, %63, %104 : vector<1x128xi1>, vector<1x128xf32>
    %106 = arith.addf %92, %105 : vector<1x128xf32>
    %107 = arith.ori %93, %96 : vector<1x128xi1>
    %108 = arith.cmpf oeq, %68, %76 : vector<1x128xf32>
    %cst_70 = arith.constant dense<true> : vector<1x128xi1>
    %109 = arith.xori %107, %cst_70 : vector<1x128xi1>
    %110 = arith.andi %108, %109 : vector<1x128xi1>
    %c8 = arith.constant 8 : index
    %111 = arith.index_cast %53 : i32 to index
    %112 = vector.load %arg19[%c8, %111] : memref<16x128xf32, #tpu.memory_space<vmem>>, vector<4x128xf32>
    %cst_71 = arith.constant 0.000000e+00 : f32
    %113 = vector.shape_cast %110 : vector<1x128xi1> to vector<1x128xi1>
    %114 = vector.broadcast %113 : vector<1x128xi1> to vector<4x128xi1>
    %115 = vector.broadcast %cst_71 : f32 to vector<4x128xf32>
    %116 = arith.select %114, %112, %115 : vector<4x128xi1>, vector<4x128xf32>
    %117 = arith.addf %103, %116 : vector<4x128xf32>
    %cst_72 = arith.constant 0.000000e+00 : f32
    %118 = vector.broadcast %cst_72 : f32 to vector<1x128xf32>
    %119 = arith.select %110, %68, %118 : vector<1x128xi1>, vector<1x128xf32>
    %120 = arith.addf %106, %119 : vector<1x128xf32>
    %121 = arith.ori %107, %110 : vector<1x128xi1>
    %122 = arith.cmpf oeq, %73, %76 : vector<1x128xf32>
    %cst_73 = arith.constant dense<true> : vector<1x128xi1>
    %123 = arith.xori %121, %cst_73 : vector<1x128xi1>
    %124 = arith.andi %122, %123 : vector<1x128xi1>
    %c12 = arith.constant 12 : index
    %125 = arith.index_cast %53 : i32 to index
    %126 = vector.load %arg19[%c12, %125] : memref<16x128xf32, #tpu.memory_space<vmem>>, vector<4x128xf32>
    %cst_74 = arith.constant 0.000000e+00 : f32
    %127 = vector.shape_cast %124 : vector<1x128xi1> to vector<1x128xi1>
    %128 = vector.broadcast %127 : vector<1x128xi1> to vector<4x128xi1>
    %129 = vector.broadcast %cst_74 : f32 to vector<4x128xf32>
    %130 = arith.select %128, %126, %129 : vector<4x128xi1>, vector<4x128xf32>
    %131 = arith.addf %117, %130 : vector<4x128xf32>
    %cst_75 = arith.constant 0.000000e+00 : f32
    %132 = vector.broadcast %cst_75 : f32 to vector<1x128xf32>
    %133 = arith.select %124, %73, %132 : vector<1x128xi1>, vector<1x128xf32>
    %134 = arith.addf %120, %133 : vector<1x128xf32>
    %cst_76 = arith.constant 1.000000e-01 : f32
    %135 = vector.broadcast %cst_76 : f32 to vector<1x128xf32>
    %136 = arith.maximumf %134, %135 : vector<1x128xf32>
    %cst_77 = arith.constant 5.000000e-01 : f32
    %137 = vector.broadcast %cst_77 : f32 to vector<1x128xf32>
    %138 = arith.divf %137, %136 : vector<1x128xf32>
    %139 = vector.broadcast %138 : vector<1x128xf32> to vector<4x128xf32>
    %140 = arith.mulf %131, %139 : vector<4x128xf32>
    %141 = vector.extract_strided_slice %140 {offsets = [0, 0], sizes = [1, 128], strides = [1, 1]} : vector<4x128xf32> to vector<1x128xf32>
    %142 = vector.extract_strided_slice %140 {offsets = [1, 0], sizes = [1, 128], strides = [1, 1]} : vector<4x128xf32> to vector<1x128xf32>
    %143 = vector.extract_strided_slice %140 {offsets = [2, 0], sizes = [1, 128], strides = [1, 1]} : vector<4x128xf32> to vector<1x128xf32>
    %144 = vector.extract_strided_slice %140 {offsets = [3, 0], sizes = [1, 128], strides = [1, 1]} : vector<4x128xf32> to vector<1x128xf32>
    %c0_78 = arith.constant 0 : index
    %145 = arith.index_cast %53 : i32 to index
    %146 = vector.load %arg18[%c0_78, %145] : memref<37x128xf32, #tpu.memory_space<vmem>>, vector<1x128xf32>
    %cst_79 = arith.constant 1.000000e+00 : f32
    %147 = vector.broadcast %cst_79 : f32 to vector<1x128xf32>
    %148 = arith.addf %146, %147 : vector<1x128xf32>
    %c1_80 = arith.constant 1 : index
    %149 = arith.index_cast %53 : i32 to index
    %150 = vector.load %arg18[%c1_80, %149] : memref<37x128xf32, #tpu.memory_space<vmem>>, vector<1x128xf32>
    %cst_81 = arith.constant 0.000000e+00 : f32
    %151 = vector.broadcast %cst_81 : f32 to vector<1x128xf32>
    %152 = arith.addf %150, %151 : vector<1x128xf32>
    %c2_82 = arith.constant 2 : index
    %153 = arith.index_cast %53 : i32 to index
    %154 = vector.load %arg18[%c2_82, %153] : memref<37x128xf32, #tpu.memory_space<vmem>>, vector<1x128xf32>
    %cst_83 = arith.constant 0.000000e+00 : f32
    %155 = vector.broadcast %cst_83 : f32 to vector<1x128xf32>
    %156 = arith.addf %154, %155 : vector<1x128xf32>
    %c3 = arith.constant 3 : index
    %157 = arith.index_cast %53 : i32 to index
    %158 = vector.load %arg18[%c3, %157] : memref<37x128xf32, #tpu.memory_space<vmem>>, vector<1x128xf32>
    %cst_84 = arith.constant 0.000000e+00 : f32
    %159 = vector.broadcast %cst_84 : f32 to vector<1x128xf32>
    %160 = arith.addf %158, %159 : vector<1x128xf32>
    %c4_85 = arith.constant 4 : index
    %161 = arith.index_cast %53 : i32 to index
    %162 = vector.load %arg18[%c4_85, %161] : memref<37x128xf32, #tpu.memory_space<vmem>>, vector<1x128xf32>
    %cst_86 = arith.constant 0.000000e+00 : f32
    %163 = vector.broadcast %cst_86 : f32 to vector<1x128xf32>
    %164 = arith.addf %162, %163 : vector<1x128xf32>
    %c5_87 = arith.constant 5 : index
    %165 = arith.index_cast %53 : i32 to index
    %166 = vector.load %arg18[%c5_87, %165] : memref<37x128xf32, #tpu.memory_space<vmem>>, vector<1x128xf32>
    %cst_88 = arith.constant 1.000000e+00 : f32
    %167 = vector.broadcast %cst_88 : f32 to vector<1x128xf32>
    %168 = arith.addf %166, %167 : vector<1x128xf32>
    %c6 = arith.constant 6 : index
    %169 = arith.index_cast %53 : i32 to index
    %170 = vector.load %arg18[%c6, %169] : memref<37x128xf32, #tpu.memory_space<vmem>>, vector<1x128xf32>
    %cst_89 = arith.constant 0.000000e+00 : f32
    %171 = vector.broadcast %cst_89 : f32 to vector<1x128xf32>
    %172 = arith.addf %170, %171 : vector<1x128xf32>
    %c7 = arith.constant 7 : index
    %173 = arith.index_cast %53 : i32 to index
    %174 = vector.load %arg18[%c7, %173] : memref<37x128xf32, #tpu.memory_space<vmem>>, vector<1x128xf32>
    %cst_90 = arith.constant 0.000000e+00 : f32
    %175 = vector.broadcast %cst_90 : f32 to vector<1x128xf32>
    %176 = arith.addf %174, %175 : vector<1x128xf32>
    %c8_91 = arith.constant 8 : index
    %177 = arith.index_cast %53 : i32 to index
    %178 = vector.load %arg18[%c8_91, %177] : memref<37x128xf32, #tpu.memory_space<vmem>>, vector<1x128xf32>
    %cst_92 = arith.constant 0.000000e+00 : f32
    %179 = vector.broadcast %cst_92 : f32 to vector<1x128xf32>
    %180 = arith.addf %178, %179 : vector<1x128xf32>
    %c9 = arith.constant 9 : index
    %181 = arith.index_cast %53 : i32 to index
    %182 = vector.load %arg18[%c9, %181] : memref<37x128xf32, #tpu.memory_space<vmem>>, vector<1x128xf32>
    %cst_93 = arith.constant 0.000000e+00 : f32
    %183 = vector.broadcast %cst_93 : f32 to vector<1x128xf32>
    %184 = arith.addf %182, %183 : vector<1x128xf32>
    %c10_94 = arith.constant 10 : index
    %185 = arith.index_cast %53 : i32 to index
    %186 = vector.load %arg18[%c10_94, %185] : memref<37x128xf32, #tpu.memory_space<vmem>>, vector<1x128xf32>
    %cst_95 = arith.constant 1.000000e+00 : f32
    %187 = vector.broadcast %cst_95 : f32 to vector<1x128xf32>
    %188 = arith.addf %186, %187 : vector<1x128xf32>
    %c11 = arith.constant 11 : index
    %189 = arith.index_cast %53 : i32 to index
    %190 = vector.load %arg18[%c11, %189] : memref<37x128xf32, #tpu.memory_space<vmem>>, vector<1x128xf32>
    %cst_96 = arith.constant 0.000000e+00 : f32
    %191 = vector.broadcast %cst_96 : f32 to vector<1x128xf32>
    %192 = arith.addf %190, %191 : vector<1x128xf32>
    %c12_97 = arith.constant 12 : index
    %193 = arith.index_cast %53 : i32 to index
    %194 = vector.load %arg18[%c12_97, %193] : memref<37x128xf32, #tpu.memory_space<vmem>>, vector<1x128xf32>
    %cst_98 = arith.constant 0.000000e+00 : f32
    %195 = vector.broadcast %cst_98 : f32 to vector<1x128xf32>
    %196 = arith.addf %194, %195 : vector<1x128xf32>
    %c13 = arith.constant 13 : index
    %197 = arith.index_cast %53 : i32 to index
    %198 = vector.load %arg18[%c13, %197] : memref<37x128xf32, #tpu.memory_space<vmem>>, vector<1x128xf32>
    %cst_99 = arith.constant 0.000000e+00 : f32
    %199 = vector.broadcast %cst_99 : f32 to vector<1x128xf32>
    %200 = arith.addf %198, %199 : vector<1x128xf32>
    %c14 = arith.constant 14 : index
    %201 = arith.index_cast %53 : i32 to index
    %202 = vector.load %arg18[%c14, %201] : memref<37x128xf32, #tpu.memory_space<vmem>>, vector<1x128xf32>
    %cst_100 = arith.constant 0.000000e+00 : f32
    %203 = vector.broadcast %cst_100 : f32 to vector<1x128xf32>
    %204 = arith.addf %202, %203 : vector<1x128xf32>
    %c15_101 = arith.constant 15 : index
    %205 = arith.index_cast %53 : i32 to index
    %206 = vector.load %arg18[%c15_101, %205] : memref<37x128xf32, #tpu.memory_space<vmem>>, vector<1x128xf32>
    %cst_102 = arith.constant 1.000000e+00 : f32
    %207 = vector.broadcast %cst_102 : f32 to vector<1x128xf32>
    %208 = arith.addf %206, %207 : vector<1x128xf32>
    %209 = arith.mulf %148, %141 : vector<1x128xf32>
    %210 = arith.mulf %152, %142 : vector<1x128xf32>
    %211 = arith.addf %209, %210 : vector<1x128xf32>
    %212 = arith.mulf %156, %143 : vector<1x128xf32>
    %213 = arith.addf %211, %212 : vector<1x128xf32>
    %214 = arith.mulf %160, %144 : vector<1x128xf32>
    %215 = arith.addf %213, %214 : vector<1x128xf32>
    %216 = arith.mulf %164, %141 : vector<1x128xf32>
    %217 = arith.mulf %168, %142 : vector<1x128xf32>
    %218 = arith.addf %216, %217 : vector<1x128xf32>
    %219 = arith.mulf %172, %143 : vector<1x128xf32>
    %220 = arith.addf %218, %219 : vector<1x128xf32>
    %221 = arith.mulf %176, %144 : vector<1x128xf32>
    %222 = arith.addf %220, %221 : vector<1x128xf32>
    %223 = arith.mulf %180, %141 : vector<1x128xf32>
    %224 = arith.mulf %184, %142 : vector<1x128xf32>
    %225 = arith.addf %223, %224 : vector<1x128xf32>
    %226 = arith.mulf %188, %143 : vector<1x128xf32>
    %227 = arith.addf %225, %226 : vector<1x128xf32>
    %228 = arith.mulf %192, %144 : vector<1x128xf32>
    %229 = arith.addf %227, %228 : vector<1x128xf32>
    %230 = arith.mulf %196, %141 : vector<1x128xf32>
    %231 = arith.mulf %200, %142 : vector<1x128xf32>
    %232 = arith.addf %230, %231 : vector<1x128xf32>
    %233 = arith.mulf %204, %143 : vector<1x128xf32>
    %234 = arith.addf %232, %233 : vector<1x128xf32>
    %235 = arith.mulf %208, %144 : vector<1x128xf32>
    %236 = arith.addf %234, %235 : vector<1x128xf32>
    %237 = arith.mulf %148, %168 : vector<1x128xf32>
    %238 = arith.mulf %152, %164 : vector<1x128xf32>
    %239 = arith.subf %237, %238 : vector<1x128xf32>
    %240 = arith.mulf %148, %172 : vector<1x128xf32>
    %241 = arith.mulf %156, %164 : vector<1x128xf32>
    %242 = arith.subf %240, %241 : vector<1x128xf32>
    %243 = arith.mulf %148, %176 : vector<1x128xf32>
    %244 = arith.mulf %160, %164 : vector<1x128xf32>
    %245 = arith.subf %243, %244 : vector<1x128xf32>
    %246 = arith.mulf %152, %172 : vector<1x128xf32>
    %247 = arith.mulf %156, %168 : vector<1x128xf32>
    %248 = arith.subf %246, %247 : vector<1x128xf32>
    %249 = arith.mulf %152, %176 : vector<1x128xf32>
    %250 = arith.mulf %160, %168 : vector<1x128xf32>
    %251 = arith.subf %249, %250 : vector<1x128xf32>
    %252 = arith.mulf %156, %176 : vector<1x128xf32>
    %253 = arith.mulf %160, %172 : vector<1x128xf32>
    %254 = arith.subf %252, %253 : vector<1x128xf32>
    %255 = arith.mulf %188, %208 : vector<1x128xf32>
    %256 = arith.mulf %192, %204 : vector<1x128xf32>
    %257 = arith.subf %255, %256 : vector<1x128xf32>
    %258 = arith.mulf %184, %208 : vector<1x128xf32>
    %259 = arith.mulf %192, %200 : vector<1x128xf32>
    %260 = arith.subf %258, %259 : vector<1x128xf32>
    %261 = arith.mulf %184, %204 : vector<1x128xf32>
    %262 = arith.mulf %188, %200 : vector<1x128xf32>
    %263 = arith.subf %261, %262 : vector<1x128xf32>
    %264 = arith.mulf %180, %208 : vector<1x128xf32>
    %265 = arith.mulf %192, %196 : vector<1x128xf32>
    %266 = arith.subf %264, %265 : vector<1x128xf32>
    %267 = arith.mulf %180, %204 : vector<1x128xf32>
    %268 = arith.mulf %188, %196 : vector<1x128xf32>
    %269 = arith.subf %267, %268 : vector<1x128xf32>
    %270 = arith.mulf %180, %200 : vector<1x128xf32>
    %271 = arith.mulf %184, %196 : vector<1x128xf32>
    %272 = arith.subf %270, %271 : vector<1x128xf32>
    %273 = arith.mulf %239, %257 : vector<1x128xf32>
    %274 = arith.mulf %242, %260 : vector<1x128xf32>
    %275 = arith.subf %273, %274 : vector<1x128xf32>
    %276 = arith.mulf %245, %263 : vector<1x128xf32>
    %277 = arith.addf %275, %276 : vector<1x128xf32>
    %278 = arith.mulf %248, %266 : vector<1x128xf32>
    %279 = arith.addf %277, %278 : vector<1x128xf32>
    %280 = arith.mulf %251, %269 : vector<1x128xf32>
    %281 = arith.subf %279, %280 : vector<1x128xf32>
    %282 = arith.mulf %254, %272 : vector<1x128xf32>
    %283 = arith.addf %281, %282 : vector<1x128xf32>
    %284 = math.absf %283 : vector<1x128xf32>
    %285 = math.log %284 : vector<1x128xf32>
    %c34 = arith.constant 34 : index
    %286 = arith.index_cast %53 : i32 to index
    %287 = vector.load %arg18[%c34, %286] : memref<37x128xf32, #tpu.memory_space<vmem>>, vector<1x128xf32>
    %c35 = arith.constant 35 : index
    %288 = arith.index_cast %53 : i32 to index
    %289 = vector.load %arg18[%c35, %288] : memref<37x128xf32, #tpu.memory_space<vmem>>, vector<1x128xf32>
    %c36 = arith.constant 36 : index
    %290 = arith.index_cast %53 : i32 to index
    %291 = vector.load %arg18[%c36, %290] : memref<37x128xf32, #tpu.memory_space<vmem>>, vector<1x128xf32>
    %292 = arith.addf %285, %287 : vector<1x128xf32>
    %293 = arith.addf %292, %289 : vector<1x128xf32>
    %294 = arith.addf %293, %291 : vector<1x128xf32>
    %295 = vector.broadcast %49 : f32 to vector<1x128xf32>
    %296 = arith.addf %294, %295 : vector<1x128xf32>
    %297 = math.exp %287 : vector<1x128xf32>
    %298 = vector.broadcast %46 : f32 to vector<1x128xf32>
    %299 = arith.mulf %298, %297 : vector<1x128xf32>
    %300 = math.exp %289 : vector<1x128xf32>
    %301 = vector.broadcast %47 : f32 to vector<1x128xf32>
    %302 = arith.mulf %301, %300 : vector<1x128xf32>
    %303 = math.exp %291 : vector<1x128xf32>
    %304 = vector.broadcast %48 : f32 to vector<1x128xf32>
    %305 = arith.mulf %304, %303 : vector<1x128xf32>
    %c19 = arith.constant 19 : index
    %306 = arith.index_cast %53 : i32 to index
    %307 = vector.load %arg18[%c19, %306] : memref<37x128xf32, #tpu.memory_space<vmem>>, vector<1x128xf32>
    %c22 = arith.constant 22 : index
    %308 = arith.index_cast %53 : i32 to index
    %309 = vector.load %arg18[%c22, %308] : memref<37x128xf32, #tpu.memory_space<vmem>>, vector<1x128xf32>
    %c23 = arith.constant 23 : index
    %310 = arith.index_cast %53 : i32 to index
    %311 = vector.load %arg18[%c23, %310] : memref<37x128xf32, #tpu.memory_space<vmem>>, vector<1x128xf32>
    %c26 = arith.constant 26 : index
    %312 = arith.index_cast %53 : i32 to index
    %313 = vector.load %arg18[%c26, %312] : memref<37x128xf32, #tpu.memory_space<vmem>>, vector<1x128xf32>
    %c27 = arith.constant 27 : index
    %314 = arith.index_cast %53 : i32 to index
    %315 = vector.load %arg18[%c27, %314] : memref<37x128xf32, #tpu.memory_space<vmem>>, vector<1x128xf32>
    %c30 = arith.constant 30 : index
    %316 = arith.index_cast %53 : i32 to index
    %317 = vector.load %arg18[%c30, %316] : memref<37x128xf32, #tpu.memory_space<vmem>>, vector<1x128xf32>
    %c0_103 = arith.constant 0 : index
    %318 = arith.index_cast %53 : i32 to index
    %319 = vector.load %arg20[%c0_103, %318] : memref<3x128xf32, #tpu.memory_space<vmem>>, vector<1x128xf32>
    %c1_104 = arith.constant 1 : index
    %320 = arith.index_cast %53 : i32 to index
    %321 = vector.load %arg20[%c1_104, %320] : memref<3x128xf32, #tpu.memory_space<vmem>>, vector<1x128xf32>
    %c2_105 = arith.constant 2 : index
    %322 = arith.index_cast %53 : i32 to index
    %323 = vector.load %arg20[%c2_105, %322] : memref<3x128xf32, #tpu.memory_space<vmem>>, vector<1x128xf32>
    %324 = arith.mulf %299, %319 : vector<1x128xf32>
    %325 = arith.mulf %313, %321 : vector<1x128xf32>
    %326 = arith.addf %324, %325 : vector<1x128xf32>
    %327 = arith.mulf %315, %323 : vector<1x128xf32>
    %328 = arith.addf %326, %327 : vector<1x128xf32>
    %329 = arith.mulf %302, %321 : vector<1x128xf32>
    %330 = arith.mulf %317, %323 : vector<1x128xf32>
    %331 = arith.addf %329, %330 : vector<1x128xf32>
    %332 = arith.mulf %305, %323 : vector<1x128xf32>
    %333 = arith.mulf %307, %328 : vector<1x128xf32>
    %334 = arith.addf %333, %331 : vector<1x128xf32>
    %335 = arith.mulf %309, %328 : vector<1x128xf32>
    %336 = arith.mulf %311, %331 : vector<1x128xf32>
    %337 = arith.addf %335, %336 : vector<1x128xf32>
    %338 = arith.addf %337, %332 : vector<1x128xf32>
    %339 = vector.broadcast %37 : f32 to vector<1x128xf32>
    %340 = arith.mulf %339, %328 : vector<1x128xf32>
    %341 = vector.broadcast %38 : f32 to vector<1x128xf32>
    %342 = arith.mulf %341, %334 : vector<1x128xf32>
    %343 = arith.addf %340, %342 : vector<1x128xf32>
    %344 = vector.broadcast %39 : f32 to vector<1x128xf32>
    %345 = arith.mulf %344, %338 : vector<1x128xf32>
    %346 = arith.addf %343, %345 : vector<1x128xf32>
    %347 = vector.broadcast %40 : f32 to vector<1x128xf32>
    %348 = arith.mulf %347, %328 : vector<1x128xf32>
    %349 = vector.broadcast %41 : f32 to vector<1x128xf32>
    %350 = arith.mulf %349, %334 : vector<1x128xf32>
    %351 = arith.addf %348, %350 : vector<1x128xf32>
    %352 = vector.broadcast %42 : f32 to vector<1x128xf32>
    %353 = arith.mulf %352, %338 : vector<1x128xf32>
    %354 = arith.addf %351, %353 : vector<1x128xf32>
    %355 = vector.broadcast %43 : f32 to vector<1x128xf32>
    %356 = arith.mulf %355, %328 : vector<1x128xf32>
    %357 = vector.broadcast %44 : f32 to vector<1x128xf32>
    %358 = arith.mulf %357, %334 : vector<1x128xf32>
    %359 = arith.addf %356, %358 : vector<1x128xf32>
    %360 = vector.broadcast %45 : f32 to vector<1x128xf32>
    %361 = arith.mulf %360, %338 : vector<1x128xf32>
    %362 = arith.addf %359, %361 : vector<1x128xf32>
    %363 = tpu.concatenate %346, %354, %362 in 0 : vector<1x128xf32>, vector<1x128xf32>, vector<1x128xf32> -> vector<3x128xf32>
    %c0_106 = arith.constant 0 : index
    %364 = arith.index_cast %53 : i32 to index
    %365 = vector.load %arg15[%c0_106, %364] : memref<3x128xf32, #tpu.memory_space<vmem>>, vector<3x128xf32>
    tpu.vector_store %arg15[%c0_106, %364], %363 {strides = array<i32>} : memref<3x128xf32, #tpu.memory_space<vmem>>, vector<3x128xf32>,
    %c0_107 = arith.constant 0 : index
    %c0_108 = arith.constant 0 : index
    %366 = vector.load %arg21[%c0_107, %c0_108] : memref<6x128xf32, #tpu.memory_space<vmem>>, vector<3x128xf32>
    %367 = arith.addf %366, %363 : vector<3x128xf32>
    %c0_109 = arith.constant 0 : index
    %c0_110 = arith.constant 0 : index
    %368 = vector.load %arg21[%c0_109, %c0_110] : memref<6x128xf32, #tpu.memory_space<vmem>>, vector<3x128xf32>
    tpu.vector_store %arg21[%c0_109, %c0_110], %367 {strides = array<i32>} : memref<6x128xf32, #tpu.memory_space<vmem>>, vector<3x128xf32>,
    %c3_111 = arith.constant 3 : index
    %c0_112 = arith.constant 0 : index
    %369 = vector.load %arg21[%c3_111, %c0_112] : memref<6x128xf32, #tpu.memory_space<vmem>>, vector<3x128xf32>
    %370 = arith.mulf %363, %363 : vector<3x128xf32>
    %371 = arith.addf %369, %370 : vector<3x128xf32>
    %c3_113 = arith.constant 3 : index
    %c0_114 = arith.constant 0 : index
    %372 = vector.load %arg21[%c3_113, %c0_114] : memref<6x128xf32, #tpu.memory_space<vmem>>, vector<3x128xf32>
    tpu.vector_store %arg21[%c3_113, %c0_114], %371 {strides = array<i32>} : memref<6x128xf32, #tpu.memory_space<vmem>>, vector<3x128xf32>,
    %373 = arith.mulf %215, %215 : vector<1x128xf32>
    %374 = arith.mulf %222, %222 : vector<1x128xf32>
    %375 = arith.addf %373, %374 : vector<1x128xf32>
    %376 = arith.mulf %229, %229 : vector<1x128xf32>
    %377 = arith.addf %375, %376 : vector<1x128xf32>
    %378 = arith.mulf %236, %236 : vector<1x128xf32>
    %379 = arith.addf %377, %378 : vector<1x128xf32>
    %380 = math.log %379 : vector<1x128xf32>
    %cst_115 = arith.constant 2.000000e+00 : f32
    %381 = vector.broadcast %cst_115 : f32 to vector<1x128xf32>
    %382 = arith.mulf %381, %380 : vector<1x128xf32>
    %383 = arith.subf %296, %382 : vector<1x128xf32>
    %c0_116 = arith.constant 0 : index
    %384 = arith.index_cast %53 : i32 to index
    %385 = vector.load %arg16[%c0_116, %384] : memref<1x128xf32, #tpu.memory_space<vmem>>, vector<1x128xf32>
    tpu.vector_store %arg16[%c0_116, %384], %383 {strides = array<i32>} : memref<1x128xf32, #tpu.memory_space<vmem>>, vector<1x128xf32>,
    %cst_117 = arith.constant 2.000000e+00 : f32
    %386 = vector.broadcast %cst_117 : f32 to vector<1x128xf32>
    %387 = arith.divf %386, %379 : vector<1x128xf32>
    %388 = arith.mulf %229, %229 : vector<1x128xf32>
    %389 = arith.mulf %236, %236 : vector<1x128xf32>
    %390 = arith.addf %388, %389 : vector<1x128xf32>
    %391 = arith.mulf %387, %390 : vector<1x128xf32>
    %cst_118 = arith.constant 1.000000e+00 : f32
    %392 = vector.broadcast %cst_118 : f32 to vector<1x128xf32>
    %393 = arith.subf %392, %391 : vector<1x128xf32>
    %394 = arith.mulf %222, %229 : vector<1x128xf32>
    %395 = arith.mulf %236, %215 : vector<1x128xf32>
    %396 = arith.subf %394, %395 : vector<1x128xf32>
    %397 = arith.mulf %387, %396 : vector<1x128xf32>
    %398 = arith.mulf %222, %236 : vector<1x128xf32>
    %399 = arith.mulf %229, %215 : vector<1x128xf32>
    %400 = arith.addf %398, %399 : vector<1x128xf32>
    %401 = arith.mulf %387, %400 : vector<1x128xf32>
    %402 = arith.mulf %222, %229 : vector<1x128xf32>
    %403 = arith.mulf %236, %215 : vector<1x128xf32>
    %404 = arith.addf %402, %403 : vector<1x128xf32>
    %405 = arith.mulf %387, %404 : vector<1x128xf32>
    %406 = arith.mulf %222, %222 : vector<1x128xf32>
    %407 = arith.mulf %236, %236 : vector<1x128xf32>
    %408 = arith.addf %406, %407 : vector<1x128xf32>
    %409 = arith.mulf %387, %408 : vector<1x128xf32>
    %cst_119 = arith.constant 1.000000e+00 : f32
    %410 = vector.broadcast %cst_119 : f32 to vector<1x128xf32>
    %411 = arith.subf %410, %409 : vector<1x128xf32>
    %412 = arith.mulf %229, %236 : vector<1x128xf32>
    %413 = arith.mulf %222, %215 : vector<1x128xf32>
    %414 = arith.subf %412, %413 : vector<1x128xf32>
    %415 = arith.mulf %387, %414 : vector<1x128xf32>
    %416 = arith.mulf %222, %236 : vector<1x128xf32>
    %417 = arith.mulf %229, %215 : vector<1x128xf32>
    %418 = arith.subf %416, %417 : vector<1x128xf32>
    %419 = arith.mulf %387, %418 : vector<1x128xf32>
    %420 = arith.mulf %229, %236 : vector<1x128xf32>
    %421 = arith.mulf %222, %215 : vector<1x128xf32>
    %422 = arith.addf %420, %421 : vector<1x128xf32>
    %423 = arith.mulf %387, %422 : vector<1x128xf32>
    %424 = arith.mulf %222, %222 : vector<1x128xf32>
    %425 = arith.mulf %229, %229 : vector<1x128xf32>
    %426 = arith.addf %424, %425 : vector<1x128xf32>
    %427 = arith.mulf %387, %426 : vector<1x128xf32>
    %cst_120 = arith.constant 1.000000e+00 : f32
    %428 = vector.broadcast %cst_120 : f32 to vector<1x128xf32>
    %429 = arith.subf %428, %427 : vector<1x128xf32>
    %430 = tpu.concatenate %393, %397, %401, %405, %411, %415, %419, %423, %429 in 0 : vector<1x128xf32>, vector<1x128xf32>, vector<1x128xf32>, vector<1x128xf32>, vector<1x128xf32>, vector<1x128xf32>, vector<1x128xf32>, vector<1x128xf32>, vector<1x128xf32> -> vector<9x128xf32>
    %c0_121 = arith.constant 0 : index
    %431 = arith.index_cast %53 : i32 to index
    %432 = vector.load %arg14[%c0_121, %431] : memref<9x128xf32, #tpu.memory_space<vmem>>, vector<9x128xf32>
    tpu.vector_store %arg14[%c0_121, %431], %430 {strides = array<i32>} : memref<9x128xf32, #tpu.memory_space<vmem>>, vector<9x128xf32>,
    %c1_i32_122 = arith.constant 1 : i32
    %c0_123 = arith.constant 0 : index
    %c0_124 = arith.constant 0 : index
    %433 = vector.load %arg21[%c0_123, %c0_124] : memref<6x128xf32, #tpu.memory_space<vmem>>, vector<6x128xf32>
    %c0_125 = arith.constant 0 : index
    %c0_126 = arith.constant 0 : index
    %434 = vector.load %arg17[%c0_125, %c0_126] : memref<6x128xf32, #tpu.memory_space<vmem>>, vector<6x128xf32>
    tpu.vector_store %arg17[%c0_125, %c0_126], %433 {strides = array<i32>} : memref<6x128xf32, #tpu.memory_space<vmem>>, vector<6x128xf32>,
    return
  }
  func.func @transform_0(%arg0: i32) -> (i32, i32) {
    %c0_i32 = arith.constant 0 : i32
    %c0_i32_0 = arith.constant 0 : i32
    return %arg0, %c0_i32 : i32, i32
  }
  func.func @transform_1(%arg0: i32) -> (i32, i32) {
    %c0_i32 = arith.constant 0 : i32
    %c0_i32_0 = arith.constant 0 : i32
    return %arg0, %c0_i32 : i32, i32
  }
  func.func @transform_2(%arg0: i32) -> (i32, i32) {
    %c0_i32 = arith.constant 0 : i32
    %c0_i32_0 = arith.constant 0 : i32
    return %arg0, %c0_i32 : i32, i32
  }
  func.func @transform_3(%arg0: i32) -> (i32, i32) {
    %c0_i32 = arith.constant 0 : i32
    %c0_i32_0 = arith.constant 0 : i32
    %c0_i32_1 = arith.constant 0 : i32
    return %c0_i32, %c0_i32_0 : i32, i32
  }
  func.func @transform_4(%arg0: i32) -> (i32, i32) {
    %c0_i32 = arith.constant 0 : i32
    %c0_i32_0 = arith.constant 0 : i32
    %c0_i32_1 = arith.constant 0 : i32
    return %c0_i32, %c0_i32_0 : i32, i32
  }
  func.func @transform_5(%arg0: i32) -> (i32, i32) {
    %c0_i32 = arith.constant 0 : i32
    %c0_i32_0 = arith.constant 0 : i32
    %c0_i32_1 = arith.constant 0 : i32
    return %c0_i32, %c0_i32_0 : i32, i32
  }
  func.func @transform_6(%arg0: i32) -> (i32, i32) {
    %c0_i32 = arith.constant 0 : i32
    %c0_i32_0 = arith.constant 0 : i32
    %c0_i32_1 = arith.constant 0 : i32
    return %c0_i32, %c0_i32_0 : i32, i32
  }
  func.func @transform_7(%arg0: i32) -> (i32, i32) {
    %c0_i32 = arith.constant 0 : i32
    %c0_i32_0 = arith.constant 0 : i32
    %c0_i32_1 = arith.constant 0 : i32
    return %c0_i32, %c0_i32_0 : i32, i32
  }
  func.func @transform_8(%arg0: i32) -> (i32, i32) {
    %c0_i32 = arith.constant 0 : i32
    %c0_i32_0 = arith.constant 0 : i32
    %c0_i32_1 = arith.constant 0 : i32
    return %c0_i32, %c0_i32_0 : i32, i32
  }
  func.func @transform_9(%arg0: i32) -> (i32, i32) {
    %c0_i32 = arith.constant 0 : i32
    %c0_i32_0 = arith.constant 0 : i32
    %c0_i32_1 = arith.constant 0 : i32
    return %c0_i32, %c0_i32_0 : i32, i32
  }
  func.func @transform_10(%arg0: i32) -> (i32, i32) {
    %c0_i32 = arith.constant 0 : i32
    %c0_i32_0 = arith.constant 0 : i32
    %c0_i32_1 = arith.constant 0 : i32
    return %c0_i32, %c0_i32_0 : i32, i32
  }
  func.func @transform_11(%arg0: i32) -> (i32, i32) {
    %c0_i32 = arith.constant 0 : i32
    %c0_i32_0 = arith.constant 0 : i32
    %c0_i32_1 = arith.constant 0 : i32
    return %c0_i32, %c0_i32_0 : i32, i32
  }
  func.func @transform_12(%arg0: i32) -> (i32, i32) {
    %c0_i32 = arith.constant 0 : i32
    %c0_i32_0 = arith.constant 0 : i32
    %c0_i32_1 = arith.constant 0 : i32
    return %c0_i32, %c0_i32_0 : i32, i32
  }
  func.func @transform_13(%arg0: i32) -> (i32, i32) {
    %c0_i32 = arith.constant 0 : i32
    %c0_i32_0 = arith.constant 0 : i32
    return %c0_i32, %arg0 : i32, i32
  }
  func.func @transform_14(%arg0: i32) -> (i32, i32) {
    %c0_i32 = arith.constant 0 : i32
    %c0_i32_0 = arith.constant 0 : i32
    return %c0_i32, %arg0 : i32, i32
  }
  func.func @transform_15(%arg0: i32) -> (i32, i32) {
    %c0_i32 = arith.constant 0 : i32
    %c0_i32_0 = arith.constant 0 : i32
    return %c0_i32, %arg0 : i32, i32
  }
  func.func @transform_16(%arg0: i32) -> (i32, i32) {
    %c0_i32 = arith.constant 0 : i32
    %c0_i32_0 = arith.constant 0 : i32
    return %c0_i32, %arg0 : i32, i32
  }
}

</mosaic_0001>

<bundles_post_ra>
// kernel: condition16transr_forward.1
= control target key start
LH: loop header
LB: loop body
LE: loop exit
PB: predicated region body
PF: predicated region fallthrough
CT: control target
= control target key end

     0   :  { %s7379_s0 = inlined_call_operand.vmem [shape: f32[128,32], index: 0, kind: input, shape index: {}]   ;;  %s7380_s1 = inlined_call_operand.vmem [shape: f32[128,9], index: 1, kind: input, shape index: {}]   ;;  %s7381_s2 = inlined_call_operand.vmem [shape: f32[128,3], index: 2, kind: input, shape index: {}]   ;;  %s7382_s3 = inlined_call_operand.vmem [shape: f32[64,32], index: 3, kind: input, shape index: {}]   ;;  %s7383_s4 = inlined_call_operand.vmem [shape: f32[64,1], index: 4, kind: input, shape index: {}]   ;;  %s7384_s5 = inlined_call_operand.vmem [shape: f32[37,64], index: 5, kind: input, shape index: {}]   ;;  %s7385_s6 = inlined_call_operand.vmem [shape: f32[37,1], index: 6, kind: input, shape index: {}]   ;;  %s7386_s7 = inlined_call_operand.vmem [shape: f32[16,9], index: 7, kind: input, shape index: {}]   ;;  %s7387_s8 = inlined_call_operand.vmem [shape: f32[16,1], index: 8, kind: input, shape index: {}]   ;;  %s7388_s9 = inlined_call_operand.vmem [shape: f32[3,3], index: 9, kind: input, shape index: {}]   ;;  %s7389_s10 = inlined_call_operand.vmem [shape: f32[3,3], index: 10, kind: input, shape index: {}]   ;;  %s7390_s11 = inlined_call_operand.vmem [shape: f32[1,3], index: 11, kind: input, shape index: {}]   ;;  %s7391_s12 = inlined_call_operand.<no memory space> [shape: f32[1,1], index: 12, kind: input, shape index: {}]   ;;  %s7392_s13 = inlined_call_operand.vmem [shape: f32[9,128], index: 13, kind: output, shape index: {0}]   ;;  %s7393_s14 = inlined_call_operand.vmem [shape: f32[3,128], index: 14, kind: output, shape index: {1}]   ;;  %s7394_s15 = inlined_call_operand.vmem [shape: f32[1,128], index: 15, kind: output, shape index: {2}]   ;;  %s7395_s16 = inlined_call_operand.vmem [shape: f32[6,128], index: 16, kind: output, shape index: {3}]  }
   0x1   :  { %7430 = sst [smem:[#allocation28_spill]] %s7379_s0 }
   0x2   :  { %23 = vsyncpa [#allocation8], 0  ;;  %s51_s23 = sshll.u32 %s7389_s10, 4  ;;  %s52_s23 = int_to_ptr.vmem [resolvable:$true] %s51_s23 }
   0x3   :  { %24 = vsyncpa [#allocation10], 0  ;;  %s61_s26 = sshll.u32 %s7390_s11, 4  ;;  %s5174_s27 = scalar_lea.vmem %s52_s23, 64  ;;  %s62_s26 = int_to_ptr.vmem [resolvable:$true] %s61_s26 }
   0x4   :  { %p5175_p0 = scmp.ne.s32.totalorder %s52_s23, %s5174_s27  ;;  %p5179_p1 = scmp.lt.s32.totalorder %s52_s23, %s52_s23 }
   0x5   :  { %p5180_p2 = scmp.lt.s32.totalorder %s5174_s27, %s5174_s27 }
   0x7   :  { %p5181_p3 = por %p5180_p2, %p5179_p1 }
   0x9   :  { %p5182_p4 = pnand %p5181_p3, %p5175_p0 }
   0xb   :  { %5185 = shalt.err (!%p5182_p4)
}
   0xc   :  { %s5202_s28 = smov [#allocation7]   ;;  %s5186_s29 = scalar_lea.vmem %s62_s26, 16 }
   0xd   :  { %54 = dma.vmem_to_smem %s52_s23, 64, %s5202_s28, [#allocation8]  }
   0xe   :  { %p5187_p5 = scmp.ne.s32.totalorder %s62_s26, %s5186_s29  ;;  %p5191_p6 = scmp.lt.s32.totalorder %s62_s26, %s62_s26 }
   0xf   :  { %p5192_p7 = scmp.lt.s32.totalorder %s5186_s29, %s5186_s29 }
  0x11   :  { %p5193_p8 = por %p5192_p7, %p5191_p6 }
  0x13   :  { %p5194_p9 = pnand %p5193_p8, %p5187_p5 }
  0x15   :  { %5197 = shalt.err (!%p5194_p9)
}
  0x16   :  { %s5203_s10 = smov [#allocation9]  }
  0x17   :  { %64 = dma.vmem_to_smem %s62_s26, 16, %s5203_s10, [#allocation10]  }
  0x18   :  { %5198 = dma.done.wait [#allocation8], 64  }
  0x19   :  { %5199 = vsyncadd [#allocation8], 4294967232 }
  0x1a   :  { %5200 = dma.done.wait [#allocation10], 16  }
  0x1b   :  { %5201 = vsyncadd [#allocation10], 4294967280 }
  0x1c   :  { %73 = sfence }
  0x1d   :  { %s7431_s0 = sld [smem:[#allocation28_spill]]  ;;  %vm146_vm0 = vcmask 261120   ;;  %v90_v48 = vld [vmem:[%s7382_s3] sm:$0xff]  ;;  %vm5206_vm1 = vmmov 0   ;;  %vm1204_vm2 = vcmask 523264   ;;  %vm1964_vm3 = vcmask 72704  }
  0x1e   :  { %v148_v53 = vsel %vm146_vm0, %v90_v48, 0  ;;  %vm2722_vm4 = vcmask 23552   ;;  %vm5207_vm15 = vmmov 1   ;;  %s3426_s17 = sld [smem:[#allocation9]] }
  0x1f   :  { %v5432_v58 = vand.u32 4294901760, %v148_v53  ;;  %s3840_s18 = sld [smem:[#allocation9 + $0x1]] }
  0x20   :  { %s7343_s19 = sld [smem:[#allocation7]] }
  0x21   :  { %7437 = vst [vmem:[#allocation18_spill] sm:$0xff] %v5432_v58  ;;  %v5435_v59 = vsub.f32 %v148_v53, %v5432_v58  ;;  %4350 = vmatprep.mubr.f32.mxu1 %v5432_v58  ;;  %s7345_s20 = sld [smem:[#allocation7 + $0x1]] }
  0x22   :  { %s7349_s21 = sld [smem:[#allocation7 + $0x80]] }
  0x23   :  { %v89_v0 = vld [vmem:[%s7431_s0 + $0x78] sm:$0xff]  ;;  %v88_v1 = vld [vmem:[%s7431_s0 + $0x70] sm:$0xff]  ;;  %v87_v2 = vld [vmem:[%s7431_s0 + $0x68] sm:$0xff]  ;;  %s7353_s22 = sld [smem:[#allocation7 + $0x100]] }
  0x24   :  { %v217_v3 = vsel %vm146_vm0, %v89_v0, 0  ;;  %v214_v4 = vsel %vm146_vm0, %v88_v1, 0  ;;  %v211_v5 = vsel %vm146_vm0, %v87_v2, 0  ;;  %v86_v6 = vld [vmem:[%s7431_s0 + $0x60] sm:$0xff]  ;;  %v85_v7 = vld [vmem:[%s7431_s0 + $0x58] sm:$0xff]  ;;  %v84_v12 = vld [vmem:[%s7431_s0 + $0x50] sm:$0xff] }
  0x25   :  { %v5317_v8 = vand.u32 4294901760, %v217_v3  ;;  %v5319_v9 = vand.u32 4294901760, %v214_v4  ;;  %v5321_v10 = vand.u32 4294901760, %v211_v5  ;;  %v208_v11 = vsel %vm146_vm0, %v86_v6, 0  ;;  %v83_v24 = vld [vmem:[%s7431_s0 + $0x48] sm:$0xff]  ;;  %v82_v34 = vld [vmem:[%s7431_s0 + $0x40] sm:$0xff] }
  0x26   :  { %v5327_v13 = vand.u32 4294901760, %v208_v11  ;;  %v205_v14 = vsel %vm146_vm0, %v85_v7, 0  ;;  %v202_v19 = vsel %vm146_vm0, %v84_v12, 0  ;;  %v199_v28 = vsel %vm146_vm0, %v83_v24, 0  ;;  %v81_v41 = vld [vmem:[%s7431_s0 + $0x38] sm:$0xff]  ;;  %v80_v49 = vld [vmem:[%s7431_s0 + $0x30] sm:$0xff] }
  0x27   :  { %4274 = vmatprep.subr.mxu0 %v5317_v8  ;;  %v5332_v15 = vsub.f32 %v217_v3, %v5317_v8  ;;  %v5335_v16 = vsub.f32 %v214_v4, %v5319_v9  ;;  %v5338_v17 = vsub.f32 %v211_v5, %v5321_v10  ;;  %v5341_v18 = vand.u32 4294901760, %v205_v14  ;;  %v79_v57 = vld [vmem:[%s7431_s0 + $0x28] sm:$0xff]  ;;  %v78_v2 = vld [vmem:[%s7431_s0 + $0x20] sm:$0xff]  ;;  %s7357_s23 = sld [smem:[#allocation7 + $0x82]] }
  0x28   :  { %4275 = vmatpush3.xpose.msra.mxu0 %v5317_v8  ;;  %v5355_v23 = vsub.f32 %v208_v11, %v5327_v13  ;;  %v5365_v27 = vand.u32 4294901760, %v202_v19  ;;  %v5381_v35 = vand.u32 4294901760, %v199_v28  ;;  %v196_v40 = vsel %vm146_vm0, %v82_v34, 0 }
  0x29   :  { %4276 = vmatprep.subr.mxu0 %v5319_v9  ;;  %v5346_v20 = vand.u32 4294901760, %v5332_v15  ;;  %v5349_v21 = vand.u32 4294901760, %v5335_v16  ;;  %v5352_v22 = vand.u32 4294901760, %v5338_v17  ;;  %v5369_v29 = vsub.f32 %v205_v14, %v5341_v18 }
  0x2a   :  { %v5375_v33 = vand.u32 4294901760, %v5355_v23  ;;  %v5384_v36 = vsub.f32 %v202_v19, %v5365_v27  ;;  %v5401_v43 = vsub.f32 %v199_v28, %v5381_v35  ;;  %v5406_v46 = vand.u32 4294901760, %v196_v40  ;;  %v77_v19 = vld [vmem:[%s7431_s0 + $0x18] sm:$0xff] }
  0x2b   :  { %7432 = vst [vmem:[#allocation13_spill] sm:$0xff] %v5352_v22  ;;  %v384_v25 = vsub.f32 %v5332_v15, %v5346_v20  ;;  %v391_v26 = vsub.f32 %v5335_v16, %v5349_v21  ;;  %v398_v32 = vsub.f32 %v5338_v17, %v5352_v22  ;;  %v5390_v39 = vand.u32 4294901760, %v5369_v29  ;;  %v105_v28 = vld [vmem:[%s7383_s4 + $0x38] sm:$0xff] }
  0x2c   :  { %4277 = vmatpush3.xpose.msra.mxu0 %v5319_v9  ;;  %7433 = vst [vmem:[#allocation14_spill] sm:$0xff] %v5375_v33  ;;  %v405_v38 = vsub.f32 %v5355_v23, %v5375_v33  ;;  %v5398_v42 = vand.u32 4294901760, %v5384_v36  ;;  %v193_v47 = vsel %vm146_vm0, %v81_v41, 0  ;;  %v5421_v52 = vand.u32 4294901760, %v5401_v43 }
  0x2d   :  { %4278 = vmatprep.subr.mxu0 %v5321_v10  ;;  %v385_v30 = vand.u32 4294901760, %v384_v25  ;;  %v392_v31 = vand.u32 4294901760, %v391_v26  ;;  %v399_v37 = vand.u32 4294901760, %v398_v32  ;;  %7434 = vst [vmem:[#allocation15_spill] sm:$0xff] %v5390_v39  ;;  %v412_v45 = vsub.f32 %v5369_v29, %v5390_v39 }
  0x2e   :  { %7435 = vst [vmem:[#allocation16_spill] sm:$0xff] %v5398_v42  ;;  %v406_v44 = vand.u32 4294901760, %v405_v38  ;;  %v419_v50 = vsub.f32 %v5384_v36, %v5398_v42  ;;  %v5418_v51 = vand.u32 4294901760, %v193_v47  ;;  %7436 = vst [vmem:[#allocation17_spill] sm:$0xff] %v5421_v52  ;;  %v190_v55 = vsel %vm146_vm0, %v80_v49, 0  ;;  %v76_v38 = vld [vmem:[%s7431_s0 + $0x10] sm:$0xff] }
  0x2f   :  { %4318 = vmatprep.subr.mxu1 %v385_v30  ;;  %v413_v54 = vand.u32 4294901760, %v412_v45  ;;  %v5427_v56 = vsub.f32 %v196_v40, %v5406_v46  ;;  %v5439_v61 = vand.u32 4294901760, %v190_v55  ;;  %v187_v62 = vsel %vm146_vm0, %v79_v57, 0  ;;  %v104_v45 = vld [vmem:[%s7383_s4 + $0x30] sm:$0xff] }
  0x30   :  { %4279 = vmatpush3.xpose.msra.mxu0 %v5321_v10  ;;  %4319 = vmatpush3.xpose.msra.mxu1 %v385_v30  ;;  %v420_v60 = vand.u32 4294901760, %v419_v50  ;;  %v426_v63 = vsub.f32 %v5401_v43, %v5421_v52  ;;  %v5449_v1 = vsub.f32 %v193_v47, %v5418_v51  ;;  %v7399_v3 = vand.u32 4294901760, %v5435_v59  ;;  %v103_v30 = vld [vmem:[%s7383_s4 + $0x28] sm:$0xff]  ;;  %v102_v47 = vld [vmem:[%s7383_s4 + $0x20] sm:$0xff] }
  0x31   :  { %4280 = vmatprep.subr.mxu0 %v5327_v13  ;;  %4320 = vmatprep.subr.mxu1 %v392_v31  ;;  %v5446_v0 = vand.u32 4294901760, %v5427_v56  ;;  %v5459_v5 = vand.u32 4294901760, %v187_v62  ;;  %v184_v6 = vsel %vm146_vm0, %v78_v2, 0  ;;  %v5463_v7 = vsub.f32 %v190_v55, %v5439_v61 }
  0x32   :  { %v303_v4 = vsub.f32 %v5435_v59, %v7399_v3  ;;  %v427_v11 = vand.u32 4294901760, %v426_v63  ;;  %v5469_v14 = vand.u32 4294901760, %v5449_v1  ;;  %v5475_v25 = vand.u32 4294901760, %v184_v6 }
  0x33   :  { %7438 = vst [vmem:[#allocation19_spill] sm:$0xff] %v5446_v0  ;;  %v433_v12 = vsub.f32 %v5427_v56, %v5446_v0  ;;  %v181_v26 = vsel %vm146_vm0, %v77_v19, 0  ;;  %v5488_v34 = vand.u32 4294901760, %v5463_v7  ;;  %v7397_v40 = vmov 0  }
  0x34   :  { %4281 = vmatpush3.xpose.msra.mxu0 %v5327_v13  ;;  %4321 = vmatpush3.xpose.msra.mxu1 %v392_v31  ;;  %7439 = vst [vmem:[#allocation20_spill] sm:$0xff] %v5469_v14  ;;  %v304_v24 = vand.u32 4294901760, %v303_v4  ;;  %v440_v32 = vsub.f32 %v5449_v1, %v5469_v14  ;;  %v5499_v41 = vand.u32 4294901760, %v181_v26  ;;  %v5515_v53 = vsub.f32 %v184_v6, %v5475_v25 }
  0x35   :  { %4282 = vmatprep.subr.mxu0 %v5341_v18  ;;  %4322 = vmatprep.subr.mxu1 %v399_v37  ;;  %v434_v31 = vand.u32 4294901760, %v433_v12  ;;  %7440 = vst [vmem:[#allocation21_spill] sm:$0xff] %v5488_v34  ;;  %v447_v49 = vsub.f32 %v5463_v7, %v5488_v34  ;;  %v91_v12 = vld [vmem:[%s7382_s3 + $0x8] sm:$0xff] }
  0x36   :  { %4306 = vmatprep.mubr.f32.mxu0 %v304_v24  ;;  %5151 = vset.pattern.permute.xlu1 %v7397_v40  ;;  %v441_v48 = vand.u32 4294901760, %v440_v32  ;;  %v5534_v4 = vand.u32 4294901760, %v5515_v53  ;;  %v5537_v6 = vsub.f32 %v181_v26, %v5499_v41  ;;  %v151_v26 = vsel %vm146_vm0, %v91_v12, 0 }
  0x37   :  { %5150 = vset.pattern.permute.xlu0 %v7397_v40  ;;  %133 = vperm.xlu1 %5151, %v103_v30   ;;  %v448_v63 = vand.u32 4294901760, %v447_v49  ;;  %v99_v30 = vld [vmem:[%s7383_s4 + $0x8] sm:$0xff]  ;;  %v5571_v49 = vand.u32 4294901760, %v151_v26 }
  0x38   :  { %4283 = vmatpush3.xpose.msra.mxu0 %v5341_v18  ;;  %4323 = vmatpush3.xpose.msra.mxu1 %v399_v37  ;;  %v5491_v37 = vsub.f32 %v187_v62, %v5459_v5  ;;  %v100_v62 = vld [vmem:[%s7383_s4 + $0x10] sm:$0xff]  ;;  %7442 = vst [vmem:[#allocation23_spill] sm:$0xff] %v5534_v4 }
  0x39   :  { %4284 = vmatprep.subr.mxu0 %v5365_v27  ;;  %4324 = vmatprep.subr.mxu1 %v406_v44 }
  0x3a   :  { %143 = vperm.xlu0 %5150, %v105_v28   ;;  %v5512_v50 = vand.u32 4294901760, %v5491_v37  ;;  %v92_v28 = vld [vmem:[%s7382_s3 + $0x10] sm:$0xff] }
  0x3b   :  { %128 = vperm.xlu1 %5151, %v102_v47  }
  0x3c   :  { %4285 = vmatpush3.xpose.msra.mxu0 %v5365_v27  ;;  %4325 = vmatpush3.xpose.msra.mxu1 %v406_v44  ;;  %v178_v44 = vsel %vm146_vm0, %v76_v38, 0  ;;  %7441 = vst [vmem:[#allocation22_spill] sm:$0xff] %v5512_v50  ;;  %v454_v2 = vsub.f32 %v5491_v37, %v5512_v50  ;;  %v461_v38 = vsub.f32 %v5515_v53, %v5534_v4 }
  0x3d   :  { %4286 = vmatprep.subr.mxu0 %v5381_v35  ;;  %4326 = vmatprep.subr.mxu1 %v413_v54  ;;  %v5521_v55 = vand.u32 4294901760, %v178_v44 }
  0x3e   :  { %138 = vperm.xlu0 %5150, %v104_v45   ;;  %v455_v32 = vand.u32 4294901760, %v454_v2  ;;  %v5563_v45 = vand.u32 4294901760, %v5537_v6  ;;  %v462_v2 = vand.u32 4294901760, %v461_v38 }
  0x3f   :  { %118 = vperm.xlu1 %5151, %v100_v62   ;;  %v5566_v47 = vsub.f32 %v178_v44, %v5521_v55  ;;  %v94_v44 = vld [vmem:[%s7382_s3 + $0x20] sm:$0xff] }
  0x40   :  { %4287 = vmatpush3.xpose.msra.mxu0 %v5381_v35  ;;  %4327 = vmatpush3.xpose.msra.mxu1 %v413_v54  ;;  %v75_v54 = vld [vmem:[%s7431_s0 + $0x8] sm:$0xff]  ;;  %7443 = vst [vmem:[#allocation24_spill] sm:$0xff] %v5563_v45  ;;  %v160_v38 = vsel %vm146_vm0, %v94_v44, 0 }
  0x41   :  { %4288 = vmatprep.subr.mxu0 %v5406_v46  ;;  %4328 = vmatprep.subr.mxu1 %v420_v60  ;;  %v175_v57 = vsel %vm146_vm0, %v75_v54, 0  ;;  %v154_v54 = vsel %vm146_vm0, %v92_v28, 0  ;;  %v5585_v12 = vand.u32 4294901760, %v5566_v47  ;;  %v95_v28 = vld [vmem:[%s7382_s3 + $0x28] sm:$0xff]  ;;  %v5621_v4 = vand.u32 4294901760, %v160_v38 }
  0x42   :  { %v5546_v19 = vand.u32 4294901760, %v175_v57  ;;  %v163_v40 = vsel %vm146_vm0, %v95_v28, 0 }
  0x43   :  { %7444 = vst [vmem:[#allocation25_spill] sm:$0xff] %v5585_v12  ;;  %v5640_v0 = vsub.f32 %v160_v38, %v5621_v4 }
  0x44   :  { %4289 = vmatpush3.xpose.msra.mxu0 %v5406_v46  ;;  %4329 = vmatpush3.xpose.msra.mxu1 %v420_v60  ;;  %v101_v60 = vld [vmem:[%s7383_s4 + $0x18] sm:$0xff] }
  0x45   :  { %4290 = vmatprep.subr.mxu0 %v5418_v51  ;;  %4330 = vmatprep.subr.mxu1 %v427_v11 }
  0x46   :  { %123 = vperm.xlu0 %5150, %v101_v60  }
  0x48   :  { %4291 = vmatpush3.xpose.msra.mxu0 %v5418_v51  ;;  %4331 = vmatpush3.xpose.msra.mxu1 %v427_v11  ;;  %v74_v11 = vld [vmem:[%s7431_s0] sm:$0xff] }
  0x49   :  { %4292 = vmatprep.subr.mxu0 %v5439_v61  ;;  %4332 = vmatprep.subr.mxu1 %v434_v31  ;;  %v172_v24 = vsel %vm146_vm0, %v74_v11, 0  ;;  %v468_v11 = vsub.f32 %v5537_v6, %v5563_v45 }
  0x4a   :  { %113 = vperm.xlu0 %5150, %v99_v30   ;;  %v5575_v60 = vand.u32 4294901760, %v172_v24  ;;  %v5593_v30 = vand.u32 4294901760, %v154_v54 }
  0x4b   :  { %v469_v3 = vand.u32 4294901760, %v468_v11 }
  0x4c   :  { %4293 = vmatpush3.xpose.msra.mxu0 %v5439_v61  ;;  %4333 = vmatpush3.xpose.msra.mxu1 %v434_v31  ;;  %v98_v31 = vld [vmem:[%s7383_s4] sm:$0xff]  ;;  %v5613_v44 = vsub.f32 %v172_v24, %v5575_v60  ;;  %v5619_v28 = vsub.f32 %v154_v54, %v5593_v30  ;;  %s7351_s4 = sld [smem:[#allocation7 + $0x81]] }
  0x4d   :  { %4294 = vmatprep.subr.mxu0 %v5459_v5  ;;  %4334 = vmatprep.subr.mxu1 %v441_v48 }
  0x4e   :  { %108 = vperm.xlu1 %5151, %v98_v31   ;;  %v5596_v31 = vsub.f32 %v151_v26, %v5571_v49  ;;  %v475_v26 = vsub.f32 %v5566_v47, %v5585_v12  ;;  %v5627_v12 = vand.u32 4294901760, %v163_v40  ;;  %v5636_v11 = vand.u32 4294901760, %v5613_v44 }
  0x4f   :  { %v7448_v42 = vand.u32 4294901760, %v5619_v28 }
  0x50   :  { %4295 = vmatpush3.xpose.msra.mxu0 %v5459_v5  ;;  %4335 = vmatpush3.xpose.msra.mxu1 %v441_v48  ;;  %v93_v48 = vld [vmem:[%s7382_s3 + $0x18] sm:$0xff]  ;;  %v476_v54 = vand.u32 4294901760, %v475_v26  ;;  %7446 = vst [vmem:[#allocation27_spill] sm:$0xff] %v5636_v11  ;;  %v5649_v26 = vsub.f32 %v163_v40, %v5627_v12 }
  0x51   :  { %4296 = vmatprep.subr.mxu0 %v5475_v25  ;;  %4336 = vmatprep.subr.mxu1 %v448_v63  ;;  %v157_v62 = vsel %vm146_vm0, %v93_v48, 0 }
  0x52   :  { %v5598_v48 = vand.u32 4294901760, %v157_v62  ;;  %v352_v33 = vand.u32 4294901760, %v5649_v26 }
  0x54   :  { %4297 = vmatpush3.xpose.msra.mxu0 %v5475_v25  ;;  %4337 = vmatpush3.xpose.msra.mxu1 %v448_v63  ;;  %v5588_v63 = vsub.f32 %v175_v57, %v5546_v19  ;;  %v96_v57 = vld [vmem:[%s7382_s3 + $0x30] sm:$0xff]  ;;  %v5625_v50 = vsub.f32 %v157_v62, %v5598_v48  ;;  %v489_v62 = vsub.f32 %v5613_v44, %v5636_v11 }
  0x55   :  { %4298 = vmatprep.subr.mxu0 %v5499_v41  ;;  %4338 = vmatprep.subr.mxu1 %v455_v32  ;;  %v166_v34 = vsel %vm146_vm0, %v96_v57, 0 }
  0x56   :  { %v5610_v45 = vand.u32 4294901760, %v5588_v63  ;;  %v5642_v57 = vand.u32 4294901760, %v166_v34  ;;  %v7449_v39 = vand.u32 4294901760, %v5625_v50 }
  0x58   :  { %4299 = vmatpush3.xpose.msra.mxu0 %v5499_v41  ;;  %4339 = vmatpush3.xpose.msra.mxu1 %v455_v32  ;;  %7445 = vst [vmem:[#allocation26_spill] sm:$0xff] %v5610_v45  ;;  %v97_v32 = vld [vmem:[%s7382_s3 + $0x38] sm:$0xff]  ;;  %v482_v14 = vsub.f32 %v5588_v63, %v5610_v45  ;;  %v5662_v40 = vsub.f32 %v166_v34, %v5642_v57  ;;  %v7450_v34 = vand.u32 4294901760, %v5640_v0 }
  0x59   :  { %4300 = vmatprep.subr.mxu0 %v5521_v55  ;;  %4340 = vmatprep.subr.mxu1 %v462_v2  ;;  %v169_v24 = vsel %vm146_vm0, %v97_v32, 0 }
  0x5a   :  { %v5651_v45 = vand.u32 4294901760, %v169_v24  ;;  %v483_v38 = vand.u32 4294901760, %v482_v14  ;;  %v362_v11 = vand.u32 4294901760, %v5662_v40 }
  0x5c   :  { %4301 = vmatpush3.xpose.msra.mxu0 %v5521_v55  ;;  %4341 = vmatpush3.xpose.msra.mxu1 %v462_v2  ;;  %v7447_v2 = vand.u32 4294901760, %v5596_v31  ;;  %v5669_v14 = vsub.f32 %v169_v24, %v5651_v45  ;;  %v353_v24 = vsub.f32 %v5649_v26, %v352_v33 }
  0x5d   :  { %4302 = vmatprep.subr.mxu0 %v5546_v19  ;;  %4342 = vmatprep.subr.mxu1 %v469_v3 }
  0x5e   :  { %v313_v32 = vsub.f32 %v5596_v31, %v7447_v2  ;;  %v323_v2 = vsub.f32 %v5619_v28, %v7448_v42  ;;  %v490_v42 = vand.u32 4294901760, %v489_v62  ;;  %v372_v22 = vand.u32 4294901760, %v5669_v14 }
  0x5f   :  { %v363_v62 = vsub.f32 %v5662_v40, %v362_v11 }
  0x60   :  { %4303 = vmatpush3.xpose.msra.mxu0 %v5546_v19  ;;  %4343 = vmatpush3.xpose.msra.mxu1 %v469_v3  ;;  %v314_v58 = vand.u32 4294901760, %v313_v32  ;;  %v333_v3 = vsub.f32 %v5625_v50, %v7449_v39  ;;  %v324_v52 = vand.u32 4294901760, %v323_v2  ;;  %v343_v32 = vsub.f32 %v5640_v0, %v7450_v34 }
  0x61   :  { %4304 = vmatprep.subr.mxu0 %v5575_v60  ;;  %4344 = vmatprep.subr.mxu1 %v476_v54  ;;  %v373_v2 = vsub.f32 %v5669_v14, %v372_v22 }
  0x62   :  { %v334_v39 = vand.u32 4294901760, %v333_v3 }
  0x64   :  { %4305 = vmatpush3.xpose.msra.mxu0 %v5575_v60  ;;  %4345 = vmatpush3.xpose.msra.mxu1 %v476_v54  ;;  %v344_v54 = vand.u32 4294901760, %v343_v32 }
  0x65   :  { %4346 = vmatprep.subr.mxu1 %v483_v38  ;;  %4362 = vmatprep.subr.mxu0 %v5332_v15 }
  0x67   :  { %4307 = vmatmul.mubr.f32.vlgmr.msra.gmra.mxu0 %v314_v58  ;;  %v354_v58 = vand.u32 4294901760, %v353_v24 }
  0x68   :  { %4347 = vmatpush3.xpose.msra.mxu1 %v483_v38  ;;  %4363 = vmatpush3.xpose.msra.mxu0 %v5332_v15  ;;  %v364_v15 = vand.u32 4294901760, %v363_v62 }
  0x69   :  { %4348 = vmatprep.subr.mxu1 %v490_v42  ;;  %4364 = vmatprep.subr.mxu0 %v5335_v16 }
  0x6a   :  { %4309 = vmatprep.mubr.f32.mxu0 %v324_v52  ;;  %v374_v52 = vand.u32 4294901760, %v373_v2 }
  0x6b   :  { %4310 = vmatmul.mubr.f32.gmra.mxu0 %v334_v39 }
  0x6c   :  { %4349 = vmatpush3.xpose.msra.mxu1 %v490_v42  ;;  %4365 = vmatpush3.xpose.msra.mxu0 %v5335_v16  ;;  %v1952_v16 = vld [vmem:[%s7387_s8] sm:$0xff] }
  0x6d   :  { %4366 = vmatprep.subr.mxu0 %v5338_v17  ;;  %4406 = vmatprep.subr.mxu1 %v5317_v8 }
  0x6e   :  { %4312 = vmatprep.mubr.f32.mxu0 %v344_v54  ;;  %1956 = vperm.xlu0 %5150, %v1952_v16  }
  0x6f   :  { %4351 = vmatmul.mubr.f32.vlgmr.msra.gmra.mxu1 %v5571_v49  ;;  %4313 = vmatmul.mubr.f32.gmra.mxu0 %v354_v58 }
  0x70   :  { %4367 = vmatpush3.xpose.msra.mxu0 %v5338_v17  ;;  %4407 = vmatpush3.xpose.msra.mxu1 %v5317_v8  ;;  %v7451_v17 = vand.u32 4294901760, %v5435_v59 }
  0x71   :  { %4368 = vmatprep.subr.mxu0 %v5355_v23  ;;  %4408 = vmatprep.subr.mxu1 %v5319_v9 }
  0x72   :  { %4353 = vmatprep.mubr.f32.mxu1 %v5593_v30  ;;  %4315 = vmatprep.mubr.f32.mxu0 %v364_v15 }
  0x73   :  { %4354 = vmatmul.mubr.f32.gmra.mxu1 %v5598_v48  ;;  %4316 = vmatmul.mubr.f32.gmra.mxu0 %v374_v52 }
  0x74   :  { %4369 = vmatpush3.xpose.msra.mxu0 %v5355_v23  ;;  %4409 = vmatpush3.xpose.msra.mxu1 %v5319_v9  ;;  %v1178_v23 = vld [vmem:[%s7385_s6 + $0x20] sm:$0x1f] }
  0x75   :  { %4370 = vmatprep.subr.mxu0 %v5369_v29  ;;  %4410 = vmatprep.subr.mxu1 %v5321_v10 }
  0x76   :  { %4356 = vmatprep.mubr.f32.mxu1 %v5621_v4  ;;  %4394 = vmatprep.mubr.f32.mxu0 %v5435_v59  ;;  %v7458_v59 = vld [vmem:[#allocation15_spill] sm:$0xff] }
  0x77   :  { %4357 = vmatmul.mubr.f32.gmra.mxu1 %v5627_v12  ;;  %1201 = vperm.xlu0 %5150, %v1178_v23  }
  0x78   :  { %4371 = vmatpush3.xpose.msra.mxu0 %v5369_v29  ;;  %4411 = vmatpush3.xpose.msra.mxu1 %v5321_v10  ;;  %v7452_v29 = vld [vmem:[#allocation13_spill] sm:$0xff] }
  0x79   :  { %4372 = vmatprep.subr.mxu0 %v5384_v36  ;;  %4412 = vmatprep.subr.mxu1 %v5327_v13 }
  0x7a   :  { %4359 = vmatprep.mubr.f32.mxu1 %v5642_v57 }
  0x7b   :  { %4360 = vmatmul.mubr.f32.gmra.mxu1 %v5651_v45 }
  0x7c   :  { %4373 = vmatpush3.xpose.msra.mxu0 %v5384_v36  ;;  %4413 = vmatpush3.xpose.msra.mxu1 %v5327_v13  ;;  %v7454_v36 = vand.u32 4294901760, %v5619_v28 }
  0x7d   :  { %4374 = vmatprep.subr.mxu0 %v5401_v43  ;;  %4414 = vmatprep.subr.mxu1 %v5341_v18 }
  0x7e   :  { %4438 = vmatprep.mubr.f32.mxu1 %v7451_v17 }
  0x80   :  { %4375 = vmatpush3.xpose.msra.mxu0 %v5401_v43  ;;  %4415 = vmatpush3.xpose.msra.mxu1 %v5341_v18  ;;  %v7456_v43 = vand.u32 4294901760, %v5625_v50 }
  0x81   :  { %4376 = vmatprep.subr.mxu0 %v5427_v56  ;;  %4416 = vmatprep.subr.mxu1 %v5365_v27 }
  0x84   :  { %4377 = vmatpush3.xpose.msra.mxu0 %v5427_v56  ;;  %4417 = vmatpush3.xpose.msra.mxu1 %v5365_v27  ;;  %v7457_v56 = vmov %v7450_v34 }
  0x85   :  { %4378 = vmatprep.subr.mxu0 %v5449_v1  ;;  %4418 = vmatprep.subr.mxu1 %v5381_v35 }
  0x88   :  { %4379 = vmatpush3.xpose.msra.mxu0 %v5449_v1  ;;  %4419 = vmatpush3.xpose.msra.mxu1 %v5381_v35  ;;  %v7459_v1 = vld [vmem:[#allocation18_spill] sm:$0xff] }
  0x89   :  { %4380 = vmatprep.subr.mxu0 %v5463_v7  ;;  %4420 = vmatprep.subr.mxu1 %v5406_v46 }
  0x8c   :  { %4381 = vmatpush3.xpose.msra.mxu0 %v5463_v7  ;;  %4421 = vmatpush3.xpose.msra.mxu1 %v5406_v46  ;;  %v7460_v7 = vld [vmem:[#allocation16_spill] sm:$0xff] }
  0x8d   :  { %4382 = vmatprep.subr.mxu0 %v5491_v37  ;;  %4422 = vmatprep.subr.mxu1 %v5418_v51 }
  0x90   :  { %4383 = vmatpush3.xpose.msra.mxu0 %v5491_v37  ;;  %4423 = vmatpush3.xpose.msra.mxu1 %v5418_v51  ;;  %v7462_v37 = vld [vmem:[#allocation19_spill] sm:$0xff] }
  0x91   :  { %4384 = vmatprep.subr.mxu0 %v5515_v53  ;;  %4424 = vmatprep.subr.mxu1 %v5439_v61 }
  0x94   :  { %4385 = vmatpush3.xpose.msra.mxu0 %v5515_v53  ;;  %4425 = vmatpush3.xpose.msra.mxu1 %v5439_v61 }
  0x95   :  { %4386 = vmatprep.subr.mxu0 %v5537_v6  ;;  %4426 = vmatprep.subr.mxu1 %v5459_v5 }
  0x98   :  { %4387 = vmatpush3.xpose.msra.mxu0 %v5537_v6  ;;  %4427 = vmatpush3.xpose.msra.mxu1 %v5459_v5 }
  0x99   :  { %4388 = vmatprep.subr.mxu0 %v5566_v47  ;;  %4428 = vmatprep.subr.mxu1 %v5475_v25 }
  0x9c   :  { %4389 = vmatpush3.xpose.msra.mxu0 %v5566_v47  ;;  %4429 = vmatpush3.xpose.msra.mxu1 %v5475_v25 }
  0x9d   :  { %4390 = vmatprep.subr.mxu0 %v5588_v63  ;;  %4430 = vmatprep.subr.mxu1 %v5499_v41 }
  0xa0   :  { %4391 = vmatpush3.xpose.msra.mxu0 %v5588_v63  ;;  %4431 = vmatpush3.xpose.msra.mxu1 %v5499_v41 }
  0xa1   :  { %4392 = vmatprep.subr.mxu0 %v5613_v44  ;;  %4432 = vmatprep.subr.mxu1 %v5521_v55 }
  0xa4   :  { %4393 = vmatpush3.xpose.msra.mxu0 %v5613_v44  ;;  %4433 = vmatpush3.xpose.msra.mxu1 %v5521_v55 }
  0xa5   :  { %4434 = vmatprep.subr.mxu1 %v5546_v19  ;;  %4450 = vmatprep.subr.mxu0 %v5346_v20 }
  0xa7   :  { %4395 = vmatmul.mubr.f32.vlgmr.msra.gmra.mxu0 %v5596_v31 }
  0xa8   :  { %4435 = vmatpush3.xpose.msra.mxu1 %v5546_v19  ;;  %4451 = vmatpush3.xpose.msra.mxu0 %v5346_v20  ;;  %v7453_v20 = vand.u32 4294901760, %v5596_v31 }
  0xa9   :  { %4397 = vmatprep.mubr.f32.mxu0 %v5619_v28  ;;  %4436 = vmatprep.subr.mxu1 %v5575_v60 }
  0xaa   :  { %4452 = vmatprep.subr.mxu0 %v5349_v21 }
  0xab   :  { %4398 = vmatmul.mubr.f32.gmra.mxu0 %v5625_v50  ;;  %v7464_v50 = vld [vmem:[#allocation21_spill] sm:$0xff] }
  0xac   :  { %4437 = vmatpush3.xpose.msra.mxu1 %v5575_v60  ;;  %4453 = vmatpush3.xpose.msra.mxu0 %v5349_v21  ;;  %v7455_v21 = vld [vmem:[#allocation14_spill] sm:$0xff] }
  0xad   :  { %4400 = vmatprep.mubr.f32.mxu0 %v5640_v0  ;;  %4454 = vmatprep.subr.mxu0 %v7452_v29  ;;  %v1176_v0 = vld [vmem:[%s7385_s6 + $0x10] sm:$0xff] }
  0xae   :  { %4494 = vmatprep.subr.mxu1 %v5317_v8 }
  0xaf   :  { %4401 = vmatmul.mubr.f32.gmra.mxu0 %v5649_v26  ;;  %4439 = vmatmul.mubr.f32.vlgmr.msra.gmra.mxu1 %v7453_v20 }
  0xb0   :  { %4455 = vmatpush3.xpose.msra.mxu0 %v7452_v29  ;;  %4495 = vmatpush3.xpose.msra.mxu1 %v5317_v8  ;;  %v1175_v8 = vld [vmem:[%s7385_s6 + $0x8] sm:$0xff] }
  0xb1   :  { %4403 = vmatprep.mubr.f32.mxu0 %v5662_v40  ;;  %4441 = vmatprep.mubr.f32.mxu1 %v7454_v36 }
  0xb2   :  { %4456 = vmatprep.subr.mxu0 %v7455_v21  ;;  %4496 = vmatprep.subr.mxu1 %v5319_v9  ;;  %v134_v42 = vpop.permute.xlu1 %133 }
  0xb3   :  { %4404 = vmatmul.mubr.f32.gmra.mxu0 %v5669_v14  ;;  %4442 = vmatmul.mubr.f32.gmra.mxu1 %v7456_v43 }
  0xb4   :  { %4457 = vmatpush3.xpose.msra.mxu0 %v7455_v21  ;;  %4497 = vmatpush3.xpose.msra.mxu1 %v5319_v9  ;;  %v1953_v9 = vld [vmem:[%s7387_s8 + $0x8] sm:$0xff]  ;;  %s7347_s8 = sld [smem:[#allocation7 + $0x2]] }
  0xb5   :  { %4444 = vmatprep.mubr.f32.mxu1 %v7457_v56  ;;  %4458 = vmatprep.subr.mxu0 %v7458_v59  ;;  %v144_v14 = vpop.permute.xlu0 %143 }
  0xb6   :  { %4498 = vmatprep.subr.mxu1 %v5321_v10  ;;  %4482 = vmatprep.mubr.f32.mxu0 %v7459_v1  ;;  %v129_v62 = vpop.permute.xlu1 %128 }
  0xb7   :  { %4445 = vmatmul.mubr.f32.gmra.mxu1 %v352_v33  ;;  %1186 = vperm.xlu0 %5150, %v1175_v8   ;;  %v7461_v33 = vld [vmem:[#allocation17_spill] sm:$0xff] }
  0xb8   :  { %4459 = vmatpush3.xpose.msra.mxu0 %v7458_v59  ;;  %4499 = vmatpush3.xpose.msra.mxu1 %v5321_v10  ;;  %v1174_v10 = vld [vmem:[%s7385_s6] sm:$0xff] }
  0xb9   :  { %4447 = vmatprep.mubr.f32.mxu1 %v362_v11  ;;  %4460 = vmatprep.subr.mxu0 %v7460_v7  ;;  %v139_v54 = vpop.permute.xlu0 %138 }
  0xba   :  { %4500 = vmatprep.subr.mxu1 %v5327_v13  ;;  %1961 = vperm.xlu1 %5151, %v1953_v9   ;;  %v119_v16 = vpop.permute.xlu1 %118 }
  0xbb   :  { %4448 = vmatmul.mubr.f32.gmra.mxu1 %v372_v22  ;;  %1191 = vperm.xlu0 %5150, %v1176_v0   ;;  %v1177_v22 = vld [vmem:[%s7385_s6 + $0x18] sm:$0xff]  ;;  %s7355_s6 = sld [smem:[#allocation7 + $0x101]] }
  0xbc   :  { %4461 = vmatpush3.xpose.msra.mxu0 %v7460_v7  ;;  %4501 = vmatpush3.xpose.msra.mxu1 %v5327_v13  ;;  %v7463_v13 = vld [vmem:[#allocation20_spill] sm:$0xff] }
  0xbd   :  { %4462 = vmatprep.subr.mxu0 %v7461_v33  ;;  %4502 = vmatprep.subr.mxu1 %v5341_v18 }
  0xbe   :  { %4526 = vmatprep.mubr.f32.mxu1 %v7459_v1  ;;  %1181 = vperm.xlu1 %5151, %v1174_v10  }
  0xc0   :  { %4463 = vmatpush3.xpose.msra.mxu0 %v7461_v33  ;;  %4503 = vmatpush3.xpose.msra.mxu1 %v5341_v18  ;;  %v7465_v18 = vld [vmem:[#allocation22_spill] sm:$0xff] }
  0xc1   :  { %4464 = vmatprep.subr.mxu0 %v7462_v37  ;;  %4504 = vmatprep.subr.mxu1 %v5365_v27  ;;  %v124_v52 = vpop.permute.xlu0 %123 }
  0xc2   :  { %1196 = vperm.xlu1 %5151, %v1177_v22  }
  0xc4   :  { %4465 = vmatpush3.xpose.msra.mxu0 %v7462_v37  ;;  %4505 = vmatpush3.xpose.msra.mxu1 %v5365_v27  ;;  %v7466_v27 = vld [vmem:[#allocation23_spill] sm:$0xff] }
  0xc5   :  { %4466 = vmatprep.subr.mxu0 %v7463_v13  ;;  %4506 = vmatprep.subr.mxu1 %v5381_v35  ;;  %v114_v8 = vpop.permute.xlu0 %113 }
  0xc8   :  { %4467 = vmatpush3.xpose.msra.mxu0 %v7463_v13  ;;  %4507 = vmatpush3.xpose.msra.mxu1 %v5381_v35  ;;  %v7467_v35 = vld [vmem:[#allocation24_spill] sm:$0xff] }
  0xc9   :  { %4468 = vmatprep.subr.mxu0 %v7464_v50  ;;  %4508 = vmatprep.subr.mxu1 %v5406_v46  ;;  %v109_v56 = vpop.permute.xlu1 %108 }
  0xcc   :  { %4469 = vmatpush3.xpose.msra.mxu0 %v7464_v50  ;;  %4509 = vmatpush3.xpose.msra.mxu1 %v5406_v46  ;;  %v7468_v46 = vld [vmem:[#allocation25_spill] sm:$0xff] }
  0xcd   :  { %4470 = vmatprep.subr.mxu0 %v7465_v18  ;;  %4510 = vmatprep.subr.mxu1 %v5418_v51 }
  0xd0   :  { %4471 = vmatpush3.xpose.msra.mxu0 %v7465_v18  ;;  %4511 = vmatpush3.xpose.msra.mxu1 %v5418_v51  ;;  %v7469_v51 = vld [vmem:[#allocation26_spill] sm:$0xff] }
  0xd1   :  { %4472 = vmatprep.subr.mxu0 %v7466_v27  ;;  %4512 = vmatprep.subr.mxu1 %v5439_v61 }
  0xd4   :  { %4473 = vmatpush3.xpose.msra.mxu0 %v7466_v27  ;;  %4513 = vmatpush3.xpose.msra.mxu1 %v5439_v61  ;;  %v7470_v61 = vld [vmem:[#allocation27_spill] sm:$0xff] }
  0xd5   :  { %4474 = vmatprep.subr.mxu0 %v7467_v35  ;;  %4514 = vmatprep.subr.mxu1 %v5459_v5 }
  0xd8   :  { %4475 = vmatpush3.xpose.msra.mxu0 %v7467_v35  ;;  %4515 = vmatpush3.xpose.msra.mxu1 %v5459_v5  ;;  %v5205_v5 = vmov 0.0  }
  0xd9   :  { %4476 = vmatprep.subr.mxu0 %v7468_v46  ;;  %4516 = vmatprep.subr.mxu1 %v5475_v25  ;;  %3416 = vst [vmem:[#allocation5] sm:$0x3f] %v5205_v5 }
  0xdc   :  { %4477 = vmatpush3.xpose.msra.mxu0 %v7468_v46  ;;  %4517 = vmatpush3.xpose.msra.mxu1 %v5475_v25 }
  0xdd   :  { %4478 = vmatprep.subr.mxu0 %v7469_v51  ;;  %4518 = vmatprep.subr.mxu1 %v5499_v41 }
  0xe0   :  { %4479 = vmatpush3.xpose.msra.mxu0 %v7469_v51  ;;  %4519 = vmatpush3.xpose.msra.mxu1 %v5499_v41 }
  0xe1   :  { %4480 = vmatprep.subr.mxu0 %v7470_v61  ;;  %4520 = vmatprep.subr.mxu1 %v5521_v55 }
  0xe4   :  { %4481 = vmatpush3.xpose.msra.mxu0 %v7470_v61  ;;  %4521 = vmatpush3.xpose.msra.mxu1 %v5521_v55 }
  0xe5   :  { %4522 = vmatprep.subr.mxu1 %v5546_v19  ;;  %4538 = vmatprep.subr.mxu0 %v5205_v5 }
  0xe7   :  { %4483 = vmatmul.mubr.f32.vlgmr.msra.gmra.mxu0 %v5571_v49 }
  0xe8   :  { %4523 = vmatpush3.xpose.msra.mxu1 %v5546_v19  ;;  %4485 = vmatprep.mubr.f32.mxu0 %v5593_v30 }
  0xe9   :  { %4524 = vmatprep.subr.mxu1 %v5575_v60 }
  0xeb   :  { %4486 = vmatmul.mubr.f32.gmra.mxu0 %v5598_v48 }
  0xec   :  { %4525 = vmatpush3.xpose.msra.mxu1 %v5575_v60  ;;  %4488 = vmatprep.mubr.f32.mxu0 %v5621_v4 }
  0xed   :  { %4569 = vmatprep.subr.mxu1 %v5205_v5 }
  0xef   :  { %4489 = vmatmul.mubr.f32.gmra.mxu0 %v5627_v12  ;;  %4527 = vmatmul.mubr.f32.vlgmr.msra.gmra.mxu1 %v5571_v49 }
  0xf0   :  { %4491 = vmatprep.mubr.f32.mxu0 %v5642_v57  ;;  %4529 = vmatprep.mubr.f32.mxu1 %v5593_v30 }
  0xf3   :  { %4492 = vmatmul.mubr.f32.gmra.mxu0 %v5651_v45  ;;  %4530 = vmatmul.mubr.f32.gmra.mxu1 %v5598_v48 }
  0xf4   :  { %4532 = vmatprep.mubr.f32.mxu1 %v5621_v4  ;;  %4554 = vmatprep.mubr.msk.f32.mxu0 %vm5206_vm1, %v5205_v5 }
  0xf7   :  { %4533 = vmatmul.mubr.f32.gmra.mxu1 %v5627_v12 }
  0xf8   :  { %4535 = vmatprep.mubr.f32.mxu1 %v5642_v57 }
  0xfb   :  { %4536 = vmatmul.mubr.f32.gmra.mxu1 %v5651_v45 }
  0xfc   :  { %4585 = vmatprep.mubr.msk.f32.mxu1 %vm5206_vm1, %v5205_v5 }
 0x127   :  { %v4308_v25 = vpop.f32.mrf.mxu0 }
 0x128   :  { %v317_v22 = vadd.f32 %v4308_v25, %v114_v8 }
 0x129   :  { %v306_v41 = vpop.f32.mrf.mxu0 }
 0x12a   :  { %v307_v37 = vadd.f32 %v306_v41, %v109_v56 }
 0x12b   :  { %v4311_v53 = vpop.f32.mrf.mxu0 }
 0x12c   :  { %v337_v20 = vadd.f32 %v4311_v53, %v124_v52 }
 0x12d   :  { %v326_v4 = vpop.f32.mrf.mxu0 }
 0x12e   :  { %v327_v59 = vadd.f32 %v326_v4, %v119_v16 }
 0x12f   :  { %v5889_v55 = vpop.f32.mrf.mxu1  ;;  %v4314_v19 = vpop.f32.mrf.mxu0 }
 0x130   :  { %v357_v36 = vadd.f32 %v4314_v19, %v134_v42  ;;  %v534_v4 = vadd.f32 %v5889_v55, %v317_v22 }
 0x131   :  { %v527_v6 = vpop.f32.mrf.mxu1  ;;  %v346_v47 = vpop.f32.mrf.mxu0 }
 0x132   :  { %v347_v1 = vadd.f32 %v346_v47, %v129_v62  ;;  %v528_v47 = vadd.f32 %v527_v6, %v307_v37 }
 0x133   :  { %v4355_v45 = vpop.f32.mrf.mxu1  ;;  %v4317_v60 = vpop.f32.mrf.mxu0 }
 0x134   :  { %v546_v7 = vadd.f32 %v4355_v45, %v337_v20  ;;  %v377_v10 = vadd.f32 %v4317_v60, %v144_v14 }
 0x135   :  { %v539_v49 = vpop.f32.mrf.mxu1  ;;  %v366_v63 = vpop.f32.mrf.mxu0 }
 0x136   :  { %v367_v18 = vadd.f32 %v366_v63, %v139_v54  ;;  %v540_v46 = vadd.f32 %v539_v49, %v327_v59 }
 0x137   :  { %v4358_v12 = vpop.f32.mrf.mxu1 }
 0x138   :  { %v558_v33 = vadd.f32 %v4358_v12, %v357_v36 }
 0x139   :  { %v551_v30 = vpop.f32.mrf.mxu1 }
 0x13a   :  { %v552_v51 = vadd.f32 %v551_v30, %v347_v1  ;;  %v1169_v30 = vld [vmem:[%s7384_s5] sm:$0xff] }
 0x13b   :  { %v4361_v48 = vpop.f32.mrf.mxu1  ;;  %v1206_v16 = vsel %vm1204_vm2, %v1169_v30, 0  ;;  %v1172_v30 = vld [vmem:[%s7384_s5 + $0x18] sm:$0xff] }
 0x13c   :  { %v570_v53 = vadd.f32 %v4361_v48, %v377_v10 }
 0x13d   :  { %v563_v28 = vpop.f32.mrf.mxu1 }
 0x13e   :  { %v564_v25 = vadd.f32 %v563_v28, %v367_v18 }
 0x167   :  { %v4396_v31 = vpop.f32.mrf.mxu0 }
 0x168   :  { %v681_v63 = vadd.f32 %v4396_v31, %v534_v4 }
 0x169   :  { %v5891_v44 = vpop.f32.mrf.mxu0 }
 0x16b   :  { %v4399_v11 = vpop.f32.mrf.mxu0 }
 0x16c   :  { %v695_v27 = vadd.f32 %v4399_v11, %v546_v7 }
 0x16d   :  { %v687_v26 = vpop.f32.mrf.mxu0 }
 0x16e   :  { %v688_v62 = vadd.f32 %v687_v26, %v540_v46 }
 0x16f   :  { %v5893_v57 = vpop.f32.mrf.mxu1  ;;  %v4402_v40 = vpop.f32.mrf.mxu0 }
 0x170   :  { %v709_v35 = vadd.f32 %v4402_v40, %v558_v33  ;;  %v820_v28 = vadd.f32 %v5893_v57, %v681_v63 }
 0x171   :  { %v5895_v38 = vpop.f32.mrf.mxu1  ;;  %v701_v34 = vpop.f32.mrf.mxu0 }
 0x172   :  { %v702_v45 = vadd.f32 %v701_v34, %v552_v51 }
 0x173   :  { %v4443_v3 = vpop.f32.mrf.mxu1  ;;  %v4405_v39 = vpop.f32.mrf.mxu0 }
 0x174   :  { %v836_v19 = vadd.f32 %v4443_v3, %v695_v27  ;;  %v723_v41 = vadd.f32 %v4405_v39, %v570_v53  ;;  %v674_v3 = vadd.f32 %v5891_v44, %v528_v47 }
 0x175   :  { %v827_v32 = vpop.f32.mrf.mxu1  ;;  %v715_v58 = vpop.f32.mrf.mxu0 }
 0x176   :  { %v828_v11 = vadd.f32 %v827_v32, %v688_v62  ;;  %v716_v48 = vadd.f32 %v715_v58, %v564_v25 }
 0x177   :  { %v4446_v24 = vpop.f32.mrf.mxu1 }
 0x178   :  { %v852_v42 = vadd.f32 %v4446_v24, %v709_v35 }
 0x179   :  { %v843_v2 = vpop.f32.mrf.mxu1 }
 0x17a   :  { %v844_v40 = vadd.f32 %v843_v2, %v702_v45 }
 0x17b   :  { %v4449_v17 = vpop.f32.mrf.mxu1 }
 0x17c   :  { %v868_v55 = vadd.f32 %v4449_v17, %v723_v41 }
 0x17d   :  { %v859_v21 = vpop.f32.mrf.mxu1 }
 0x17e   :  { %v860_v32 = vadd.f32 %v859_v21, %v716_v48  ;;  %v1170_v21 = vld [vmem:[%s7384_s5 + $0x8] sm:$0xff] }
 0x17f   :  { %v1209_v37 = vsel %vm1204_vm2, %v1170_v21, 0 }
 0x180   :  { %v5943_v53 = vand.u32 4294901760, %v1209_v37 }
 0x182   :  { %v5969_v63 = vsub.f32 %v1209_v37, %v5943_v53 }
 0x1a7   :  { %v5897_v15 = vpop.f32.mrf.mxu0 }
 0x1a8   :  { %v993_v58 = vadd.f32 %v5897_v15, %v820_v28 }
 0x1a9   :  { %v5899_v23 = vpop.f32.mrf.mxu0 }
 0x1ab   :  { %v4487_v29 = vpop.f32.mrf.mxu0 }
 0x1ac   :  { %v1005_v14 = vadd.f32 %v4487_v29, %v836_v19  ;;  %v812_v29 = vadd.f32 %v5895_v38, %v674_v3  ;;  %v5916_v38 = vand.u32 4294901760, %v1206_v16 }
 0x1ad   :  { %v998_v43 = vpop.f32.mrf.mxu0 }
 0x1ae   :  { %v999_v34 = vadd.f32 %v998_v43, %v828_v11  ;;  %v987_v43 = vadd.f32 %v5899_v23, %v812_v29 }
 0x1af   :  { %v4490_v9 = vpop.f32.mrf.mxu0  ;;  %v4528_v0 = vpop.f32.mrf.mxu1 }
 0x1b0   :  { %v1017_v52 = vadd.f32 %v4490_v9, %v852_v42  ;;  %v1122_v59 = vadd.f32 %v4528_v0, %v993_v58  ;;  %v1171_v0 = vld [vmem:[%s7384_s5 + $0x10] sm:$0xff] }
 0x1b1   :  { %v1010_v13 = vpop.f32.mrf.mxu0  ;;  %v1115_v50 = vpop.f32.mrf.mxu1  ;;  %v1212_v4 = vsel %vm1204_vm2, %v1171_v0, 0 }
 0x1b2   :  { %v1011_v39 = vadd.f32 %v1010_v13, %v844_v40  ;;  %v1116_v10 = vadd.f32 %v1115_v50, %v987_v43  ;;  %v1162_v35 = vmax.f32 %v1122_v59, 0.0  ;;  %v5932_v50 = vsub.f32 %v1206_v16, %v5916_v38 }
 0x1b3   :  { %v4531_v61 = vpop.f32.mrf.mxu1  ;;  %v4493_v60 = vpop.f32.mrf.mxu0 }
 0x1b4   :  { %v1134_v6 = vadd.f32 %v4531_v61, %v1005_v14  ;;  %v1029_v54 = vadd.f32 %v4493_v60, %v868_v55  ;;  %v1161_v19 = vmax.f32 %v1116_v10, 0.0  ;;  %v1295_v25 = vand.u32 4294901760, %v5932_v50 }
 0x1b5   :  { %v1127_v12 = vpop.f32.mrf.mxu1  ;;  %v1022_v24 = vpop.f32.mrf.mxu0 }
 0x1b6   :  { %v1128_v17 = vadd.f32 %v1127_v12, %v999_v34  ;;  %v1164_v8 = vmax.f32 %v1134_v6, 0.0  ;;  %v1023_v44 = vadd.f32 %v1022_v24, %v860_v32  ;;  %v5958_v12 = vand.u32 4294901760, %v1162_v35 }
 0x1b7   :  { %v4534_v49 = vpop.f32.mrf.mxu1  ;;  %v5971_v11 = vand.u32 4294901760, %v1161_v19  ;;  %v1296_v28 = vsub.f32 %v5932_v50, %v1295_v25  ;;  %v1305_v24 = vand.u32 4294901760, %v5969_v63 }
 0x1b8   :  { %v1146_v26 = vadd.f32 %v4534_v49, %v1017_v52  ;;  %v1163_v33 = vmax.f32 %v1128_v17, 0.0  ;;  %v5921_v13 = vand.u32 4294901760, %v1164_v8  ;;  %v5977_v49 = vand.u32 4294901760, %v1212_v4 }
 0x1b9   :  { %v1139_v31 = vpop.f32.mrf.mxu1  ;;  %v5991_v3 = vsub.f32 %v1162_v35, %v5958_v12  ;;  %v1297_v17 = vand.u32 4294901760, %v1296_v28 }
 0x1ba   :  { %v1166_v2 = vmax.f32 %v1146_v26, 0.0  ;;  %v1140_v20 = vadd.f32 %v1139_v31, %v1011_v39  ;;  %v5945_v42 = vand.u32 4294901760, %v1163_v33  ;;  %v5950_v47 = vsub.f32 %v1164_v8, %v5921_v13 }
 0x1bb   :  { %v4537_v36 = vpop.f32.mrf.mxu1  ;;  %v1215_v31 = vsel %vm1204_vm2, %v1172_v30, 0  ;;  %v1404_v58 = vand.u32 4294901760, %v5991_v3 }
 0x1bc   :  { %v5910_v56 = vand.u32 4294901760, %v1166_v2  ;;  %v1158_v57 = vadd.f32 %v4537_v36, %v1029_v54  ;;  %v1165_v1 = vmax.f32 %v1140_v20, 0.0  ;;  %v5974_v40 = vsub.f32 %v1163_v33, %v5945_v42  ;;  %v1173_v36 = vld [vmem:[%s7384_s5 + $0x20] sm:$0x1f] }
 0x1bd   :  { %v1151_v9 = vpop.f32.mrf.mxu1  ;;  %v1390_v48 = vand.u32 4294901760, %v5950_v47  ;;  %v6007_v54 = vsub.f32 %v1212_v4, %v5977_v49  ;;  %v6019_v20 = vand.u32 4294901760, %v1215_v31 }
 0x1be   :  { %v1168_v15 = vmax.f32 %v1158_v57, 0.0  ;;  %v1152_v7 = vadd.f32 %v1151_v9, %v1023_v44  ;;  %v5918_v22 = vand.u32 4294901760, %v1165_v1  ;;  %v5924_v18 = vsub.f32 %v1166_v2, %v5910_v56 }
 0x1bf   :  { %v1397_v32 = vand.u32 4294901760, %v5974_v40  ;;  %v6010_v2 = vsub.f32 %v1161_v19, %v5971_v11  ;;  %v1391_v16 = vsub.f32 %v5950_v47, %v1390_v48  ;;  %v1306_v44 = vsub.f32 %v5969_v63, %v1305_v24 }
 0x1c0   :  { %v5926_v27 = vand.u32 4294901760, %v1168_v15  ;;  %v1167_v23 = vmax.f32 %v1152_v7, 0.0  ;;  %v5935_v46 = vsub.f32 %v1165_v1, %v5918_v22  ;;  %v1376_v62 = vand.u32 4294901760, %v5924_v18 }
 0x1c1   :  { %v1398_v57 = vsub.f32 %v5974_v40, %v1397_v32  ;;  %v1315_v21 = vand.u32 4294901760, %v6007_v54  ;;  %v1411_v43 = vand.u32 4294901760, %v6010_v2  ;;  %v1392_v59 = vand.u32 4294901760, %v1391_v16 }
 0x1c2   :  { %v5938_v51 = vsub.f32 %v1168_v15, %v5926_v27  ;;  %v5940_v61 = vand.u32 4294901760, %v1167_v23  ;;  %4539 = vmatpush3.msra.mxu0 %v5926_v27  ;;  %v1383_v41 = vand.u32 4294901760, %v5935_v46  ;;  %v1377_v55 = vsub.f32 %v5924_v18, %v1376_v62 }
 0x1c3   :  { %4540 = vmatprep.subr.mxu0 %v5205_v5  ;;  %v1218_v1 = vsel %vm1204_vm2, %v1173_v36, 0  ;;  %v1405_v9 = vsub.f32 %v5991_v3, %v1404_v58  ;;  %v6042_v15 = vsub.f32 %v1215_v31, %v6019_v20  ;;  %v1307_v7 = vand.u32 4294901760, %v1306_v44 }
 0x1c4   :  { %v1362_v45 = vand.u32 4294901760, %v5938_v51  ;;  %v5955_v60 = vsub.f32 %v1167_v23, %v5940_v61  ;;  %4541 = vmatpush3.msra.mxu0 %v5940_v61  ;;  %v1384_v34 = vsub.f32 %v5935_v46, %v1383_v41  ;;  %v1378_v29 = vand.u32 4294901760, %v1377_v55 }
 0x1c5   :  { %4542 = vmatprep.subr.mxu0 %v5205_v5  ;;  %v1399_v10 = vand.u32 4294901760, %v1398_v57  ;;  %v1316_v33 = vsub.f32 %v6007_v54, %v1315_v21  ;;  %v6050_v37 = vand.u32 4294901760, %v1218_v1  ;;  %v1412_v23 = vsub.f32 %v6010_v2, %v1411_v43 }
 0x1c6   :  { %v1363_v14 = vsub.f32 %v5938_v51, %v1362_v45  ;;  %v1369_v52 = vand.u32 4294901760, %v5955_v60  ;;  %4543 = vmatpush3.msra.mxu0 %v5910_v56  ;;  %v1385_v8 = vand.u32 4294901760, %v1384_v34  ;;  %v1406_v0 = vand.u32 4294901760, %v1405_v9  ;;  %v1944_v34 = vld [vmem:[%s7380_s1 + $0x50] sm:$0xff] }
 0x1c7   :  { %4544 = vmatprep.subr.mxu0 %v5205_v5  ;;  %v1325_v35 = vand.u32 4294901760, %v6042_v15  ;;  %v1317_v19 = vand.u32 4294901760, %v1316_v33  ;;  %v6063_v4 = vsub.f32 %v1218_v1, %v6050_v37 }
 0x1c8   :  { %v1370_v6 = vsub.f32 %v5955_v60, %v1369_v52  ;;  %4545 = vmatpush3.msra.mxu0 %v5918_v22  ;;  %v1364_v26 = vand.u32 4294901760, %v1363_v14  ;;  %v1413_v14 = vand.u32 4294901760, %v1412_v23 }
 0x1c9   :  { %4546 = vmatprep.subr.mxu0 %v5205_v5  ;;  %v1326_v30 = vsub.f32 %v6042_v15, %v1325_v35  ;;  %v1335_v55 = vand.u32 4294901760, %v6063_v4 }
 0x1ca   :  { %4547 = vmatpush3.msra.mxu0 %v5921_v13  ;;  %4570 = vmatpush3.msra.mxu1 %v1364_v26  ;;  %v1371_v39 = vand.u32 4294901760, %v1370_v6 }
 0x1cb   :  { %4548 = vmatprep.subr.mxu0 %v5205_v5  ;;  %4571 = vmatprep.subr.mxu1 %v5205_v5  ;;  %v1327_v6 = vand.u32 4294901760, %v1326_v30  ;;  %v1336_v26 = vsub.f32 %v6063_v4, %v1335_v55 }
 0x1cc   :  { %4549 = vmatpush3.msra.mxu0 %v5945_v42  ;;  %4572 = vmatpush3.msra.mxu1 %v1371_v39 }
 0x1cd   :  { %4550 = vmatprep.subr.mxu0 %v5205_v5  ;;  %4573 = vmatprep.subr.mxu1 %v5205_v5  ;;  %v1337_v28 = vand.u32 4294901760, %v1336_v26 }
 0x1ce   :  { %4551 = vmatpush3.msra.mxu0 %v5958_v12  ;;  %4574 = vmatpush3.msra.mxu1 %v1378_v29 }
 0x1cf   :  { %4552 = vmatprep.subr.mxu0 %v5205_v5  ;;  %4575 = vmatprep.subr.mxu1 %v5205_v5 }
 0x1d0   :  { %4553 = vmatpush3.msra.mxu0 %v5971_v11  ;;  %4576 = vmatpush3.msra.mxu1 %v1385_v8 }
 0x1d1   :  { %4555 = vmatmul.mubr.f32.vlgmr.msra.gmra.mxu0 %v1297_v17  ;;  %4577 = vmatprep.subr.mxu1 %v5205_v5 }
 0x1d2   :  { %4600 = vmatprep.subr.mxu0 %v5205_v5  ;;  %4578 = vmatpush3.msra.mxu1 %v1392_v59 }
 0x1d3   :  { %4601 = vmatpush3.msra.mxu0 %v5938_v51  ;;  %4579 = vmatprep.subr.mxu1 %v5205_v5  ;;  %v1949_v51 = vld [vmem:[%s7380_s1 + $0x78] sm:$0xff] }
 0x1d4   :  { %4602 = vmatprep.subr.mxu0 %v5205_v5  ;;  %4557 = vmatprep.mubr.msk.f32.mxu0 %vm5206_vm1, %v5205_v5 }
 0x1d5   :  { %4580 = vmatpush3.msra.mxu1 %v1399_v10  ;;  %4603 = vmatpush3.msra.mxu0 %v5955_v60  ;;  %v1950_v60 = vld [vmem:[%s7386_s7] sm:$0xff]  ;;  %v1941_v10 = vld [vmem:[%s7380_s1 + $0x38] sm:$0xff] }
 0x1d6   :  { %4558 = vmatmul.mubr.f32.gmra.mxu0 %v1307_v7  ;;  %4581 = vmatprep.subr.mxu1 %v5205_v5 }
 0x1d7   :  { %4604 = vmatprep.subr.mxu0 %v5205_v5  ;;  %4582 = vmatpush3.msra.mxu1 %v1406_v0 }
 0x1d8   :  { %4605 = vmatpush3.msra.mxu0 %v5924_v18  ;;  %4583 = vmatprep.subr.mxu1 %v5205_v5  ;;  %v2017_v18 = vsel %vm1964_vm3, %v1949_v51, 0 }
 0x1d9   :  { %4606 = vmatprep.subr.mxu0 %v5205_v5  ;;  %4560 = vmatprep.mubr.msk.f32.mxu0 %vm5206_vm1, %v5205_v5 }
 0x1da   :  { %4584 = vmatpush3.msra.mxu1 %v1413_v14  ;;  %4607 = vmatpush3.msra.mxu0 %v5935_v46  ;;  %v6161_v46 = vand.u32 4294901760, %v2017_v18  ;;  %v1940_v14 = vld [vmem:[%s7380_s1 + $0x30] sm:$0xff] }
 0x1db   :  { %4561 = vmatmul.mubr.f32.gmra.mxu0 %v1317_v19  ;;  %4586 = vmatmul.mubr.f32.vlgmr.msra.gmra.mxu1 %v5916_v38  ;;  %v1990_v51 = vsel %vm1964_vm3, %v1940_v14, 0 }
 0x1dc   :  { %4608 = vmatprep.subr.mxu0 %v5205_v5  ;;  %4631 = vmatprep.subr.mxu1 %v5205_v5 }
 0x1dd   :  { %4609 = vmatpush3.msra.mxu0 %v5950_v47  ;;  %4632 = vmatpush3.msra.mxu1 %v5926_v27  ;;  %v6180_v47 = vsub.f32 %v2017_v18, %v6161_v46  ;;  %v1939_v18 = vld [vmem:[%s7380_s1 + $0x28] sm:$0xff] }
 0x1de   :  { %4610 = vmatprep.subr.mxu0 %v5205_v5  ;;  %4633 = vmatprep.subr.mxu1 %v5205_v5 }
 0x1df   :  { %4563 = vmatprep.mubr.msk.f32.mxu0 %vm5206_vm1, %v5205_v5  ;;  %4588 = vmatprep.mubr.msk.f32.mxu1 %vm5206_vm1, %v5205_v5 }
 0x1e0   :  { %4611 = vmatpush3.msra.mxu0 %v5974_v40  ;;  %4634 = vmatpush3.msra.mxu1 %v5940_v61  ;;  %v1966_v40 = vsel %vm1964_vm3, %v1950_v60, 0  ;;  %v1938_v60 = vld [vmem:[%s7380_s1 + $0x20] sm:$0xff] }
 0x1e1   :  { %4564 = vmatmul.mubr.f32.gmra.mxu0 %v1327_v6  ;;  %4589 = vmatmul.mubr.f32.gmra.mxu1 %v5943_v53 }
 0x1e2   :  { %4612 = vmatprep.subr.mxu0 %v5205_v5  ;;  %4635 = vmatprep.subr.mxu1 %v5205_v5 }
 0x1e3   :  { %4613 = vmatpush3.msra.mxu0 %v5991_v3  ;;  %4636 = vmatpush3.msra.mxu1 %v5910_v56 }
 0x1e4   :  { %4614 = vmatprep.subr.mxu0 %v5205_v5  ;;  %4637 = vmatprep.subr.mxu1 %v5205_v5 }
 0x1e5   :  { %4566 = vmatprep.mubr.msk.f32.mxu0 %vm5206_vm1, %v5205_v5  ;;  %4591 = vmatprep.mubr.msk.f32.mxu1 %vm5206_vm1, %v5205_v5 }
 0x1e6   :  { %4615 = vmatpush3.msra.mxu0 %v6010_v2  ;;  %4638 = vmatpush3.msra.mxu1 %v5918_v22 }
 0x1e7   :  { %4567 = vmatmul.mubr.f32.gmra.mxu0 %v1337_v28  ;;  %4592 = vmatmul.mubr.f32.gmra.mxu1 %v5977_v49 }
 0x1e8   :  { %4639 = vmatprep.subr.mxu1 %v5205_v5  ;;  %4594 = vmatprep.mubr.msk.f32.mxu1 %vm5206_vm1, %v5205_v5 }
 0x1e9   :  { %4640 = vmatpush3.msra.mxu1 %v5921_v13  ;;  %4616 = vmatprep.mubr.msk.f32.mxu0 %vm5206_vm1, %v5205_v5 }
 0x1ea   :  { %4641 = vmatprep.subr.mxu1 %v5205_v5  ;;  %4662 = vmatprep.subr.mxu0 %v5205_v5 }
 0x1eb   :  { %4642 = vmatpush3.msra.mxu1 %v5945_v42  ;;  %4617 = vmatmul.mubr.f32.vlgmr.msra.gmra.mxu0 %v5932_v50  ;;  %v1948_v50 = vld [vmem:[%s7380_s1 + $0x70] sm:$0xff] }
 0x1ec   :  { %4595 = vmatmul.mubr.f32.gmra.mxu1 %v6019_v20  ;;  %4643 = vmatprep.subr.mxu1 %v5205_v5 }
 0x1ed   :  { %4663 = vmatpush3.msra.mxu0 %v1362_v45  ;;  %4644 = vmatpush3.msra.mxu1 %v5958_v12 }
 0x1ee   :  { %4664 = vmatprep.subr.mxu0 %v5205_v5  ;;  %4645 = vmatprep.subr.mxu1 %v5205_v5 }
 0x1ef   :  { %4665 = vmatpush3.msra.mxu0 %v1369_v52  ;;  %4597 = vmatprep.mubr.msk.f32.mxu1 %vm5206_vm1, %v5205_v5 }
 0x1f0   :  { %4619 = vmatprep.mubr.msk.f32.mxu0 %vm5206_vm1, %v5205_v5  ;;  %4646 = vmatpush3.msra.mxu1 %v5971_v11 }
 0x1f1   :  { %4666 = vmatprep.subr.mxu0 %v5205_v5  ;;  %4598 = vmatmul.mubr.f32.gmra.mxu1 %v6050_v37 }
 0x1f2   :  { %4620 = vmatmul.mubr.f32.gmra.mxu0 %v5969_v63  ;;  %4647 = vmatprep.mubr.msk.f32.mxu1 %vm5206_vm1, %v5205_v5  ;;  %v1945_v63 = vld [vmem:[%s7380_s1 + $0x58] sm:$0xff] }
 0x1f3   :  { %4667 = vmatpush3.msra.mxu0 %v1376_v62  ;;  %4622 = vmatprep.mubr.msk.f32.mxu0 %vm5206_vm1, %v5205_v5 }
 0x1f4   :  { %4668 = vmatprep.subr.mxu0 %v5205_v5  ;;  %4693 = vmatprep.subr.mxu1 %v5205_v5 }
 0x1f5   :  { %4669 = vmatpush3.msra.mxu0 %v1383_v41  ;;  %4648 = vmatmul.mubr.f32.vlgmr.msra.gmra.mxu1 %v1295_v25 }
 0x1f6   :  { %4670 = vmatprep.subr.mxu0 %v5205_v5  ;;  %4623 = vmatmul.mubr.f32.gmra.mxu0 %v6007_v54 }
 0x1f7   :  { %4671 = vmatpush3.msra.mxu0 %v1390_v48  ;;  %4694 = vmatpush3.msra.mxu1 %v5926_v27  ;;  %v2014_v27 = vsel %vm1964_vm3, %v1948_v50, 0 }
 0x1f8   :  { %4672 = vmatprep.subr.mxu0 %v5205_v5  ;;  %4695 = vmatprep.subr.mxu1 %v5205_v5  ;;  %v6184_v62 = vand.u32 4294901760, %v2014_v27 }
 0x1f9   :  { %4673 = vmatpush3.msra.mxu0 %v1397_v32  ;;  %4696 = vmatpush3.msra.mxu1 %v5940_v61  ;;  %v1947_v61 = vld [vmem:[%s7380_s1 + $0x68] sm:$0xff]  ;;  %v2002_v32 = vsel %vm1964_vm3, %v1944_v34, 0 }
 0x1fa   :  { %4625 = vmatprep.mubr.msk.f32.mxu0 %vm5206_vm1, %v5205_v5  ;;  %4650 = vmatprep.mubr.msk.f32.mxu1 %vm5206_vm1, %v5205_v5  ;;  %v2011_v45 = vsel %vm1964_vm3, %v1947_v61, 0  ;;  %v6213_v52 = vsub.f32 %v2014_v27, %v6184_v62  ;;  %v6368_v61 = vand.u32 4294901760, %v1990_v51 }
 0x1fb   :  { %4674 = vmatprep.subr.mxu0 %v5205_v5  ;;  %4697 = vmatprep.subr.mxu1 %v5205_v5  ;;  %v6209_v25 = vand.u32 4294901760, %v2011_v45 }
 0x1fc   :  { %4626 = vmatmul.mubr.f32.gmra.mxu0 %v6042_v15  ;;  %4651 = vmatmul.mubr.f32.gmra.mxu1 %v1305_v24  ;;  %v6243_v24 = vand.u32 4294901760, %v1966_v40  ;;  %v6393_v34 = vsub.f32 %v1990_v51, %v6368_v61  ;;  %v1951_v51 = vld [vmem:[%s7386_s7 + $0x8] sm:$0xff] }
 0x1fd   :  { %4675 = vmatpush3.msra.mxu0 %v1404_v58  ;;  %4698 = vmatpush3.msra.mxu1 %v5910_v56  ;;  %v1946_v56 = vld [vmem:[%s7380_s1 + $0x60] sm:$0xff]  ;;  %v6241_v39 = vsub.f32 %v2011_v45, %v6209_v25  ;;  %v6276_v58 = vand.u32 4294901760, %v2002_v32 }
 0x1fe   :  { %4676 = vmatprep.subr.mxu0 %v5205_v5  ;;  %4699 = vmatprep.subr.mxu1 %v5205_v5  ;;  %v2008_v41 = vsel %vm1964_vm3, %v1946_v56, 0  ;;  %v6271_v29 = vsub.f32 %v1966_v40, %v6243_v24  ;;  %v1987_v56 = vsel %vm1964_vm3, %v1939_v18, 0  ;;  %v1934_v18 = vld [vmem:[%s7380_s1] sm:$0xff] }
 0x1ff   :  { %4677 = vmatpush3.msra.mxu0 %v1411_v43  ;;  %4700 = vmatpush3.msra.mxu1 %v5918_v22  ;;  %v6203_v22 = vand.u32 4294901760, %v6180_v47  ;;  %v6228_v3 = vand.u32 4294901760, %v2008_v41  ;;  %v6300_v1 = vsub.f32 %v2002_v32, %v6276_v58 }
 0x200   :  { %4628 = vmatprep.mubr.msk.f32.mxu0 %vm5206_vm1, %v5205_v5  ;;  %4653 = vmatprep.mubr.msk.f32.mxu1 %vm5206_vm1, %v5205_v5  ;;  %v2102_v43 = vand.u32 4294901760, %v6271_v29 }
 0x201   :  { %4701 = vmatprep.subr.mxu1 %v5205_v5  ;;  %4629 = vmatmul.mubr.f32.gmra.mxu0 %v6063_v4  ;;  %v2124_v48 = vsub.f32 %v6180_v47, %v6203_v22  ;;  %v6257_v2 = vsub.f32 %v2008_v41, %v6228_v3  ;;  %v6323_v23 = vand.u32 4294901760, %v6300_v1  ;;  %v1993_v4 = vsel %vm1964_vm3, %v1941_v10, 0 }
 0x202   :  { %4654 = vmatmul.mubr.f32.gmra.mxu1 %v1315_v21  ;;  %4678 = vmatprep.mubr.msk.f32.mxu0 %vm5206_vm1, %v5205_v5  ;;  %v1942_v21 = vld [vmem:[%s7380_s1 + $0x40] sm:$0xff]  ;;  %v2103_v33 = vsub.f32 %v6271_v29, %v2102_v43  ;;  %v6352_v26 = vand.u32 4294901760, %v1993_v4 }
 0x203   :  { %4702 = vmatpush3.msra.mxu1 %v5921_v13  ;;  %4656 = vmatprep.mubr.msk.f32.mxu1 %vm5206_vm1, %v5205_v5  ;;  %v2005_v13 = vsel %vm1964_vm3, %v1945_v63, 0  ;;  %v2125_v54 = vand.u32 4294901760, %v2124_v48  ;;  %v6287_v8 = vand.u32 4294901760, %v6257_v2  ;;  %v1996_v15 = vsel %vm1964_vm3, %v1942_v21, 0 }
 0x204   :  { %4703 = vmatprep.subr.mxu1 %v5205_v5  ;;  %4724 = vmatprep.subr.mxu0 %v6161_v46  ;;  %v6250_v31 = vand.u32 4294901760, %v2005_v13  ;;  %v2104_v30 = vand.u32 4294901760, %v2103_v33  ;;  %v6382_v63 = vand.u32 4294901760, %v1987_v56 }
 0x205   :  { %4704 = vmatpush3.msra.mxu1 %v5945_v42  ;;  %4679 = vmatmul.mubr.f32.vlgmr.msra.gmra.mxu0 %v5916_v38  ;;  %v6238_v42 = vand.u32 4294901760, %v6213_v52  ;;  %v2145_v9 = vsub.f32 %v6257_v2, %v6287_v8 }
 0x206   :  { %4705 = vmatprep.subr.mxu1 %v5205_v5  ;;  %4657 = vmatmul.mubr.f32.gmra.mxu1 %v1325_v35  ;;  %v6283_v36 = vsub.f32 %v2005_v13, %v6250_v31  ;;  %v6333_v35 = vand.u32 4294901760, %v1996_v15  ;;  %v1984_v13 = vsel %vm1964_vm3, %v1938_v60, 0 }
 0x207   :  { %4706 = vmatpush3.msra.mxu1 %v5958_v12  ;;  %4725 = vmatpush3.xpose.msra.mxu0 %v6161_v46  ;;  %v1943_v12 = vld [vmem:[%s7380_s1 + $0x48] sm:$0xff]  ;;  %v2131_v16 = vsub.f32 %v6213_v52, %v6238_v42  ;;  %v2146_v19 = vand.u32 4294901760, %v2145_v9  ;;  %v6399_v32 = vand.u32 4294901760, %v1984_v13 }
 0x208   :  { %4707 = vmatprep.subr.mxu1 %v5205_v5  ;;  %4659 = vmatprep.mubr.msk.f32.mxu1 %vm5206_vm1, %v5205_v5  ;;  %v1999_v17 = vsel %vm1964_vm3, %v1943_v12, 0  ;;  %v6355_v28 = vsub.f32 %v1996_v15, %v6333_v35 }
 0x209   :  { %4708 = vmatpush3.msra.mxu1 %v5971_v11  ;;  %4681 = vmatprep.mubr.msk.f32.mxu0 %vm5206_vm1, %v5205_v5  ;;  %v6268_v11 = vand.u32 4294901760, %v6241_v39  ;;  %v2132_v44 = vand.u32 4294901760, %v2131_v16  ;;  %v6297_v59 = vand.u32 4294901760, %v1999_v17  ;;  %v6419_v9 = vsub.f32 %v1984_v13, %v6399_v32 }
 0x20a   :  { %4726 = vmatprep.subr.mxu0 %v6184_v62  ;;  %4660 = vmatmul.mubr.f32.gmra.mxu1 %v1335_v55  ;;  %v2159_v55 = vsub.f32 %v6300_v1, %v6323_v23  ;;  %v6371_v45 = vand.u32 4294901760, %v6355_v28  ;;  %v1972_v13 = vsel %vm1964_vm3, %v1934_v18, 0 }
 0x20b   :  { %4682 = vmatmul.mubr.f32.gmra.mxu0 %v5943_v53  ;;  %4709 = vmatprep.mubr.msk.f32.mxu1 %vm5206_vm1, %v5205_v5  ;;  %v2138_v57 = vsub.f32 %v6241_v39, %v6268_v11  ;;  %v6326_v0 = vsub.f32 %v1999_v17, %v6297_v59  ;;  %v6408_v17 = vand.u32 4294901760, %v6393_v34 }
 0x20c   :  { %4727 = vmatpush3.xpose.msra.mxu0 %v6184_v62  ;;  %4684 = vmatprep.mubr.msk.f32.mxu0 %vm5206_vm1, %v5205_v5  ;;  %v2160_v50 = vand.u32 4294901760, %v2159_v55  ;;  %v2173_v40 = vsub.f32 %v6355_v28, %v6371_v45 }
 0x20d   :  { %4728 = vmatprep.subr.mxu0 %v6209_v25  ;;  %4759 = vmatprep.subr.mxu1 %v2125_v54  ;;  %v2139_v7 = vand.u32 4294901760, %v2138_v57  ;;  %v6347_v6 = vand.u32 4294901760, %v6326_v0  ;;  %v1936_v57 = vld [vmem:[%s7380_s1 + $0x10] sm:$0xff] }
 0x20e   :  { %4710 = vmatmul.mubr.f32.vlgmr.msra.gmra.mxu1 %v5916_v38  ;;  %v6306_v38 = vand.u32 4294901760, %v6283_v36  ;;  %v2174_v12 = vand.u32 4294901760, %v2173_v40  ;;  %v1978_v33 = vsel %vm1964_vm3, %v1936_v57, 0  ;;  %v1969_v40 = vsel %vm1964_vm3, %v1951_v51, 0 }
 0x20f   :  { %4685 = vmatmul.mubr.f32.gmra.mxu0 %v5977_v49  ;;  %4760 = vmatpush3.xpose.msra.mxu1 %v2125_v54  ;;  %v2166_v27 = vsub.f32 %v6326_v0, %v6347_v6  ;;  %v6402_v54 = vsub.f32 %v1987_v56, %v6382_v63 }
 0x210   :  { %4729 = vmatpush3.xpose.msra.mxu0 %v6209_v25  ;;  %4687 = vmatprep.mubr.msk.f32.mxu0 %vm5206_vm1, %v5205_v5 }
 0x211   :  { %4712 = vmatprep.mubr.msk.f32.mxu1 %vm5206_vm1, %v5205_v5  ;;  %4730 = vmatprep.subr.mxu0 %v6228_v3  ;;  %v2167_v41 = vand.u32 4294901760, %v2166_v27  ;;  %v6416_v21 = vand.u32 4294901760, %v6402_v54 }
 0x212   :  { %4761 = vmatprep.subr.mxu1 %v2132_v44  ;;  %4713 = vmatmul.mubr.f32.gmra.mxu1 %v5943_v53  ;;  %v2152_v53 = vsub.f32 %v6283_v36, %v6306_v38 }
 0x213   :  { %4688 = vmatmul.mubr.f32.gmra.mxu0 %v6019_v20  ;;  %4762 = vmatpush3.xpose.msra.mxu1 %v2132_v44 }
 0x214   :  { %4731 = vmatpush3.xpose.msra.mxu0 %v6228_v3  ;;  %4690 = vmatprep.mubr.msk.f32.mxu0 %vm5206_vm1, %v5205_v5 }
 0x215   :  { %4715 = vmatprep.mubr.msk.f32.mxu1 %vm5206_vm1, %v5205_v5  ;;  %4732 = vmatprep.subr.mxu0 %v6250_v31 }
 0x216   :  { %4763 = vmatprep.subr.mxu1 %v2139_v7  ;;  %4716 = vmatmul.mubr.f32.gmra.mxu1 %v5977_v49  ;;  %v2153_v49 = vand.u32 4294901760, %v2152_v53  ;;  %v1935_v53 = vld [vmem:[%s7380_s1 + $0x8] sm:$0xff] }
 0x217   :  { %4691 = vmatmul.mubr.f32.gmra.mxu0 %v6050_v37  ;;  %4764 = vmatpush3.xpose.msra.mxu1 %v2139_v7  ;;  %v2187_v7 = vsub.f32 %v6393_v34, %v6408_v17 }
 0x218   :  { %4733 = vmatpush3.xpose.msra.mxu0 %v6250_v31  ;;  %4718 = vmatprep.mubr.msk.f32.mxu1 %vm5206_vm1, %v5205_v5 }
 0x219   :  { %4734 = vmatprep.subr.mxu0 %v6276_v58  ;;  %4765 = vmatprep.subr.mxu1 %v2146_v19  ;;  %v2188_v14 = vand.u32 4294901760, %v2187_v7 }
 0x21a   :  { %4719 = vmatmul.mubr.f32.gmra.mxu1 %v6019_v20  ;;  %4756 = vmatprep.mubr.f32.mxu0 %v2104_v30  ;;  %v6375_v20 = vsub.f32 %v1993_v4, %v6352_v26  ;;  %v6434_v4 = vand.u32 4294901760, %v6419_v9  ;;  %v6437_v30 = vand.u32 4294901760, %v1978_v33 }
 0x21b   :  { %4766 = vmatpush3.xpose.msra.mxu1 %v2146_v19  ;;  %4721 = vmatprep.mubr.msk.f32.mxu1 %vm5206_vm1, %v5205_v5  ;;  %v2194_v19 = vsub.f32 %v6402_v54, %v6416_v21 }
 0x21c   :  { %4735 = vmatpush3.xpose.msra.mxu0 %v6276_v58  ;;  %4767 = vmatprep.subr.mxu1 %v2153_v49  ;;  %v6389_v48 = vand.u32 4294901760, %v6375_v20  ;;  %v2201_v27 = vsub.f32 %v6419_v9, %v6434_v4 }
 0x21d   :  { %4736 = vmatprep.subr.mxu0 %v6297_v59 }
 0x21e   :  { %4722 = vmatmul.mubr.f32.gmra.mxu1 %v6050_v37  ;;  %v1937_v37 = vld [vmem:[%s7380_s1 + $0x18] sm:$0xff]  ;;  %v2180_v16 = vsub.f32 %v6375_v20, %v6389_v48  ;;  %s7359_s1 = sld [smem:[#allocation7 + $0x102]] }
 0x21f   :  { %4768 = vmatpush3.xpose.msra.mxu1 %v2153_v49  ;;  %4791 = vmatprep.mubr.f32.mxu1 %v6243_v24  ;;  %v1981_v44 = vsel %vm1964_vm3, %v1937_v37, 0  ;;  %v1975_v49 = vsel %vm1964_vm3, %v1935_v53, 0  ;;  %v2202_v37 = vand.u32 4294901760, %v2201_v27 }
 0x220   :  { %4737 = vmatpush3.xpose.msra.mxu0 %v6297_v59  ;;  %4769 = vmatprep.subr.mxu1 %v2160_v50  ;;  %v2181_v15 = vand.u32 4294901760, %v2180_v16  ;;  %v6424_v10 = vand.u32 4294901760, %v1981_v44  ;;  %v6453_v56 = vand.u32 4294901760, %v1975_v49 }
 0x221   :  { %4738 = vmatprep.subr.mxu0 %v6333_v35 }
 0x222   :  { %v6440_v55 = vsub.f32 %v1981_v44, %v6424_v10  ;;  %v6469_v44 = vand.u32 4294901760, %v1972_v13 }
 0x223   :  { %4770 = vmatpush3.xpose.msra.mxu1 %v2160_v50  ;;  %v2195_v50 = vand.u32 4294901760, %v2194_v19 }
 0x224   :  { %4739 = vmatpush3.xpose.msra.mxu0 %v6333_v35  ;;  %4771 = vmatprep.subr.mxu1 %v2167_v41  ;;  %v6456_v60 = vand.u32 4294901760, %v6440_v55 }
 0x225   :  { %4740 = vmatprep.subr.mxu0 %v6352_v26 }
 0x226   :  { %v2208_v16 = vsub.f32 %v6440_v55, %v6456_v60 }
 0x227   :  { %4772 = vmatpush3.xpose.msra.mxu1 %v2167_v41  ;;  %v6459_v41 = vsub.f32 %v1978_v33, %v6437_v30 }
 0x228   :  { %4741 = vmatpush3.xpose.msra.mxu0 %v6352_v26  ;;  %4773 = vmatprep.subr.mxu1 %v2174_v12  ;;  %v2209_v33 = vand.u32 4294901760, %v2208_v16 }
 0x229   :  { %4742 = vmatprep.subr.mxu0 %v6368_v61  ;;  %v6472_v57 = vand.u32 4294901760, %v6459_v41 }
 0x22b   :  { %4774 = vmatpush3.xpose.msra.mxu1 %v2174_v12  ;;  %v6464_v12 = vand.u32 4294901760, %v1969_v40  ;;  %v2215_v53 = vsub.f32 %v6459_v41, %v6472_v57 }
 0x22c   :  { %4743 = vmatpush3.xpose.msra.mxu0 %v6368_v61  ;;  %4775 = vmatprep.subr.mxu1 %v2181_v15 }
 0x22d   :  { %4744 = vmatprep.subr.mxu0 %v6382_v63  ;;  %v6479_v7 = vsub.f32 %v1969_v40, %v6464_v12  ;;  %v2216_v51 = vand.u32 4294901760, %v2215_v53 }
 0x22f   :  { %4776 = vmatpush3.xpose.msra.mxu1 %v2181_v15  ;;  %v6475_v15 = vsub.f32 %v1975_v49, %v6453_v56  ;;  %v2112_v49 = vand.u32 4294901760, %v6479_v7 }
 0x230   :  { %4745 = vmatpush3.xpose.msra.mxu0 %v6382_v63  ;;  %4777 = vmatprep.subr.mxu1 %v2188_v14 }
 0x231   :  { %4746 = vmatprep.subr.mxu0 %v6399_v32  ;;  %v6485_v19 = vand.u32 4294901760, %v6475_v15  ;;  %v2113_v27 = vsub.f32 %v6479_v7, %v2112_v49 }
 0x233   :  { %4778 = vmatpush3.xpose.msra.mxu1 %v2188_v14  ;;  %v6488_v14 = vsub.f32 %v1972_v13, %v6469_v44  ;;  %v2222_v18 = vsub.f32 %v6475_v15, %v6485_v19 }
 0x234   :  { %4747 = vmatpush3.xpose.msra.mxu0 %v6399_v32  ;;  %4779 = vmatprep.subr.mxu1 %v2195_v50 }
 0x235   :  { %4748 = vmatprep.subr.mxu0 %v6424_v10  ;;  %v2223_v40 = vand.u32 4294901760, %v2222_v18 }
 0x237   :  { %4780 = vmatpush3.xpose.msra.mxu1 %v2195_v50  ;;  %v6496_v50 = vand.u32 4294901760, %v6488_v14 }
 0x238   :  { %4749 = vmatpush3.xpose.msra.mxu0 %v6424_v10  ;;  %4781 = vmatprep.subr.mxu1 %v2202_v37 }
 0x239   :  { %4750 = vmatprep.subr.mxu0 %v6437_v30  ;;  %v2229_v13 = vsub.f32 %v6488_v14, %v6496_v50 }
 0x23b   :  { %4782 = vmatpush3.xpose.msra.mxu1 %v2202_v37  ;;  %v2114_v37 = vand.u32 4294901760, %v2113_v27  ;;  %v2230_v16 = vand.u32 4294901760, %v2229_v13 }
 0x23c   :  { %4751 = vmatpush3.xpose.msra.mxu0 %v6437_v30  ;;  %4783 = vmatprep.subr.mxu1 %v2209_v33 }
 0x23d   :  { %4752 = vmatprep.subr.mxu0 %v6453_v56 }
 0x23f   :  { %4784 = vmatpush3.xpose.msra.mxu1 %v2209_v33 }
 0x240   :  { %4753 = vmatpush3.xpose.msra.mxu0 %v6453_v56  ;;  %4785 = vmatprep.subr.mxu1 %v2216_v51 }
 0x241   :  { %4754 = vmatprep.subr.mxu0 %v6469_v44 }
 0x243   :  { %4786 = vmatpush3.xpose.msra.mxu1 %v2216_v51 }
 0x244   :  { %4755 = vmatpush3.xpose.msra.mxu0 %v6469_v44  ;;  %4787 = vmatprep.subr.mxu1 %v2223_v40 }
 0x245   :  { %4794 = vmatprep.subr.mxu0 %v6180_v47 }
 0x247   :  { %4757 = vmatmul.mubr.f32.vlgmr.msra.gmra.mxu0 %v2114_v37  ;;  %4788 = vmatpush3.xpose.msra.mxu1 %v2223_v40  ;;  %v2716_v40 = vld [vmem:[%s7381_s2 + $0x58] sm:$0xff] }
 0x248   :  { %4795 = vmatpush3.xpose.msra.mxu0 %v6180_v47  ;;  %4789 = vmatprep.subr.mxu1 %v2230_v16 }
 0x249   :  { %4796 = vmatprep.subr.mxu0 %v6213_v52  ;;  %4826 = vmatprep.mubr.f32.mxu0 %v6271_v29 }
 0x24b   :  { %4790 = vmatpush3.xpose.msra.mxu1 %v2230_v16 }
 0x24c   :  { %4797 = vmatpush3.xpose.msra.mxu0 %v6213_v52  ;;  %4829 = vmatprep.subr.mxu1 %v6161_v46 }
 0x24d   :  { %4798 = vmatprep.subr.mxu0 %v6241_v39 }
 0x24e   :  { %4792 = vmatmul.mubr.f32.vlgmr.msra.gmra.mxu1 %v6464_v12 }
 0x24f   :  { %4830 = vmatpush3.xpose.msra.mxu1 %v6161_v46  ;;  %4861 = vmatprep.mubr.f32.mxu1 %v2102_v43 }
 0x250   :  { %4799 = vmatpush3.xpose.msra.mxu0 %v6241_v39  ;;  %4831 = vmatprep.subr.mxu1 %v6184_v62 }
 0x251   :  { %4800 = vmatprep.subr.mxu0 %v6257_v2 }
 0x253   :  { %4832 = vmatpush3.xpose.msra.mxu1 %v6184_v62 }
 0x254   :  { %4801 = vmatpush3.xpose.msra.mxu0 %v6257_v2  ;;  %4833 = vmatprep.subr.mxu1 %v6209_v25 }
 0x255   :  { %4802 = vmatprep.subr.mxu0 %v6283_v36 }
 0x257   :  { %4834 = vmatpush3.xpose.msra.mxu1 %v6209_v25 }
 0x258   :  { %4803 = vmatpush3.xpose.msra.mxu0 %v6283_v36  ;;  %4835 = vmatprep.subr.mxu1 %v6228_v3 }
 0x259   :  { %4804 = vmatprep.subr.mxu0 %v6300_v1 }
 0x25b   :  { %4836 = vmatpush3.xpose.msra.mxu1 %v6228_v3 }
 0x25c   :  { %4805 = vmatpush3.xpose.msra.mxu0 %v6300_v1  ;;  %4837 = vmatprep.subr.mxu1 %v6250_v31 }
 0x25d   :  { %4806 = vmatprep.subr.mxu0 %v6326_v0 }
 0x25f   :  { %4838 = vmatpush3.xpose.msra.mxu1 %v6250_v31 }
 0x260   :  { %4807 = vmatpush3.xpose.msra.mxu0 %v6326_v0  ;;  %4839 = vmatprep.subr.mxu1 %v6276_v58 }
 0x261   :  { %4808 = vmatprep.subr.mxu0 %v6355_v28 }
 0x263   :  { %4840 = vmatpush3.xpose.msra.mxu1 %v6276_v58 }
 0x264   :  { %4809 = vmatpush3.xpose.msra.mxu0 %v6355_v28  ;;  %4841 = vmatprep.subr.mxu1 %v6297_v59 }
 0x265   :  { %4810 = vmatprep.subr.mxu0 %v6375_v20 }
 0x267   :  { %4842 = vmatpush3.xpose.msra.mxu1 %v6297_v59 }
 0x268   :  { %4811 = vmatpush3.xpose.msra.mxu0 %v6375_v20  ;;  %4843 = vmatprep.subr.mxu1 %v6333_v35 }
 0x269   :  { %4812 = vmatprep.subr.mxu0 %v6393_v34 }
 0x26b   :  { %4844 = vmatpush3.xpose.msra.mxu1 %v6333_v35 }
 0x26c   :  { %4813 = vmatpush3.xpose.msra.mxu0 %v6393_v34  ;;  %4845 = vmatprep.subr.mxu1 %v6352_v26  ;;  %v6665_v34 = vpop.permute.xlu0 %1956 }
 0x26d   :  { %4814 = vmatprep.subr.mxu0 %v6402_v54 }
 0x26f   :  { %4846 = vmatpush3.xpose.msra.mxu1 %v6352_v26 }
 0x270   :  { %4815 = vmatpush3.xpose.msra.mxu0 %v6402_v54  ;;  %4847 = vmatprep.subr.mxu1 %v6368_v61 }
 0x271   :  { %4816 = vmatprep.subr.mxu0 %v6419_v9 }
 0x273   :  { %4848 = vmatpush3.xpose.msra.mxu1 %v6368_v61 }
 0x274   :  { %4817 = vmatpush3.xpose.msra.mxu0 %v6419_v9  ;;  %4849 = vmatprep.subr.mxu1 %v6382_v63 }
 0x275   :  { %4818 = vmatprep.subr.mxu0 %v6440_v55 }
 0x277   :  { %4850 = vmatpush3.xpose.msra.mxu1 %v6382_v63 }
 0x278   :  { %4819 = vmatpush3.xpose.msra.mxu0 %v6440_v55  ;;  %4851 = vmatprep.subr.mxu1 %v6399_v32 }
 0x279   :  { %4820 = vmatprep.subr.mxu0 %v6459_v41 }
 0x27b   :  { %4852 = vmatpush3.xpose.msra.mxu1 %v6399_v32 }
 0x27c   :  { %4821 = vmatpush3.xpose.msra.mxu0 %v6459_v41  ;;  %4853 = vmatprep.subr.mxu1 %v6424_v10 }
 0x27d   :  { %4822 = vmatprep.subr.mxu0 %v6475_v15 }
 0x27f   :  { %4854 = vmatpush3.xpose.msra.mxu1 %v6424_v10 }
 0x280   :  { %4823 = vmatpush3.xpose.msra.mxu0 %v6475_v15  ;;  %4855 = vmatprep.subr.mxu1 %v6437_v30  ;;  %v6690_v15 = vpop.permute.xlu0 %1201 }
 0x281   :  { %4824 = vmatprep.subr.mxu0 %v6488_v14 }
 0x283   :  { %4856 = vmatpush3.xpose.msra.mxu1 %v6437_v30 }
 0x284   :  { %4825 = vmatpush3.xpose.msra.mxu0 %v6488_v14  ;;  %4857 = vmatprep.subr.mxu1 %v6453_v56  ;;  %v1187_v16 = vpop.permute.xlu0 %1186 }
 0x285   :  { %4864 = vmatprep.subr.mxu0 %v6203_v22 }
 0x287   :  { %4827 = vmatmul.mubr.f32.vlgmr.msra.gmra.mxu0 %v6479_v7  ;;  %4858 = vmatpush3.xpose.msra.mxu1 %v6453_v56  ;;  %v2717_v7 = vld [vmem:[%s7381_s2 + $0x60] sm:$0xff] }
 0x288   :  { %4865 = vmatpush3.xpose.msra.mxu0 %v6203_v22  ;;  %4859 = vmatprep.subr.mxu1 %v6469_v44  ;;  %v2763_v51 = vsel %vm2722_vm4, %v2717_v7, 0 }
 0x289   :  { %4866 = vmatprep.subr.mxu0 %v6238_v42  ;;  %4896 = vmatprep.mubr.f32.mxu0 %v6243_v24 }
 0x28b   :  { %4860 = vmatpush3.xpose.msra.mxu1 %v6469_v44 }
 0x28c   :  { %4867 = vmatpush3.xpose.msra.mxu0 %v6238_v42  ;;  %4899 = vmatprep.subr.mxu1 %v6161_v46 }
 0x28d   :  { %4868 = vmatprep.subr.mxu0 %v6268_v11 }
 0x28e   :  { %4862 = vmatmul.mubr.f32.vlgmr.msra.gmra.mxu1 %v2112_v49 }
 0x28f   :  { %4900 = vmatpush3.xpose.msra.mxu1 %v6161_v46  ;;  %4931 = vmatprep.mubr.f32.mxu1 %v6243_v24 }
 0x290   :  { %4869 = vmatpush3.xpose.msra.mxu0 %v6268_v11  ;;  %4901 = vmatprep.subr.mxu1 %v6184_v62 }
 0x291   :  { %4870 = vmatprep.subr.mxu0 %v6287_v8  ;;  %v6590_v47 = vpop.f32.mrf.mxu0 }
 0x293   :  { %4902 = vmatpush3.xpose.msra.mxu1 %v6184_v62  ;;  %v4556_v22 = vpop.f32.mrf.mxu0 }
 0x294   :  { %4871 = vmatpush3.xpose.msra.mxu0 %v6287_v8  ;;  %4903 = vmatprep.subr.mxu1 %v6209_v25 }
 0x295   :  { %4872 = vmatprep.subr.mxu0 %v6306_v38 }
 0x296   :  { %v6596_v46 = vpop.f32.mrf.mxu0 }
 0x297   :  { %4904 = vmatpush3.xpose.msra.mxu1 %v6209_v25 }
 0x298   :  { %4873 = vmatpush3.xpose.msra.mxu0 %v6306_v38  ;;  %4905 = vmatprep.subr.mxu1 %v6228_v3  ;;  %v4559_v52 = vpop.f32.mrf.mxu0 }
 0x299   :  { %4874 = vmatprep.subr.mxu0 %v6323_v23  ;;  %v6722_v52 = vand.u32 4294901760, %v2763_v51 }
 0x29b   :  { %4906 = vmatpush3.xpose.msra.mxu1 %v6228_v3  ;;  %v6603_v62 = vpop.f32.mrf.mxu0  ;;  %v6605_v42 = vpop.f32.mrf.mxu1 }
 0x29c   :  { %4875 = vmatpush3.xpose.msra.mxu0 %v6323_v23  ;;  %4907 = vmatprep.subr.mxu1 %v6250_v31 }
 0x29d   :  { %4876 = vmatprep.subr.mxu0 %v6347_v6  ;;  %v4562_v25 = vpop.f32.mrf.mxu0  ;;  %v4587_v39 = vpop.f32.mrf.mxu1 }
 0x29f   :  { %4908 = vmatpush3.xpose.msra.mxu1 %v6250_v31 }
 0x2a0   :  { %4877 = vmatpush3.xpose.msra.mxu0 %v6347_v6  ;;  %4909 = vmatprep.subr.mxu1 %v6276_v58 }
 0x2a1   :  { %4878 = vmatprep.subr.mxu0 %v6371_v45  ;;  %v6614_v3 = vpop.f32.mrf.mxu0  ;;  %v6616_v24 = vpop.f32.mrf.mxu1 }
 0x2a3   :  { %4910 = vmatpush3.xpose.msra.mxu1 %v6276_v58  ;;  %v4565_v2 = vpop.f32.mrf.mxu0  ;;  %v4590_v11 = vpop.f32.mrf.mxu1 }
 0x2a4   :  { %4879 = vmatpush3.xpose.msra.mxu0 %v6371_v45  ;;  %4911 = vmatprep.subr.mxu1 %v6297_v59  ;;  %v2760_v2 = vsel %vm2722_vm4, %v2716_v40, 0 }
 0x2a5   :  { %4880 = vmatprep.subr.mxu0 %v6389_v48 }
 0x2a7   :  { %4912 = vmatpush3.xpose.msra.mxu1 %v6297_v59  ;;  %v6623_v31 = vpop.f32.mrf.mxu0  ;;  %v6625_v29 = vpop.f32.mrf.mxu1 }
 0x2a8   :  { %4881 = vmatpush3.xpose.msra.mxu0 %v6389_v48  ;;  %4913 = vmatprep.subr.mxu1 %v6333_v35  ;;  %v2719_v48 = vld [vmem:[%s7381_s2 + $0x70] sm:$0xff] }
 0x2a9   :  { %4882 = vmatprep.subr.mxu0 %v6408_v17  ;;  %v4568_v58 = vpop.f32.mrf.mxu0  ;;  %v4593_v36 = vpop.f32.mrf.mxu1 }
 0x2aa   :  { %v1310_v58 = vadd.f32 %v6596_v46, %v1187_v16 }
 0x2ab   :  { %4914 = vmatpush3.xpose.msra.mxu1 %v6333_v35  ;;  %v6631_v8 = vpop.f32.mrf.mxu0 }
 0x2ac   :  { %4883 = vmatpush3.xpose.msra.mxu0 %v6408_v17  ;;  %4915 = vmatprep.subr.mxu1 %v6352_v26  ;;  %v6635_v43 = vpop.f32.mrf.mxu1  ;;  %v2718_v17 = vld [vmem:[%s7381_s2 + $0x68] sm:$0xff]  ;;  %v1457_v46 = vadd.f32 %v6616_v24, %v1310_v58 }
 0x2ad   :  { %4884 = vmatprep.subr.mxu0 %v6416_v21  ;;  %v4618_v59 = vpop.f32.mrf.mxu0  ;;  %v2766_v41 = vsel %vm2722_vm4, %v2718_v17, 0 }
 0x2ae   :  { %v4596_v1 = vpop.f32.mrf.mxu1  ;;  %v6700_v53 = vand.u32 4294901760, %v2766_v41 }
 0x2af   :  { %4916 = vmatpush3.xpose.msra.mxu1 %v6352_v26  ;;  %v2720_v26 = vld [vmem:[%s7381_s2 + $0x78] sm:$0xff]  ;;  %v6746_v1 = vsub.f32 %v2763_v51, %v6722_v52 }
 0x2b0   :  { %4885 = vmatpush3.xpose.msra.mxu0 %v6416_v21  ;;  %4917 = vmatprep.subr.mxu1 %v6368_v61  ;;  %v2772_v20 = vsel %vm2722_vm4, %v2720_v26, 0  ;;  %v6718_v37 = vsub.f32 %v2766_v41, %v6700_v53 }
 0x2b1   :  { %4886 = vmatprep.subr.mxu0 %v6434_v4  ;;  %v6642_v38 = vpop.f32.mrf.mxu1  ;;  %v6668_v54 = vand.u32 4294901760, %v2772_v20 }
 0x2b2   :  { %v6644_v23 = vpop.f32.mrf.mxu0  ;;  %v2882_v36 = vand.u32 4294901760, %v6718_v37 }
 0x2b3   :  { %4918 = vmatpush3.xpose.msra.mxu1 %v6368_v61  ;;  %v4599_v0 = vpop.f32.mrf.mxu1 }
 0x2b4   :  { %4887 = vmatpush3.xpose.msra.mxu0 %v6434_v4  ;;  %4919 = vmatprep.subr.mxu1 %v6382_v63  ;;  %v4621_v35 = vpop.f32.mrf.mxu0  ;;  %v6680_v4 = vpop.permute.xlu1 %1961 }
 0x2b5   :  { %4888 = vmatprep.subr.mxu0 %v6456_v60  ;;  %v6650_v6 = vpop.f32.mrf.mxu1  ;;  %v6751_v35 = vand.u32 4294901760, %v2760_v2 }
 0x2b6   :  { %v6655_v28 = vpop.f32.mrf.mxu0 }
 0x2b7   :  { %4920 = vmatpush3.xpose.msra.mxu1 %v6382_v63  ;;  %v4649_v61 = vpop.f32.mrf.mxu1  ;;  %v2769_v63 = vsel %vm2722_vm4, %v2719_v48, 0  ;;  %v6770_v7 = vsub.f32 %v2760_v2, %v6751_v35 }
 0x2b8   :  { %4889 = vmatpush3.xpose.msra.mxu0 %v6456_v60  ;;  %4921 = vmatprep.subr.mxu1 %v6399_v32  ;;  %v4624_v45 = vpop.f32.mrf.mxu0  ;;  %v6683_v60 = vand.u32 4294901760, %v2769_v63  ;;  %v1182_v18 = vpop.permute.xlu1 %1181 }
 0x2b9   :  { %4890 = vmatprep.subr.mxu0 %v6472_v57  ;;  %v1300_v13 = vadd.f32 %v6590_v47, %v1182_v18 }
 0x2ba   :  { %v6705_v14 = vsub.f32 %v2769_v63, %v6683_v60  ;;  %v2714_v63 = vld [vmem:[%s7381_s2 + $0x48] sm:$0xff] }
 0x2bb   :  { %4922 = vmatpush3.xpose.msra.mxu1 %v6399_v32  ;;  %v1451_v25 = vadd.f32 %v6605_v42, %v1300_v13  ;;  %v2715_v42 = vld [vmem:[%s7381_s2 + $0x50] sm:$0xff]  ;;  %v2754_v40 = vsel %vm2722_vm4, %v2714_v63, 0  ;;  %v2713_v13 = vld [vmem:[%s7381_s2 + $0x40] sm:$0xff] }
 0x2bc   :  { %4891 = vmatpush3.xpose.msra.mxu0 %v6472_v57  ;;  %4923 = vmatprep.subr.mxu1 %v6424_v10  ;;  %v6676_v21 = vpop.f32.mrf.mxu0  ;;  %v6678_v9 = vpop.f32.mrf.mxu1  ;;  %v6688_v57 = vsub.f32 %v2772_v20, %v6668_v54  ;;  %v2757_v45 = vsel %vm2722_vm4, %v2715_v42, 0  ;;  %v2896_v42 = vand.u32 4294901760, %v6770_v7 }
 0x2bd   :  { %4892 = vmatprep.subr.mxu0 %v6485_v19  ;;  %v1192_v20 = vpop.permute.xlu0 %1191 }
 0x2be   :  { %v4627_v32 = vpop.f32.mrf.mxu0  ;;  %v4652_v55 = vpop.f32.mrf.mxu1  ;;  %v2868_v49 = vand.u32 4294901760, %v6688_v57  ;;  %v1320_v24 = vadd.f32 %v6603_v62, %v1192_v20  ;;  %v2889_v62 = vand.u32 4294901760, %v6746_v1 }
 0x2bf   :  { %4924 = vmatpush3.xpose.msra.mxu1 %v6424_v10 }
 0x2c0   :  { %4893 = vmatpush3.xpose.msra.mxu0 %v6485_v19  ;;  %4925 = vmatprep.subr.mxu1 %v6437_v30  ;;  %v2869_v39 = vsub.f32 %v6688_v57, %v2868_v49  ;;  %v2890_v2 = vsub.f32 %v6746_v1, %v2889_v62 }
 0x2c1   :  { %4894 = vmatprep.subr.mxu0 %v6496_v50  ;;  %v6698_v33 = vpop.f32.mrf.mxu0 }
 0x2c2   :  { %v6702_v10 = vpop.f32.mrf.mxu1  ;;  %v2870_v61 = vand.u32 4294901760, %v2869_v39 }
 0x2c3   :  { %4926 = vmatpush3.xpose.msra.mxu1 %v6437_v30  ;;  %v4630_v19 = vpop.f32.mrf.mxu0 }
 0x2c4   :  { %4895 = vmatpush3.xpose.msra.mxu0 %v6496_v50  ;;  %v4655_v27 = vpop.f32.mrf.mxu1  ;;  %4927 = vmatprep.subr.mxu1 %v6453_v56  ;;  %v2875_v50 = vand.u32 4294901760, %v6705_v14  ;;  %v6772_v19 = vand.u32 4294901760, %v2757_v45 }
 0x2c5   :  { %4934 = vmatprep.subr.mxu0 %v5205_v5  ;;  %v1798_v30 = vpop.f32.mrf.mxu0 }
 0x2c6   :  { %v6720_v22 = vpop.f32.mrf.mxu1  ;;  %v2876_v0 = vsub.f32 %v6705_v14, %v2875_v50 }
 0x2c7   :  { %4897 = vmatmul.mubr.f32.vlgmr.msra.gmra.mxu0 %v6464_v12  ;;  %4928 = vmatpush3.xpose.msra.mxu1 %v6453_v56  ;;  %v4680_v47 = vpop.f32.mrf.mxu0  ;;  %v1563_v56 = vadd.f32 %v6631_v8, %v1451_v25 }
 0x2c8   :  { %4935 = vmatpush3.xpose.msra.mxu0 %v6668_v54  ;;  %v4658_v11 = vpop.f32.mrf.mxu1  ;;  %4929 = vmatprep.subr.mxu1 %v6469_v44  ;;  %v2877_v41 = vand.u32 4294901760, %v2876_v0  ;;  %v6796_v0 = vsub.f32 %v2757_v45, %v6772_v19 }
 0x2c9   :  { %4936 = vmatprep.subr.mxu0 %v5205_v5  ;;  %4966 = vmatprep.mubr.msk.f32.mxu0 %vm5206_vm1, %v5205_v5  ;;  %v1672_v8 = vadd.f32 %v6650_v6, %v1563_v56  ;;  %v1570_v6 = vadd.f32 %v6644_v23, %v1457_v46  ;;  %v1463_v23 = vadd.f32 %v6625_v29, %v1320_v24  ;;  %v1197_v29 = vpop.permute.xlu1 %1196  ;;  %v6791_v11 = vand.u32 4294901760, %v2754_v40 }
 0x2ca   :  { %v6743_v59 = vpop.f32.mrf.mxu1  ;;  %v1330_v47 = vadd.f32 %v6614_v3, %v1197_v29  ;;  %v2751_v46 = vsel %vm2722_vm4, %v2713_v13, 0 }
 0x2cb   :  { %v1804_v26 = vpop.f32.mrf.mxu0  ;;  %4930 = vmatpush3.xpose.msra.mxu1 %v6469_v44  ;;  %v1799_v17 = vadd.f32 %v1798_v30, %v1672_v8  ;;  %v2883_v44 = vsub.f32 %v6718_v37, %v2882_v36  ;;  %v1680_v51 = vadd.f32 %v6678_v9, %v1570_v6  ;;  %v1577_v9 = vadd.f32 %v6655_v28, %v1463_v23  ;;  %v2711_v23 = vld [vmem:[%s7381_s2 + $0x30] sm:$0xff] }
 0x2cc   :  { %4937 = vmatpush3.xpose.msra.mxu0 %v6683_v60  ;;  %v4661_v48 = vpop.f32.mrf.mxu1  ;;  %4969 = vmatprep.subr.mxu1 %v5205_v5  ;;  %v1469_v3 = vadd.f32 %v6635_v43, %v1330_v47  ;;  %v6808_v43 = vsub.f32 %v2754_v40, %v6791_v11  ;;  %v6810_v63 = vand.u32 4294901760, %v2751_v46 }
 0x2cd   :  { %v4683_v32 = vpop.f32.mrf.mxu0  ;;  %4938 = vmatprep.subr.mxu0 %v5205_v5  ;;  %v1805_v30 = vadd.f32 %v1804_v26, %v1680_v51  ;;  %v2884_v25 = vand.u32 4294901760, %v2883_v44  ;;  %v1688_v58 = vadd.f32 %v6702_v10, %v1577_v9  ;;  %v2712_v26 = vld [vmem:[%s7381_s2 + $0x38] sm:$0xff]  ;;  %v2891_v48 = vand.u32 4294901760, %v2890_v2 }
 0x2ce   :  { %4932 = vmatmul.mubr.f32.vlgmr.msra.gmra.mxu1 %v6464_v12  ;;  %v1901_v55 = vpop.f32.mrf.mxu1  ;;  %v1584_v45 = vadd.f32 %v6676_v21, %v1469_v3  ;;  %v2903_v32 = vand.u32 4294901760, %v6796_v0  ;;  %v2748_v44 = vsel %vm2722_vm4, %v2712_v26, 0 }
 0x2cf   :  { %v1810_v18 = vpop.f32.mrf.mxu0  ;;  %v1902_v27 = vadd.f32 %v1901_v55, %v1799_v17  ;;  %4970 = vmatpush3.xpose.msra.mxu1 %v2870_v61  ;;  %5001 = vmatprep.mubr.msk.f32.mxu1 %vm5206_vm1, %v5205_v5  ;;  %v2897_v17 = vsub.f32 %v6770_v7, %v2896_v42  ;;  %v6829_v40 = vand.u32 4294901760, %v2748_v44 }
 0x2d0   :  { %4939 = vmatpush3.xpose.msra.mxu0 %v6700_v53  ;;  %v4711_v12 = vpop.f32.mrf.mxu1  ;;  %4971 = vmatprep.subr.mxu1 %v5205_v5  ;;  %v1811_v10 = vadd.f32 %v1810_v18, %v1688_v58  ;;  %v1696_v21 = vadd.f32 %v6720_v22, %v1584_v45  ;;  %v6827_v22 = vsub.f32 %v2751_v46, %v6810_v63  ;;  %v2709_v46 = vld [vmem:[%s7381_s2 + $0x20] sm:$0xff] }
 0x2d1   :  { %1929 = vst [vmem:[#allocation2] sm:$0xff] %v1902_v27  ;;  %v4686_v16 = vpop.f32.mrf.mxu0  ;;  %4940 = vmatprep.subr.mxu0 %v5205_v5  ;;  %v2910_v12 = vand.u32 4294901760, %v6808_v43  ;;  %v6845_v47 = vsub.f32 %v2748_v44, %v6829_v40 }
 0x2d2   :  { %v1907_v39 = vpop.f32.mrf.mxu1  ;;  %v2917_v2 = vand.u32 4294901760, %v6827_v22 }
 0x2d3   :  { %v1816_v28 = vpop.f32.mrf.mxu0  ;;  %v1908_v56 = vadd.f32 %v1907_v39, %v1805_v30  ;;  %4972 = vmatpush3.xpose.msra.mxu1 %v2877_v41  ;;  %v1340_v41 = vadd.f32 %v6623_v31, %v6690_v15  ;;  %v2898_v31 = vand.u32 4294901760, %v2897_v17  ;;  %v2904_v15 = vsub.f32 %v6796_v0, %v2903_v32 }
 0x2d4   :  { %4941 = vmatpush3.xpose.msra.mxu0 %v6722_v52  ;;  %v4714_v8 = vpop.f32.mrf.mxu1  ;;  %4973 = vmatprep.subr.mxu1 %v5205_v5  ;;  %v1817_v18 = vadd.f32 %v1816_v28, %v1696_v21  ;;  %v2745_v30 = vsel %vm2722_vm4, %v2711_v23, 0  ;;  %v2911_v39 = vsub.f32 %v6808_v43, %v2910_v12  ;;  %v2707_v23 = vld [vmem:[%s7381_s2 + $0x10] sm:$0xff] }
 0x2d5   :  { %1930 = vst [vmem:[#allocation2 + $0x8] sm:$0xff] %v1908_v56  ;;  %v4689_v61 = vpop.f32.mrf.mxu0  ;;  %4942 = vmatprep.subr.mxu0 %v5205_v5  ;;  %v1475_v13 = vadd.f32 %v6642_v38, %v1340_v41  ;;  %v2710_v38 = vld [vmem:[%s7381_s2 + $0x28] sm:$0xff]  ;;  %v2905_v58 = vand.u32 4294901760, %v2904_v15  ;;  %v6852_v28 = vand.u32 4294901760, %v2745_v30  ;;  %v2733_v15 = vsel %vm2722_vm4, %v2707_v23, 0 }
 0x2d6   :  { %v1913_v20 = vpop.f32.mrf.mxu1  ;;  %v2742_v56 = vsel %vm2722_vm4, %v2710_v38, 0  ;;  %v2912_v26 = vand.u32 4294901760, %v2911_v39  ;;  %v6919_v39 = vand.u32 4294901760, %v2733_v15 }
 0x2d7   :  { %v1822_v24 = vpop.f32.mrf.mxu0  ;;  %v1914_v6 = vadd.f32 %v1913_v20, %v1811_v10  ;;  %4974 = vmatpush3.xpose.msra.mxu1 %v2884_v25  ;;  %v1591_v16 = vadd.f32 %v6698_v33, %v1475_v13  ;;  %v2924_v10 = vand.u32 4294901760, %v6845_v47  ;;  %v6866_v45 = vsub.f32 %v2745_v30, %v6852_v28 }
 0x2d8   :  { %4943 = vmatpush3.xpose.msra.mxu0 %v6751_v35  ;;  %v4717_v55 = vpop.f32.mrf.mxu1  ;;  %4975 = vmatprep.subr.mxu1 %v5205_v5  ;;  %v6868_v20 = vand.u32 4294901760, %v2742_v56 }
 0x2d9   :  { %1931 = vst [vmem:[#allocation2 + $0x10] sm:$0xff] %v1914_v6  ;;  %4944 = vmatprep.subr.mxu0 %v5205_v5  ;;  %v4692_v51 = vpop.f32.mrf.mxu0  ;;  %v1704_v33 = vadd.f32 %v6743_v59, %v1591_v16  ;;  %v2918_v59 = vsub.f32 %v6827_v22, %v2917_v2  ;;  %v2925_v21 = vsub.f32 %v6845_v47, %v2924_v10  ;;  %v2931_v55 = vand.u32 4294901760, %v6866_v45 }
 0x2da   :  { %v1919_v27 = vpop.f32.mrf.mxu1  ;;  %v6880_v44 = vsub.f32 %v2742_v56, %v6868_v20  ;;  %v2705_v56 = vld [vmem:[%s7381_s2] sm:$0xff] }
 0x2db   :  { %4976 = vmatpush3.xpose.msra.mxu1 %v2891_v48  ;;  %v1920_v29 = vadd.f32 %v1919_v27, %v1817_v18  ;;  %v1823_v8 = vadd.f32 %v1822_v24, %v1704_v33  ;;  %v2739_v48 = vsel %vm2722_vm4, %v2709_v46, 0  ;;  %v2708_v24 = vld [vmem:[%s7381_s2 + $0x18] sm:$0xff]  ;;  %v2919_v6 = vand.u32 4294901760, %v2918_v59 }
 0x2dc   :  { %4945 = vmatpush3.xpose.msra.mxu0 %v6772_v19  ;;  %v4720_v9 = vpop.f32.mrf.mxu1  ;;  %4977 = vmatprep.subr.mxu1 %v5205_v5  ;;  %v6877_v17 = vand.u32 4294901760, %v2739_v48  ;;  %v2736_v41 = vsel %vm2722_vm4, %v2708_v24, 0  ;;  %v2926_v27 = vand.u32 4294901760, %v2925_v21  ;;  %v2932_v13 = vsub.f32 %v6866_v45, %v2931_v55 }
 0x2dd   :  { %4946 = vmatprep.subr.mxu0 %v5205_v5  ;;  %1932 = vst [vmem:[#allocation2 + $0x18] sm:$0xff] %v1920_v29  ;;  %v6896_v18 = vand.u32 4294901760, %v2736_v41  ;;  %v2706_v29 = vld [vmem:[%s7381_s2 + $0x8] sm:$0xff]  ;;  %v2721_v9 = vld [vmem:[%s7388_s9] sm:$0x7] }
 0x2de   :  { %v1925_v25 = vpop.f32.mrf.mxu1  ;;  %v6894_v51 = vsub.f32 %v2739_v48, %v6877_v17  ;;  %v2933_v38 = vand.u32 4294901760, %v2932_v13  ;;  %v2730_v33 = vsel %vm2722_vm4, %v2706_v29, 0  ;;  %v2727_v48 = vsel %vm2722_vm4, %v2705_v56, 0 }
 0x2df   :  { %4978 = vmatpush3.xpose.msra.mxu1 %v2898_v31  ;;  %v1926_v61 = vadd.f32 %v1925_v25, %v1823_v8  ;;  %v2938_v31 = vand.u32 4294901760, %v6880_v44  ;;  %v6913_v30 = vsub.f32 %v2736_v41, %v6896_v18  ;;  %v6936_v59 = vand.u32 4294901760, %v2730_v33 }
 0x2e0   :  { %4947 = vmatpush3.xpose.msra.mxu0 %v6791_v11  ;;  %v4723_v3 = vpop.f32.mrf.mxu1  ;;  %4979 = vmatprep.subr.mxu1 %v5205_v5  ;;  %v2945_v16 = vand.u32 4294901760, %v6894_v51  ;;  %v6950_v41 = vand.u32 4294901760, %v2727_v48 }
 0x2e1   :  { %4948 = vmatprep.subr.mxu0 %v5205_v5  ;;  %1933 = vst [vmem:[#allocation2 + $0x20] sm:$0x1f] %v1926_v61  ;;  %v2939_v25 = vsub.f32 %v6880_v44, %v2938_v31  ;;  %v2952_v3 = vand.u32 4294901760, %v6913_v30  ;;  %v6948_v21 = vsub.f32 %v2730_v33, %v6936_v59 }
 0x2e2   :  { %v2946_v46 = vsub.f32 %v6894_v51, %v2945_v16 }
 0x2e3   :  { %4980 = vmatpush3.xpose.msra.mxu1 %v2905_v58  ;;  %v2724_v58 = vsel %vm2722_vm4, %v2721_v9, 0  ;;  %v2940_v8 = vand.u32 4294901760, %v2939_v25 }
 0x2e4   :  { %4949 = vmatpush3.xpose.msra.mxu0 %v6810_v63  ;;  %4981 = vmatprep.subr.mxu1 %v5205_v5  ;;  %v6938_v61 = vand.u32 4294901760, %v2724_v58  ;;  %v2947_v24 = vand.u32 4294901760, %v2946_v46 }
 0x2e5   :  { %4950 = vmatprep.subr.mxu0 %v5205_v5 }
 0x2e7   :  { %4982 = vmatpush3.xpose.msra.mxu1 %v2912_v26  ;;  %v6934_v26 = vsub.f32 %v2733_v15, %v6919_v39  ;;  %v6960_v15 = vsub.f32 %v2727_v48, %v6950_v41 }
 0x2e8   :  { %4951 = vmatpush3.xpose.msra.mxu0 %v6829_v40  ;;  %4983 = vmatprep.subr.mxu1 %v5205_v5 }
 0x2e9   :  { %4952 = vmatprep.subr.mxu0 %v5205_v5  ;;  %v2959_v23 = vand.u32 4294901760, %v6934_v26  ;;  %v2973_v56 = vand.u32 4294901760, %v6960_v15 }
 0x2eb   :  { %4984 = vmatpush3.xpose.msra.mxu1 %v2919_v6  ;;  %v2953_v6 = vsub.f32 %v6913_v30, %v2952_v3  ;;  %v2960_v29 = vsub.f32 %v6934_v26, %v2959_v23  ;;  %v2974_v48 = vsub.f32 %v6960_v15, %v2973_v56 }
 0x2ec   :  { %4953 = vmatpush3.xpose.msra.mxu0 %v6852_v28  ;;  %4985 = vmatprep.subr.mxu1 %v5205_v5 }
 0x2ed   :  { %4954 = vmatprep.subr.mxu0 %v5205_v5  ;;  %v2954_v13 = vand.u32 4294901760, %v2953_v6  ;;  %v2961_v25 = vand.u32 4294901760, %v2960_v29 }
 0x2ef   :  { %4986 = vmatpush3.xpose.msra.mxu1 %v2926_v27  ;;  %v6954_v27 = vsub.f32 %v2724_v58, %v6938_v61 }
 0x2f0   :  { %4955 = vmatpush3.xpose.msra.mxu0 %v6868_v20  ;;  %4987 = vmatprep.subr.mxu1 %v5205_v5 }
 0x2f1   :  { %4956 = vmatprep.subr.mxu0 %v5205_v5  ;;  %v2857_v9 = vand.u32 4294901760, %v6954_v27 }
 0x2f3   :  { %4988 = vmatpush3.xpose.msra.mxu1 %v2933_v38  ;;  %v2966_v38 = vand.u32 4294901760, %v6948_v21  ;;  %v2858_v33 = vsub.f32 %v6954_v27, %v2857_v9 }
 0x2f4   :  { %4957 = vmatpush3.xpose.msra.mxu0 %v6877_v17  ;;  %4989 = vmatprep.subr.mxu1 %v5205_v5 }
 0x2f5   :  { %4958 = vmatprep.subr.mxu0 %v5205_v5  ;;  %v2967_v58 = vsub.f32 %v6948_v21, %v2966_v38  ;;  %v2859_v46 = vand.u32 4294901760, %v2858_v33 }
 0x2f7   :  { %4990 = vmatpush3.xpose.msra.mxu1 %v2940_v8  ;;  %v2968_v8 = vand.u32 4294901760, %v2967_v58 }
 0x2f8   :  { %4959 = vmatpush3.xpose.msra.mxu0 %v6896_v18  ;;  %4991 = vmatprep.subr.mxu1 %v5205_v5 }
 0x2f9   :  { %4960 = vmatprep.subr.mxu0 %v5205_v5 }
 0x2fb   :  { %4992 = vmatpush3.xpose.msra.mxu1 %v2947_v24  ;;  %v2975_v24 = vand.u32 4294901760, %v2974_v48  ;;  %v7164_v48 = vld [vmem:[#allocation2 + $0xd] sm:$0x1] }
 0x2fc   :  { %4961 = vmatpush3.xpose.msra.mxu0 %v6919_v39  ;;  %4993 = vmatprep.subr.mxu1 %v5205_v5 }
 0x2fd   :  { %4962 = vmatprep.subr.mxu0 %v5205_v5 }
 0x2ff   :  { %4994 = vmatpush3.xpose.msra.mxu1 %v2954_v13 }
 0x300   :  { %4963 = vmatpush3.xpose.msra.mxu0 %v6936_v59  ;;  %4995 = vmatprep.subr.mxu1 %v5205_v5 }
 0x301   :  { %4964 = vmatprep.subr.mxu0 %v5205_v5 }
 0x303   :  { %4996 = vmatpush3.xpose.msra.mxu1 %v2961_v25 }
 0x304   :  { %4965 = vmatpush3.xpose.msra.mxu0 %v6950_v41  ;;  %4997 = vmatprep.subr.mxu1 %v5205_v5 }
 0x305   :  { %5004 = vmatprep.subr.mxu0 %v5205_v5 }
 0x307   :  { %4967 = vmatmul.mubr.f32.vlgmr.msra.gmra.mxu0 %v2859_v46  ;;  %4998 = vmatpush3.xpose.msra.mxu1 %v2968_v8  ;;  %v7162_v8 = vld [vmem:[#allocation2 + $0xb] sm:$0x1] }
 0x308   :  { %5005 = vmatpush3.xpose.msra.mxu0 %v6688_v57  ;;  %4999 = vmatprep.subr.mxu1 %v5205_v5 }
 0x309   :  { %5006 = vmatprep.subr.mxu0 %v5205_v5  ;;  %5036 = vmatprep.mubr.msk.f32.mxu0 %vm5206_vm1, %v5205_v5 }
 0x30b   :  { %5000 = vmatpush3.xpose.msra.mxu1 %v2975_v24  ;;  %v7166_v24 = vld [vmem:[#allocation2 + $0xe] sm:$0x1] }
 0x30c   :  { %5007 = vmatpush3.xpose.msra.mxu0 %v6705_v14  ;;  %5039 = vmatprep.subr.mxu1 %v5205_v5 }
 0x30d   :  { %5008 = vmatprep.subr.mxu0 %v5205_v5 }
 0x30e   :  { %5002 = vmatmul.mubr.f32.vlgmr.msra.gmra.mxu1 %v6938_v61  ;;  %v4793_v57 = vpop.f32.mrf.mxu1 }
 0x30f   :  { %5040 = vmatpush3.xpose.msra.mxu1 %v6668_v54  ;;  %5071 = vmatprep.mubr.msk.f32.mxu1 %vm5206_vm1, %v5205_v5 }
 0x310   :  { %5009 = vmatpush3.xpose.msra.mxu0 %v6718_v37  ;;  %5041 = vmatprep.subr.mxu1 %v5205_v5  ;;  %v2267_v14 = vpop.f32.mrf.mxu1 }
 0x311   :  { %5010 = vmatprep.subr.mxu0 %v5205_v5 }
 0x313   :  { %5042 = vmatpush3.xpose.msra.mxu1 %v6683_v60 }
 0x314   :  { %5011 = vmatpush3.xpose.msra.mxu0 %v6746_v1  ;;  %5043 = vmatprep.subr.mxu1 %v5205_v5 }
 0x315   :  { %5012 = vmatprep.subr.mxu0 %v5205_v5 }
 0x317   :  { %5044 = vmatpush3.xpose.msra.mxu1 %v6700_v53 }
 0x318   :  { %5013 = vmatpush3.xpose.msra.mxu0 %v6770_v7  ;;  %5045 = vmatprep.subr.mxu1 %v5205_v5 }
 0x319   :  { %5014 = vmatprep.subr.mxu0 %v5205_v5 }
 0x31b   :  { %5046 = vmatpush3.xpose.msra.mxu1 %v6722_v52 }
 0x31c   :  { %5015 = vmatpush3.xpose.msra.mxu0 %v6796_v0  ;;  %5047 = vmatprep.subr.mxu1 %v5205_v5 }
 0x31d   :  { %5016 = vmatprep.subr.mxu0 %v5205_v5 }
 0x31f   :  { %5048 = vmatpush3.xpose.msra.mxu1 %v6751_v35 }
 0x320   :  { %5017 = vmatpush3.xpose.msra.mxu0 %v6808_v43  ;;  %5049 = vmatprep.subr.mxu1 %v5205_v5 }
 0x321   :  { %5018 = vmatprep.subr.mxu0 %v5205_v5 }
 0x323   :  { %5050 = vmatpush3.xpose.msra.mxu1 %v6772_v19 }
 0x324   :  { %5019 = vmatpush3.xpose.msra.mxu0 %v6827_v22  ;;  %5051 = vmatprep.subr.mxu1 %v5205_v5 }
 0x325   :  { %5020 = vmatprep.subr.mxu0 %v5205_v5 }
 0x327   :  { %5052 = vmatpush3.xpose.msra.mxu1 %v6791_v11 }
 0x328   :  { %5021 = vmatpush3.xpose.msra.mxu0 %v6845_v47  ;;  %5053 = vmatprep.subr.mxu1 %v5205_v5 }
 0x329   :  { %5022 = vmatprep.subr.mxu0 %v5205_v5 }
 0x32b   :  { %5054 = vmatpush3.xpose.msra.mxu1 %v6810_v63 }
 0x32c   :  { %5023 = vmatpush3.xpose.msra.mxu0 %v6866_v45  ;;  %5055 = vmatprep.subr.mxu1 %v5205_v5 }
 0x32d   :  { %5024 = vmatprep.subr.mxu0 %v5205_v5 }
 0x32f   :  { %5056 = vmatpush3.xpose.msra.mxu1 %v6829_v40 }
 0x330   :  { %5025 = vmatpush3.xpose.msra.mxu0 %v6880_v44  ;;  %5057 = vmatprep.subr.mxu1 %v5205_v5 }
 0x331   :  { %5026 = vmatprep.subr.mxu0 %v5205_v5 }
 0x333   :  { %5058 = vmatpush3.xpose.msra.mxu1 %v6852_v28 }
 0x334   :  { %5027 = vmatpush3.xpose.msra.mxu0 %v6894_v51  ;;  %5059 = vmatprep.subr.mxu1 %v5205_v5 }
 0x335   :  { %5028 = vmatprep.subr.mxu0 %v5205_v5 }
 0x337   :  { %5060 = vmatpush3.xpose.msra.mxu1 %v6868_v20 }
 0x338   :  { %5029 = vmatpush3.xpose.msra.mxu0 %v6913_v30  ;;  %5061 = vmatprep.subr.mxu1 %v5205_v5 }
 0x339   :  { %5030 = vmatprep.subr.mxu0 %v5205_v5 }
 0x33b   :  { %5062 = vmatpush3.xpose.msra.mxu1 %v6877_v17 }
 0x33c   :  { %5031 = vmatpush3.xpose.msra.mxu0 %v6934_v26  ;;  %5063 = vmatprep.subr.mxu1 %v5205_v5  ;;  %v3533_v26 = vld [vmem:[#allocation2] sm:$0x1] }
 0x33d   :  { %5032 = vmatprep.subr.mxu0 %v5205_v5 }
 0x33f   :  { %5064 = vmatpush3.xpose.msra.mxu1 %v6896_v18 }
 0x340   :  { %5033 = vmatpush3.xpose.msra.mxu0 %v6948_v21  ;;  %5065 = vmatprep.subr.mxu1 %v5205_v5 }
 0x341   :  { %5034 = vmatprep.subr.mxu0 %v5205_v5 }
 0x343   :  { %5066 = vmatpush3.xpose.msra.mxu1 %v6919_v39 }
 0x344   :  { %5035 = vmatpush3.xpose.msra.mxu0 %v6960_v15  ;;  %5067 = vmatprep.subr.mxu1 %v5205_v5 }
 0x345   :  { %5074 = vmatprep.subr.mxu0 %v5205_v5 }
 0x347   :  { %5037 = vmatmul.mubr.f32.vlgmr.msra.gmra.mxu0 %v6954_v27  ;;  %5068 = vmatpush3.xpose.msra.mxu1 %v6936_v59 }
 0x348   :  { %5075 = vmatpush3.xpose.msra.mxu0 %v2868_v49  ;;  %5069 = vmatprep.subr.mxu1 %v5205_v5 }
 0x349   :  { %5076 = vmatprep.subr.mxu0 %v5205_v5  ;;  %5106 = vmatprep.mubr.msk.f32.mxu0 %vm5206_vm1, %v5205_v5 }
 0x34b   :  { %5070 = vmatpush3.xpose.msra.mxu1 %v6950_v41 }
 0x34c   :  { %5077 = vmatpush3.xpose.msra.mxu0 %v2875_v50  ;;  %5109 = vmatprep.subr.mxu1 %v5205_v5 }
 0x34d   :  { %5078 = vmatprep.subr.mxu0 %v5205_v5 }
 0x34e   :  { %5072 = vmatmul.mubr.f32.vlgmr.msra.gmra.mxu1 %v2857_v9 }
 0x34f   :  { %5110 = vmatpush3.xpose.msra.mxu1 %v6668_v54  ;;  %5141 = vmatprep.mubr.msk.f32.mxu1 %vm5206_vm1, %v5205_v5  ;;  %v4758_v54 = vpop.f32.mrf.mxu0 }
 0x350   :  { %5079 = vmatpush3.xpose.msra.mxu0 %v2882_v36  ;;  %5111 = vmatprep.subr.mxu1 %v5205_v5  ;;  %v2117_v49 = vadd.f32 %v4758_v54, %v6680_v4 }
 0x351   :  { %5080 = vmatprep.subr.mxu0 %v5205_v5 }
 0x352   :  { %v2274_v36 = vadd.f32 %v4793_v57, %v2117_v49  ;;  %v7170_v57 = vld [vmem:[#allocation2 + $0x2] sm:$0x1] }
 0x353   :  { %5112 = vmatpush3.xpose.msra.mxu1 %v6683_v60  ;;  %v2106_v60 = vpop.f32.mrf.mxu0 }
 0x354   :  { %5081 = vmatpush3.xpose.msra.mxu0 %v2889_v62  ;;  %5113 = vmatprep.subr.mxu1 %v5205_v5  ;;  %v2107_v50 = vadd.f32 %v2106_v60, %v6665_v34 }
 0x355   :  { %5082 = vmatprep.subr.mxu0 %v5205_v5 }
 0x357   :  { %5114 = vmatpush3.xpose.msra.mxu1 %v6700_v53  ;;  %v4828_v53 = vpop.f32.mrf.mxu0 }
 0x358   :  { %5083 = vmatpush3.xpose.msra.mxu0 %v2896_v42  ;;  %5115 = vmatprep.subr.mxu1 %v5205_v5  ;;  %v2385_v7 = vadd.f32 %v4828_v53, %v2274_v36  ;;  %v7172_v53 = vld [vmem:[#allocation2 + $0x4] sm:$0x1] }
 0x359   :  { %5084 = vmatprep.subr.mxu0 %v5205_v5  ;;  %v2377_v37 = vpop.f32.mrf.mxu0 }
 0x35b   :  { %5116 = vmatpush3.xpose.msra.mxu1 %v6722_v52  ;;  %v4863_v52 = vpop.f32.mrf.mxu1 }
 0x35c   :  { %5085 = vmatpush3.xpose.msra.mxu0 %v2903_v32  ;;  %5117 = vmatprep.subr.mxu1 %v5205_v5 }
 0x35d   :  { %5086 = vmatprep.subr.mxu0 %v5205_v5 }
 0x35f   :  { %5118 = vmatpush3.xpose.msra.mxu1 %v6751_v35  ;;  %v2268_v35 = vadd.f32 %v2267_v14, %v2107_v50  ;;  %v7174_v14 = vld [vmem:[#allocation2 + $0x6] sm:$0x1] }
 0x360   :  { %5087 = vmatpush3.xpose.msra.mxu0 %v2910_v12  ;;  %5119 = vmatprep.subr.mxu1 %v5205_v5 }
 0x361   :  { %5088 = vmatprep.subr.mxu0 %v5205_v5  ;;  %v2378_v62 = vadd.f32 %v2377_v37, %v2268_v35  ;;  %v3619_v35 = vmul.f32 %v7166_v24, %v7162_v8 }
 0x363   :  { %5120 = vmatpush3.xpose.msra.mxu1 %v6772_v19  ;;  %v2473_v19 = vpop.f32.mrf.mxu1 }
 0x364   :  { %5089 = vmatpush3.xpose.msra.mxu0 %v2917_v2  ;;  %5121 = vmatprep.subr.mxu1 %v5205_v5  ;;  %v2474_v42 = vadd.f32 %v2473_v19, %v2378_v62  ;;  %v3604_v19 = vmul.f32 %v7172_v53, %v7170_v57 }
 0x365   :  { %5090 = vmatprep.subr.mxu0 %v5205_v5 }
 0x367   :  { %5122 = vmatpush3.xpose.msra.mxu1 %v6791_v11  ;;  %v2482_v11 = vadd.f32 %v4863_v52, %v2385_v7  ;;  %v7180_v52 = vld [vmem:[#allocation2 + $0x1] sm:$0x1]  ;;  %v3622_v7 = vmul.f32 %v7164_v48, %v7162_v8 }
 0x368   :  { %5091 = vmatpush3.xpose.msra.mxu0 %v2924_v10  ;;  %5123 = vmatprep.subr.mxu1 %v5205_v5  ;;  %v3601_v62 = vmul.f32 %v7172_v53, %v7180_v52 }
 0x369   :  { %5092 = vmatprep.subr.mxu0 %v5205_v5 }
 0x36b   :  { %5124 = vmatpush3.xpose.msra.mxu1 %v6810_v63 }
 0x36c   :  { %5093 = vmatpush3.xpose.msra.mxu0 %v2931_v55  ;;  %5125 = vmatprep.subr.mxu1 %v5205_v5 }
 0x36d   :  { %5094 = vmatprep.subr.mxu0 %v5205_v5 }
 0x36f   :  { %5126 = vmatpush3.xpose.msra.mxu1 %v6829_v40 }
 0x370   :  { %5095 = vmatpush3.xpose.msra.mxu0 %v2938_v31  ;;  %5127 = vmatprep.subr.mxu1 %v5205_v5 }
 0x371   :  { %5096 = vmatprep.subr.mxu0 %v5205_v5 }
 0x373   :  { %5128 = vmatpush3.xpose.msra.mxu1 %v6852_v28 }
 0x374   :  { %5097 = vmatpush3.xpose.msra.mxu0 %v2945_v16  ;;  %5129 = vmatprep.subr.mxu1 %v5205_v5 }
 0x375   :  { %5098 = vmatprep.subr.mxu0 %v5205_v5 }
 0x377   :  { %5130 = vmatpush3.xpose.msra.mxu1 %v6868_v20  ;;  %v3553_v20 = vld [vmem:[#allocation2 + $0xa] sm:$0x1] }
 0x378   :  { %5099 = vmatpush3.xpose.msra.mxu0 %v2952_v3  ;;  %5131 = vmatprep.subr.mxu1 %v5205_v5  ;;  %v7146_v55 = vadd.f32 1.0, %v3553_v20 }
 0x379   :  { %5100 = vmatprep.subr.mxu0 %v5205_v5 }
 0x37b   :  { %5132 = vmatpush3.xpose.msra.mxu1 %v6877_v17  ;;  %v3563_v17 = vld [vmem:[#allocation2 + $0xf] sm:$0x1] }
 0x37c   :  { %5101 = vmatpush3.xpose.msra.mxu0 %v2959_v23  ;;  %5133 = vmatprep.subr.mxu1 %v5205_v5  ;;  %v7148_v51 = vadd.f32 1.0, %v3563_v17 }
 0x37d   :  { %5102 = vmatprep.subr.mxu0 %v5205_v5 }
 0x37e   :  { %v3618_v49 = vmul.f32 %v7148_v51, %v7146_v55 }
 0x37f   :  { %5134 = vmatpush3.xpose.msra.mxu1 %v6896_v18 }
 0x380   :  { %5103 = vmatpush3.xpose.msra.mxu0 %v2966_v38  ;;  %5135 = vmatprep.subr.mxu1 %v5205_v5  ;;  %v7153_v38 = vadd.f32 1.0, %v3533_v26 }
 0x381   :  { %5104 = vmatprep.subr.mxu0 %v5205_v5 }
 0x382   :  { %v3603_v50 = vmul.f32 %v7174_v14, %v7153_v38 }
 0x383   :  { %5136 = vmatpush3.xpose.msra.mxu1 %v6919_v39 }
 0x384   :  { %5105 = vmatpush3.xpose.msra.mxu0 %v2973_v56  ;;  %5137 = vmatprep.subr.mxu1 %v5205_v5  ;;  %v7160_v56 = vld [vmem:[#allocation2 + $0x9] sm:$0x1] }
 0x385   :  { %v3621_v37 = vmul.f32 %v7148_v51, %v7160_v56 }
 0x387   :  { %5107 = vmatmul.mubr.f32.vlgmr.msra.gmra.mxu0 %v6938_v61  ;;  %5138 = vmatpush3.xpose.msra.mxu1 %v6936_v59  ;;  %v4898_v1 = vpop.f32.mrf.mxu0 }
 0x388   :  { %5139 = vmatprep.subr.mxu1 %v5205_v5  ;;  %v2607_v0 = vadd.f32 %v4898_v1, %v2482_v11  ;;  %v3620_v11 = vsub.f32 %v3618_v49, %v3619_v35 }
 0x389   :  { %v2600_v4 = vpop.f32.mrf.mxu0 }
 0x38a   :  { %v2601_v34 = vadd.f32 %v2600_v4, %v2474_v42  ;;  %v3623_v4 = vsub.f32 %v3621_v37, %v3622_v7  ;;  %v3605_v42 = vsub.f32 %v3603_v50, %v3604_v19 }
 0x38b   :  { %5140 = vmatpush3.xpose.msra.mxu1 %v6950_v41  ;;  %v3543_v41 = vld [vmem:[#allocation2 + $0x5] sm:$0x1] }
 0x38c   :  { %v7158_v58 = vadd.f32 1.0, %v3543_v41  ;;  %v7479_v41 = vmov 0  }
 0x38e   :  { %v4933_v43 = vpop.f32.mrf.mxu1  ;;  %5142 = vmatmul.mubr.f32.vlgmr.msra.gmra.mxu1 %v6938_v61  ;;  %v3600_v1 = vmul.f32 %v7158_v58, %v7153_v38 }
 0x38f   :  { %v2700_v63 = vadd.f32 %v4933_v43, %v2607_v0  ;;  %v3472_v0 = vlaneseq }
 0x390   :  { %v2693_v32 = vpop.f32.mrf.mxu1 }
 0x391   :  { %2704 = vst [vmem:[#allocation3 + $0x8] sm:$0xff] %v2700_v63  ;;  %v2694_v22 = vadd.f32 %v2693_v32, %v2601_v34  ;;  %v7202_v34 = vld [vmem:[#allocation2 + $0x3] sm:$0x1]  ;;  %v7204_v63 = vld [vmem:[#allocation2 + $0x7] sm:$0x1]  ;;  %v3602_v32 = vsub.f32 %v3600_v1, %v3601_v62 }
 0x392   :  { %v3607_v17 = vmul.f32 %v7172_v53, %v7202_v34  ;;  %v3613_v49 = vmul.f32 %v7158_v58, %v7202_v34  ;;  %v3612_v19 = vmul.f32 %v7204_v63, %v7180_v52 }
 0x393   :  { %2703 = vst [vmem:[#allocation3] sm:$0xff] %v2694_v22  ;;  %v3625_v22 = vmul.f32 %v7164_v48, %v7146_v55 }
 0x398   :  { %v3448_v5 = vld [vmem:[#allocation3 + $0xa] sm:$0x1]  ;;  %v3457_v40 = vld [vmem:[#allocation3 + $0xf] sm:$0x1] }
 0x399   :  { %v3449_v12 = vmax.f32 %v3448_v5, 0.0  ;;  %v3458_v47 = vmax.f32 %v3457_v40, 0.0 }
 0x39a   :  { %v3430_v2 = vld [vmem:[#allocation3] sm:$0x1]  ;;  %v3439_v28 = vld [vmem:[#allocation3 + $0x5] sm:$0x1] }
 0x39b   :  { %5152 = vrsqrt.f32 %v3449_v12  ;;  %v3431_v10 = vmax.f32 %v3430_v2, 0.0  ;;  %v3440_v45 = vmax.f32 %v3439_v28, 0.0  ;;  %vm3452_vm5 = vcmp.eq.f32.partialorder %v3449_v12, inf }
 0x39c   :  { %5154 = vrsqrt.f32 %v3458_v47  ;;  %vm3454_vm6 = vcmp.eq.f32.partialorder %v3449_v12, 0.0  ;;  %v3455_v30 = vand.u32 2147483648, %v3449_v12  ;;  %vm3461_vm9 = vcmp.eq.f32.partialorder %v3458_v47, inf }
 0x39d   :  { %5156 = vrsqrt.f32 %v3431_v10  ;;  %vm3434_vm7 = vcmp.eq.f32.partialorder %v3431_v10, inf  ;;  %vm3436_vm8 = vcmp.eq.f32.partialorder %v3431_v10, 0.0  ;;  %v3437_v61 = vand.u32 2147483648, %v3431_v10 }
 0x39e   :  { %5158 = vrsqrt.f32 %v3440_v45  ;;  %v3464_v21 = vand.u32 2147483648, %v3458_v47  ;;  %vm3443_vm10 = vcmp.eq.f32.partialorder %v3440_v45, inf  ;;  %vm3463_vm11 = vcmp.eq.f32.partialorder %v3458_v47, 0.0 }
 0x39f   :  { %v3446_v15 = vand.u32 2147483648, %v3440_v45  ;;  %vm3445_vm12 = vcmp.eq.f32.partialorder %v3440_v45, 0.0  ;;  %v3624_v28 = vmul.f32 %v7166_v24, %v7160_v56 }
 0x3a8   :  { %v5153_v44 = vpop.eup %5152 }
 0x3a9   :  { %v5155_v18 = vpop.eup %5154  ;;  %v3451_v31 = vmul.f32 %v5153_v44, %v3449_v12  ;;  %v7234_v44 = vld [vmem:[#allocation2 + $0x8] sm:$0x1] }
 0x3aa   :  { %v5157_v16 = vpop.eup %5156  ;;  %v3460_v39 = vmul.f32 %v5155_v18, %v3458_v47  ;;  %v7236_v18 = vld [vmem:[#allocation2 + $0xc] sm:$0x1]  ;;  %v3630_v1 = vmul.f32 %v7166_v24, %v7234_v44 }
 0x3ab   :  { %v5159_v3 = vpop.eup %5158  ;;  %v3433_v59 = vmul.f32 %v5157_v16, %v3431_v10  ;;  %v3453_v6 = vsel %vm3452_vm5, %v3449_v12, %v3451_v31  ;;  %v3473_v31 = vshrl.u32 %v3472_v0, 7  ;;  %v3626_v16 = vsub.f32 %v3624_v28, %v3625_v22  ;;  %v3484_v12 = vld [vmem:[#allocation3 + $0x4] sm:$0xf] }
 0x3ac   :  { %v3442_v23 = vmul.f32 %v5159_v3, %v3440_v45  ;;  %v3462_v27 = vsel %vm3461_vm9, %v3458_v47, %v3460_v39  ;;  %v3456_v29 = vsel %vm3454_vm6, %v3455_v30, %v3453_v6  ;;  %v3606_v47 = vmul.f32 %v7204_v63, %v7153_v38 }
 0x3ad   :  { %v3435_v13 = vsel %vm3434_vm7, %v3431_v10, %v3433_v59  ;;  %v7151_v9 = vsel %vm3463_vm11, %v3464_v21, %v3462_v27  ;;  %v3636_v10 = vmul.f32 %v3620_v11, %v3602_v32  ;;  %v3627_v39 = vmul.f32 %v7148_v51, %v7234_v44 }
 0x3ae   :  { %v7156_v25 = vsel %vm3436_vm8, %v3437_v61, %v3435_v13  ;;  %v3444_v33 = vsel %vm3443_vm10, %v3440_v45, %v3442_v23  ;;  %v3467_v60 = vmax.f32 %v3456_v29, %v7151_v9  ;;  %v3637_v45 = vmul.f32 %v3623_v4, %v3605_v42 }
 0x3af   :  { %v3447_v46 = vsel %vm3445_vm12, %v3446_v15, %v3444_v33  ;;  %v3608_v26 = vsub.f32 %v3606_v47, %v3607_v17  ;;  %v3610_v59 = vmul.f32 %v7158_v58, %v7170_v57  ;;  %v3628_v6 = vmul.f32 %v7236_v18, %v7162_v8 }
 0x3b0   :  { %v3466_v54 = vmax.f32 %v7156_v25, %v3447_v46  ;;  %v3638_v21 = vsub.f32 %v3636_v10, %v3637_v45  ;;  %v3609_v13 = vmul.f32 %v7174_v14, %v7180_v52  ;;  %v3474_v15 = vsub.s32 0, %v3473_v31  ;;  %v3470_v45 = vld [vmem:[#allocation3] sm:$0xf] }
 0x3b1   :  { %v3629_v33 = vsub.f32 %v3627_v39, %v3628_v6  ;;  %v3634_v11 = vmul.f32 %v7236_v18, %v7160_v56  ;;  %v3615_v42 = vmul.f32 %v7204_v63, %v7170_v57  ;;  %v3614_v32 = vsub.f32 %v3612_v19, %v3613_v49  ;;  %v3499_v39 = vld [vmem:[#allocation3 + $0x8] sm:$0xf]  ;;  %v3514_v6 = vld [vmem:[#allocation3 + $0xc] sm:$0xf] }
 0x3b2   :  { %v3468_v36 = vmax.f32 %v3466_v54, %v3467_v60  ;;  %v3639_v54 = vmul.f32 %v3626_v16, %v3608_v26  ;;  %v3616_v22 = vmul.f32 %v7174_v14, %v7202_v34 }
 0x3b4   :  { %vm3469_vm13 = vcmp.eq.f32.partialorder %v7156_v25, %v3468_v36  ;;  %vm3481_vm14 = vcmp.eq.f32.partialorder %v3447_v46, %v3468_v36  ;;  %vm3496_vm3 = vcmp.eq.f32.partialorder %v3456_v29, %v3468_v36  ;;  %vm3511_vm7 = vcmp.eq.f32.partialorder %v7151_v9, %v3468_v36 }
 0x3b5   :  { %vm3482_vm0 = vmxor %vm3469_vm13, %vm5207_vm15  ;;  %v3479_v5 = vsel %vm3469_vm13, %v7156_v25, 0.0  ;;  %v3471_v60 = vsel %vm3469_vm13, 1, %v7479_v41  ;;  %v3640_v35 = vadd.f32 %v3639_v54, %v3638_v21  ;;  %v3633_v36 = vmul.f32 %v7164_v48, %v7234_v44 }
 0x3b6   :  { %vm7198_vm1 = vmand %vm3481_vm14, %vm3482_vm0  ;;  %v3475_v62 = vrot.slane %v3471_v60, %v3474_v15  ;;  %v3617_v17 = vsub.f32 %v3615_v42, %v3616_v22  ;;  %vm3724_vm14 = vcmask 1040384   ;;  %vm3800_vm0 = vcmask 1042432  }
 0x3b7   :  { %v3493_v40 = vsel %vm7198_vm1, %v3447_v46, 0.0  ;;  %vm7217_vm2 = vmor %vm3469_vm13, %vm7198_vm1  ;;  %v3485_v23 = vsel %vm7198_vm1, 1, %v7479_v41  ;;  %v3631_v46 = vmul.f32 %v7236_v18, %v7146_v55  ;;  %v3635_v47 = vsub.f32 %v3633_v36, %v3634_v11 }
 0x3b8   :  { %v3494_v2 = vadd.f32 %v3493_v40, %v3479_v5  ;;  %vm3497_vm4 = vmxor %vm7217_vm2, %vm5207_vm15  ;;  %v3489_v37 = vrot.slane %v3485_v23, %v3474_v15  ;;  %vm3476_vm11 = vcmp.eq.s32.totalorder %v3475_v62, 1  ;;  %vm3802_vm1 = vcmask 1043456  }
 0x3b9   :  { %vm7228_vm5 = vmand %vm3496_vm3, %vm3497_vm4  ;;  %v3632_v25 = vsub.f32 %v3630_v1, %v3631_v46  ;;  %v3645_v26 = vmul.f32 %v3635_v47, %v3617_v17  ;;  %v7316_v17 = vld [vmem:[#allocation2 + $0x23] sm:$0x1]  ;;  %vm3806_vm3 = vcmask 1045504   ;;  %vm3808_vm4 = vcmask 1046528  }
 0x3ba   :  { %v3508_v30 = vsel %vm7228_vm5, %v3456_v29, 0.0  ;;  %vm3510_vm6 = vmor %vm7217_vm2, %vm7228_vm5  ;;  %v3500_v7 = vsel %vm7228_vm5, 1, %v7479_v41  ;;  %vm7284_vm10 = vcmp.eq.s32.totalorder %v3489_v37, 1  ;;  %vm3804_vm2 = vcmask 1044480  }
 0x3bb   :  { %v3509_v3 = vadd.f32 %v3508_v30, %v3494_v2  ;;  %vm3512_vm8 = vmxor %vm3510_vm6, %vm5207_vm15  ;;  %v3504_v43 = vrot.slane %v3500_v7, %v3474_v15  ;;  %v3643_v2 = vmul.f32 %v3632_v25, %v3614_v32  ;;  %v3491_v28 = vsel %vm7284_vm10, %v3484_v12, 0.0 }
 0x3bc   :  { %vm7250_vm9 = vmand %vm3511_vm7, %vm3512_vm8  ;;  %v3477_v30 = vsel %vm3476_vm11, %v3470_v45, 0.0  ;;  %vm3726_vm15 = vcmask 1041408  }
 0x3bd   :  { %v3523_v27 = vsel %vm7250_vm9, %v7151_v9, 0.0  ;;  %v3611_v9 = vsub.f32 %v3609_v13, %v3610_v59  ;;  %v3515_v40 = vsel %vm7250_vm9, 1, %v7479_v41  ;;  %vm3505_vm12 = vcmp.eq.s32.totalorder %v3504_v43, 1 }
 0x3be   :  { %v3524_v29 = vadd.f32 %v3523_v27, %v3509_v3  ;;  %v3519_v20 = vrot.slane %v3515_v40, %v3474_v15  ;;  %v3492_v3 = vadd.f32 %v3491_v28, %v3477_v30  ;;  %v3506_v59 = vsel %vm3505_vm12, %v3499_v39, 0.0 }
 0x3bf   :  { %v3641_v4 = vmul.f32 %v3629_v33, %v3611_v9 }
 0x3c0   :  { %v3525_v50 = vmax.f32 %v3524_v29, 0.1  ;;  %vm3520_vm13 = vcmp.eq.s32.totalorder %v3519_v20, 1  ;;  %v3507_v21 = vadd.f32 %v3506_v59, %v3492_v3 }
 0x3c1   :  { %v3642_v5 = vadd.f32 %v3641_v4, %v3640_v35  ;;  %v3521_v27 = vsel %vm3520_vm13, %v3514_v6, 0.0 }
 0x3c2   :  { %5160 = vrcp.f32 %v3525_v50  ;;  %v3522_v54 = vadd.f32 %v3521_v27, %v3507_v21 }
 0x3c3   :  { %v3644_v31 = vsub.f32 %v3642_v5, %v3643_v2 }
 0x3c5   :  { %v3646_v61 = vadd.f32 %v3645_v26, %v3644_v31  ;;  %v7319_v31 = vld [vmem:[#allocation2 + $0x24] sm:$0x1] }
 0x3c7   :  { %v2861_v10 = vpop.f32.mrf.mxu0  ;;  %v3647_v46 = vand.u32 2147483647, %v3646_v61 }
 0x3c9   :  { %v4968_v16 = vpop.f32.mrf.mxu0  ;;  %5162 = vlog2.f32 %v3647_v46 }
 0x3ca   :  { %v3656_v16 = vstv %s7391_s12 }
 0x3ce   :  { %v3012_v41 = vpop.f32.mrf.mxu1 }
 0x3cf   :  { %v5161_v23 = vpop.eup %5160  ;;  %v7295_v13 = vadd.f32 %v3012_v41, %v2861_v10 }
 0x3d0   :  { %v3527_v29 = vmul.f32 0.5, %v5161_v23  ;;  %v5003_v33 = vpop.f32.mrf.mxu1 }
 0x3d2   :  { %v3531_v60 = vrot.slane %v3527_v29, %v3474_v15 }
 0x3d4   :  { %v3532_v49 = vmul.f32 %v3531_v60, %v3522_v54 }
 0x3d6   :  { %v3567_v37 = vrot.slane %v3532_v49, 1  ;;  %v3571_v50 = vrot.slane %v3532_v49, 2  ;;  %v3565_v9 = vmul.f32 %v7153_v38, %v3532_v49  ;;  %v3575_v35 = vrot.slane %v3532_v49, 3  ;;  %v5163_v2 = vpop.eup %5162 }
 0x3d7   :  { %v3579_v7 = vmul.f32 %v7172_v53, %v3532_v49  ;;  %v3586_v62 = vmul.f32 %v7234_v44, %v3532_v49  ;;  %v3593_v36 = vmul.f32 %v7236_v18, %v3532_v49 }
 0x3d8   :  { %v3569_v1 = vmul.f32 %v3567_v37, %v7180_v52  ;;  %v3580_v19 = vmul.f32 %v3567_v37, %v7158_v58  ;;  %v3587_v25 = vmul.f32 %v3567_v37, %v7160_v56  ;;  %v3594_v15 = vmul.f32 %v3567_v37, %v7164_v48 }
 0x3d9   :  { %v3573_v4 = vmul.f32 %v3571_v50, %v7170_v57  ;;  %v3582_v38 = vmul.f32 %v3571_v50, %v7174_v14  ;;  %v3589_v0 = vmul.f32 %v3571_v50, %v7146_v55  ;;  %v3596_v58 = vmul.f32 %v3571_v50, %v7166_v24 }
 0x3da   :  { %v3570_v11 = vadd.f32 %v3569_v1, %v3565_v9  ;;  %v3581_v42 = vadd.f32 %v3580_v19, %v3579_v7  ;;  %v3588_v52 = vadd.f32 %v3587_v25, %v3586_v62  ;;  %v3595_v53 = vadd.f32 %v3594_v15, %v3593_v36 }
 0x3db   :  { %v3577_v56 = vmul.f32 %v3575_v35, %v7202_v34  ;;  %v3584_v18 = vmul.f32 %v3575_v35, %v7204_v63  ;;  %v3591_v22 = vmul.f32 %v3575_v35, %v7162_v8  ;;  %v3598_v14 = vmul.f32 %v3575_v35, %v7148_v51  ;;  %v7313_v63 = vld [vmem:[#allocation2 + $0x22] sm:$0x1] }
 0x3dc   :  { %v3574_v43 = vadd.f32 %v3573_v4, %v3570_v11  ;;  %v3583_v44 = vadd.f32 %v3582_v38, %v3581_v42  ;;  %v3590_v32 = vadd.f32 %v3589_v0, %v3588_v52  ;;  %v3597_v48 = vadd.f32 %v3596_v58, %v3595_v53 }
 0x3dd   :  { %v3649_v34 = vmul.f32 0.6931472, %v5163_v2 }
 0x3de   :  { %v3578_v57 = vadd.f32 %v3577_v56, %v3574_v43  ;;  %v3585_v5 = vadd.f32 %v3584_v18, %v3583_v44  ;;  %v3592_v40 = vadd.f32 %v3591_v22, %v3590_v32  ;;  %v3599_v12 = vadd.f32 %v3598_v14, %v3597_v48 }
 0x3df   :  { %v3653_v8 = vadd.f32 %v7313_v63, %v3649_v34  ;;  %v3662_v34 = vmul.f32 1.442695, %v7316_v17 }
 0x3e0   :  { %v3736_v55 = vmul.f32 %v3578_v57, %v3578_v57  ;;  %v3737_v47 = vmul.f32 %v3585_v5, %v3585_v5  ;;  %v3739_v28 = vmul.f32 %v3592_v40, %v3592_v40  ;;  %v3741_v45 = vmul.f32 %v3599_v12, %v3599_v12 }
 0x3e1   :  { %v3654_v51 = vadd.f32 %v3653_v8, %v7316_v17  ;;  %v3753_v39 = vmul.f32 %v3592_v40, %v3585_v5  ;;  %v3754_v3 = vmul.f32 %v3599_v12, %v3578_v57  ;;  %v3757_v26 = vmul.f32 %v3599_v12, %v3585_v5 }
 0x3e2   :  { %v3738_v24 = vadd.f32 %v3737_v47, %v3736_v55  ;;  %v3758_v59 = vmul.f32 %v3592_v40, %v3578_v57  ;;  %v3766_v61 = vmul.f32 %v3599_v12, %v3592_v40  ;;  %v3767_v6 = vmul.f32 %v3585_v5, %v3578_v57 }
 0x3e3   :  { %v3655_v30 = vadd.f32 %v3654_v51, %v7319_v31  ;;  %v3750_v29 = vadd.f32 %v3741_v45, %v3739_v28  ;;  %v3755_v46 = vsub.f32 %v3753_v39, %v3754_v3  ;;  %v3761_v60 = vadd.f32 %v3754_v3, %v3753_v39 }
 0x3e4   :  { %v3740_v10 = vadd.f32 %v3739_v28, %v3738_v24  ;;  %v3759_v54 = vadd.f32 %v3758_v59, %v3757_v26  ;;  %v3763_v37 = vadd.f32 %v3741_v45, %v3737_v47  ;;  %v3768_v50 = vsub.f32 %v3766_v61, %v3767_v6 }
 0x3e5   :  { %v3657_v41 = vadd.f32 %v3656_v16, %v3655_v30  ;;  %v3774_v9 = vadd.f32 %v3739_v28, %v3737_v47  ;;  %v3770_v36 = vsub.f32 %v3757_v26, %v3758_v59  ;;  %v3772_v15 = vadd.f32 %v3767_v6, %v3766_v61  ;;  %v3673_v59 = vld [vmem:[#allocation2 + $0x1a] sm:$0x1] }
 0x3e6   :  { %v3742_v20 = vadd.f32 %v3741_v45, %v3740_v10  ;;  %v3658_v45 = vmul.f32 1.442695, %v7313_v63  ;;  %v3666_v51 = vmul.f32 1.442695, %v7319_v31  ;;  %v3660_v31 = vstv %s3426_s17 }
 0x3e7   :  { %v3664_v26 = vstv %s3840_s18 }
 0x3e8   :  { %5164 = vlog2.f32 %v3742_v20 }
 0x3e9   :  { %5166 = vrcp.f32 %v3742_v20 }
 0x3ea   :  { %5168 = vpow2.f32 %v3658_v45 }
 0x3eb   :  { %5170 = vpow2.f32 %v3662_v34 }
 0x3ec   :  { %5172 = vpow2.f32 %v3666_v51 }
 0x3f5   :  { %v5165_v21 = vpop.eup %5164 }
 0x3f6   :  { %v5167_v23 = vpop.eup %5166  ;;  %v3744_v27 = vmul.f32 0.6931472, %v5165_v21 }
 0x3f7   :  { %v3749_v33 = vmul.f32 2.0, %v5167_v23  ;;  %v5169_v63 = vpop.eup %5168 }
 0x3f8   :  { %v3745_v49 = vmul.f32 2.0, %v3744_v27  ;;  %v5171_v17 = vpop.eup %5170  ;;  %v3661_v61 = vmul.f32 %v5169_v63, %v3660_v31  ;;  %v3675_v27 = vld [vmem:[#allocation2 + $0x1e] sm:$0x1] }
 0x3f9   :  { %v3751_v1 = vmul.f32 %v3750_v29, %v3749_v33  ;;  %v3756_v35 = vmul.f32 %v3755_v46, %v3749_v33  ;;  %v3760_v7 = vmul.f32 %v3759_v54, %v3749_v33  ;;  %v3762_v19 = vmul.f32 %v3761_v60, %v3749_v33  ;;  %v3674_v54 = vld [vmem:[#allocation2 + $0x1b] sm:$0x1] }
 0x3fa   :  { %v3746_v62 = vsub.f32 %v3657_v41, %v3745_v49  ;;  %v3764_v25 = vmul.f32 %v3763_v37, %v3749_v33  ;;  %v3769_v4 = vmul.f32 %v3768_v50, %v3749_v33  ;;  %v3775_v42 = vmul.f32 %v3774_v9, %v3749_v33  ;;  %v5173_v49 = vpop.eup %5172 }
 0x3fb   :  { %v3752_v11 = vsub.f32 1.0, %v3751_v1  ;;  %v3778_v38 = vrot.slane %v3756_v35, 7  ;;  %v3771_v0 = vmul.f32 %v3770_v36, %v3749_v33  ;;  %v3781_v53 = vrot.slane %v3760_v7, 6  ;;  %v3670_v7 = vld [vmem:[#allocation2 + $0x13] sm:$0x1] }
 0x3fc   :  { %3747 = vst [vmem:[%s7394_s15] sm:$0x1] %v3746_v62  ;;  %v3765_v52 = vsub.f32 1.0, %v3764_v25  ;;  %v3773_v58 = vmul.f32 %v3772_v15, %v3749_v33  ;;  %v3776_v43 = vsub.f32 1.0, %v3775_v42  ;;  %v3784_v44 = vrot.slane %v3762_v19, 5  ;;  %v3671_v19 = vld [vmem:[#allocation2 + $0x16] sm:$0x1] }
 0x3fd   :  { %v3798_v56 = vsel %vm3724_vm14, %v3752_v11, %v3778_v38  ;;  %v3790_v48 = vrot.slane %v3769_v4, 3  ;;  %v3793_v57 = vrot.slane %v3771_v0, 2  ;;  %v3665_v6 = vmul.f32 %v5171_v17, %v3664_v26  ;;  %v3672_v62 = vld [vmem:[#allocation2 + $0x17] sm:$0x1] }
 0x3fe   :  { %v3787_v18 = vrot.slane %v3765_v52, 4  ;;  %v3799_v32 = vsel %vm3726_vm15, %v3798_v56, %v3781_v53  ;;  %3811 = vst [vmem:[%s7392_s13 + $0x8] sm:$0x1] %v3776_v43  ;;  %v3796_v14 = vrot.slane %v3773_v58, 1  ;;  %v3694_v36 = vstv %s7343_s19 }
 0x3ff   :  { %v3801_v22 = vsel %vm3800_vm0, %v3799_v32, %v3784_v44  ;;  %v3702_v42 = vstv %s7349_s21  ;;  %v3696_v38 = vstv %s7345_s20  ;;  %v3704_v52 = vstv %s7351_s4 }
 0x400   :  { %v3803_v5 = vsel %vm3802_vm1, %v3801_v22, %v3787_v18  ;;  %v3710_v0 = vstv %s7353_s22  ;;  %v3712_v53 = vstv %s7355_s6  ;;  %v3699_v56 = vstv %s7347_s8 }
 0x401   :  { %v3805_v40 = vsel %vm3804_vm2, %v3803_v5, %v3790_v48  ;;  %v3707_v48 = vstv %s7357_s23  ;;  %v3715_v22 = vstv %s7359_s1 }
 0x402   :  { %v3807_v12 = vsel %vm3806_vm3, %v3805_v40, %v3793_v57 }
 0x403   :  { %v3809_v55 = vsel %vm3808_vm4, %v3807_v12, %v3796_v14 }
 0x404   :  { %3810 = vst [vmem:[%s7392_s13] sm:$0xff] %v3809_v55  ;;  %s7341_s13 = sld [smem:[#allocation9 + $0x2]] }
 0x407   :  { %v3116_v47 = vpop.f32.mrf.mxu0 }
 0x408   :  { %v3117_v2 = vadd.f32 %v3116_v47, %v7295_v13 }
 0x409   :  { %v5038_v24 = vpop.f32.mrf.mxu0 }
 0x40a   :  { %v3668_v37 = vstv %s7341_s13 }
 0x40b   :  { %v3669_v25 = vmul.f32 %v5173_v49, %v3668_v37 }
 0x40e   :  { %v3205_v28 = vpop.f32.mrf.mxu1 }
 0x40f   :  { %v3206_v30 = vadd.f32 %v3205_v28, %v3117_v2 }
 0x410   :  { %v5073_v10 = vpop.f32.mrf.mxu1 }
 0x447   :  { %v3324_v20 = vpop.f32.mrf.mxu0 }
 0x448   :  { %v3325_v16 = vadd.f32 %v3324_v20, %v3206_v30  ;;  %v3729_v30 = vld [vmem:[#allocation5] sm:$0x7] }
 0x449   :  { %v5108_v8 = vpop.f32.mrf.mxu0 }
 0x44e   :  { %v3411_v39 = vpop.f32.mrf.mxu1 }
 0x44f   :  { %v3412_v13 = vadd.f32 %v3411_v39, %v3325_v16 }
 0x450   :  { %v5143_v3 = vpop.f32.mrf.mxu1 }
 0x451   :  { %3415 = vst [vmem:[#allocation4] sm:$0x7] %v3412_v13  ;;  %v3732_v13 = vld [vmem:[#allocation5 + $0x3] sm:$0x7] }
 0x458   :  { %v3676_v21 = vld [vmem:[#allocation4] sm:$0x1]  ;;  %v3677_v41 = vld [vmem:[#allocation4 + $0x1] sm:$0x1]  ;;  %v3678_v23 = vld [vmem:[#allocation4 + $0x2] sm:$0x1] }
 0x459   :  { %v3679_v29 = vmul.f32 %v3676_v21, %v3661_v61  ;;  %v3680_v33 = vmul.f32 %v3677_v41, %v3673_v59  ;;  %v3684_v46 = vmul.f32 %v3677_v41, %v3665_v6  ;;  %v3685_v60 = vmul.f32 %v3678_v23, %v3675_v27 }
 0x45a   :  { %v3682_v9 = vmul.f32 %v3678_v23, %v3674_v54  ;;  %v3687_v58 = vmul.f32 %v3678_v23, %v3669_v25 }
 0x45b   :  { %v3681_v50 = vadd.f32 %v3680_v33, %v3679_v29  ;;  %v3686_v1 = vadd.f32 %v3685_v60, %v3684_v46 }
 0x45d   :  { %v3683_v35 = vadd.f32 %v3682_v9, %v3681_v50  ;;  %v3691_v4 = vmul.f32 %v3686_v1, %v3672_v62 }
 0x45f   :  { %v3688_v15 = vmul.f32 %v3683_v35, %v3670_v7  ;;  %v3690_v11 = vmul.f32 %v3683_v35, %v3671_v19  ;;  %v3695_v18 = vmul.f32 %v3694_v36, %v3683_v35  ;;  %v3703_v32 = vmul.f32 %v3702_v42, %v3683_v35 }
 0x460   :  { %v3711_v12 = vmul.f32 %v3710_v0, %v3683_v35 }
 0x461   :  { %v3689_v43 = vadd.f32 %v3688_v15, %v3686_v1  ;;  %v3692_v44 = vadd.f32 %v3691_v4, %v3690_v11 }
 0x463   :  { %v3693_v57 = vadd.f32 %v3692_v44, %v3687_v58  ;;  %v3697_v5 = vmul.f32 %v3696_v38, %v3689_v43  ;;  %v3705_v14 = vmul.f32 %v3704_v52, %v3689_v43  ;;  %v3713_v40 = vmul.f32 %v3712_v53, %v3689_v43 }
 0x465   :  { %v3698_v55 = vadd.f32 %v3697_v5, %v3695_v18  ;;  %v3700_v47 = vmul.f32 %v3699_v56, %v3693_v57  ;;  %v3706_v2 = vadd.f32 %v3705_v14, %v3703_v32  ;;  %v3708_v24 = vmul.f32 %v3707_v48, %v3693_v57 }
 0x466   :  { %v3714_v28 = vadd.f32 %v3713_v40, %v3711_v12  ;;  %v3716_v10 = vmul.f32 %v3715_v22, %v3693_v57 }
 0x467   :  { %v3701_v45 = vadd.f32 %v3700_v47, %v3698_v55  ;;  %v3709_v34 = vadd.f32 %v3708_v24, %v3706_v2 }
 0x468   :  { %v3717_v20 = vadd.f32 %v3716_v10, %v3714_v28 }
 0x469   :  { %v3719_v8 = vrot.slane %v3709_v34, 7 }
 0x46a   :  { %v3722_v51 = vrot.slane %v3717_v20, 6 }
 0x46b   :  { %v3725_v16 = vsel %vm3724_vm14, %v3701_v45, %v3719_v8 }
 0x46c   :  { %v3727_v39 = vsel %vm3726_vm15, %v3725_v16, %v3722_v51 }
 0x46d   :  { %3728 = vst [vmem:[%s7393_s14] sm:$0x7] %v3727_v39  ;;  %v3730_v3 = vadd.f32 %v3729_v30, %v3727_v39  ;;  %v3733_v63 = vmul.f32 %v3727_v39, %v3727_v39 }
 0x46f   :  { %3731 = vst [vmem:[#allocation5] sm:$0x7] %v3730_v3  ;;  %v3734_v17 = vadd.f32 %v3733_v63, %v3732_v13 }
 0x471   :  { %3735 = vst [vmem:[#allocation5 + $0x3] sm:$0x7] %v3734_v17 }
 0x478   :  { %v3812_v31 = vld [vmem:[#allocation5] sm:$0x3f] }
 0x479   :  { %3813 = vst [vmem:[%s7395_s16] sm:$0x3f] %v3812_v31 }
 0x47a   :  { %3830 = vsyncpa [#allocation8], 1 }
 0x47b   :  { %3831 = vsyncpa [#allocation10], 1 }

</bundles_post_ra>
